<compile_context>
chip_gen: v5e
topology: v5e:2x2
jax: 0.10.0
libtpu: 0.0.40
codegen_flags: <defaults>
</compile_context>

<pallas_src>
import math

import jax
import jax.numpy as jnp
from jax import lax
from jax.experimental import pallas as pl
from jax.experimental.pallas import tpu as pltpu

CONV_CHANNELS = [1, 16, 32, 64, 128]
OUTPUT_LEN = 50          # hard-coded in the PyTorch module
KSIZE = 5                # conv kernel size, padding = 2
PAD = 2
CMAX = 128               # all conv channel dims zero-padded to full lane width


# ----------------------------------------------------------------------------
# Fused kernel: one grid step == one batch element, everything stays in VMEM.
# ----------------------------------------------------------------------------
def _fused_kernel(x_ref, w1, b1, w2, b2, w3, b3, w4, b4, fcw_ref, fcb_ref,
                  o_ref, pbuf, flat_ref):
    # x_ref : (1, L, 1)      input, channels-last, one batch element
    # wN    : (5, 128, 128)  conv weights, tap-major, cin/cout zero-padded
    # bN    : (1, 128)       conv biases, zero-padded
    # fcw   : (O, 6400)      FC weight, feature axis reordered to p*128 + c
    # fcb   : (1, O)
    # o_ref : (1, 1, O)      output logits
    # pbuf  : (56, 128)      zero-padded activation slab (VMEM scratch)
    # flat  : (1, 6400)      flattened pooled features (VMEM scratch)
    L = x_ref.shape[1]

    # Zero the slab every step (keeps conv borders exact; megacore-safe since it
    # does not depend on program_id), then stage the input into lane 0.
    pbuf[...] = jnp.zeros_like(pbuf)
    pbuf[pl.ds(PAD, L), pl.ds(0, 1)] = x_ref[0]

    # 4 x (Conv1d(k=5, pad=2) + ReLU); each conv = 5 shifted full-lane matmuls
    # with f32 accumulation on the MXU.
    for w_ref, b_ref in ((w1, b1), (w2, b2), (w3, b3), (w4, b4)):
        acc = jnp.dot(pbuf[pl.ds(0, L), :], w_ref[0],
                      preferred_element_type=jnp.float32)
        for k in range(1, KSIZE):
            acc = acc + jnp.dot(pbuf[pl.ds(k, L), :], w_ref[k],
                                preferred_element_type=jnp.float32)
        y = jnp.maximum(acc + b_ref[...], 0.0)          # (L, 128); pad lanes stay 0
        pbuf[pl.ds(PAD, L), :] = y                      # full-lane store; pad rows stay 0

    # Dropout(p=0.5): identity at inference.
    # AvgPool1d(kernel = max(1, L // 50), stride = kernel) fused with the
    # channels-last flatten into the (1, 6400) feature row (j = p*128 + c).
    P = flat_ref.shape[1] // CMAX                       # 50 (pooled length)
    kpool = max(1, L // P)                              # 1 for L = 50
    inv_k = 1.0 / kpool
    for p in range(P):
        row = pbuf[pl.ds(PAD + p * kpool, 1), :]
        for r in range(1, kpool):
            row = row + pbuf[pl.ds(PAD + p * kpool + r, 1), :]
        if kpool > 1:
            row = row * inv_k
        flat_ref[pl.ds(0, 1), pl.ds(p * CMAX, CMAX)] = row   # lane-group aligned

    # Final Linear: (1, 6400) . (O, 6400)^T on the MXU.
    logits = lax.dot_general(flat_ref[...], fcw_ref[...],
                             dimension_numbers=(((1,), (1,)), ((), ())),
                             preferred_element_type=jnp.float32)   # (1, O)
    o_ref[0] = logits + fcb_ref[...]


# ----------------------------------------------------------------------------
# Parameters (PyTorch-default init), layouts pre-baked for the kernel.
# ----------------------------------------------------------------------------
def init_params(key, out_size):
    params = {"convs": []}
    for cin, cout in zip(CONV_CHANNELS[:-1], CONV_CHANNELS[1:]):
        key, k1, k2 = jax.random.split(key, 3)
        s = 1.0 / math.sqrt(cin * KSIZE)
        w_pt = jax.random.uniform(k1, (cout, cin, KSIZE), jnp.float32, -s, s)
        b_pt = jax.random.uniform(k2, (cout,), jnp.float32, -s, s)
        w_k = jnp.transpose(w_pt, (2, 1, 0))                    # (5, cin, cout)
        w_k = jnp.pad(w_k, ((0, 0), (0, CMAX - cin), (0, CMAX - cout)))
        b_k = jnp.pad(b_pt, (0, CMAX - cout)).reshape(1, CMAX)
        params["convs"].append((w_k, b_k))

    C = CONV_CHANNELS[-1]
    F = C * OUTPUT_LEN                                          # 128 * 50 = 6400
    key, k1, k2 = jax.random.split(key, 3)
    s = 1.0 / math.sqrt(F)
    fc_w_pt = jax.random.uniform(k1, (out_size, F), jnp.float32, -s, s)
    fc_b = jax.random.uniform(k2, (out_size,), jnp.float32, -s, s)
    # Fold the NCW flatten (f = c*50 + p) into the weight so the kernel can use
    # the channels-last flatten (j = p*128 + c) directly.
    w_fc = fc_w_pt.reshape(out_size, C, OUTPUT_LEN)             # [o, c, p]
    w_fc = jnp.transpose(w_fc, (0, 2, 1)).reshape(out_size, F)  # [o, p*128 + c]
    params["fc_w"] = w_fc                                       # (O, 6400): 6400 on lanes
    params["fc_b"] = fc_b.reshape(1, out_size)
    return params


# ----------------------------------------------------------------------------
# Forward pass (single fused pallas_call)
# ----------------------------------------------------------------------------
def dynamic_pooling_cnn(x, params):
    """x: (B, L) f32 -> (B, out_size) f32. Mirrors DynamicPoolingCNN.forward (eval)."""
    B, L = x.shape
    out_size = params["fc_b"].shape[-1]
    kpool = max(1, L // OUTPUT_LEN)
    # The module's fc requires the pooled length to be exactly 50.
    assert L // kpool == OUTPUT_LEN, "fc expects 128*50 features (as in PyTorch)"

    x3 = x[:, :, None]                                          # unsqueeze, channels-last

    conv_ws = [w for (w, _) in params["convs"]]
    conv_bs = [b for (_, b) in params["convs"]]
    fc_w, fc_b = params["fc_w"], params["fc_b"]

    args = [x3]
    in_specs = [pl.BlockSpec((1, L, 1), lambda i: (i, 0, 0))]
    for w, b in zip(conv_ws, conv_bs):
        args += [w, b]
        in_specs += [pl.BlockSpec(w.shape, lambda i: (0, 0, 0)),
                     pl.BlockSpec(b.shape, lambda i: (0, 0))]
    args += [fc_w, fc_b]
    in_specs += [pl.BlockSpec(fc_w.shape, lambda i: (0, 0)),
                 pl.BlockSpec(fc_b.shape, lambda i: (0, 0))]

    pbuf_rows = ((L + 2 * PAD + 7) // 8) * 8                    # 56 for L = 50

    real_conv_flops = 2 * B * L * KSIZE * sum(
        ci * co for ci, co in zip(CONV_CHANNELS[:-1], CONV_CHANNELS[1:]))
    flops = real_conv_flops + 2 * B * fc_w.shape[1] * out_size
    bytes_accessed = 4 * (x.size + B * out_size + fc_w.size + fc_b.size
                          + sum(w.size + b.size for w, b in zip(conv_ws, conv_bs)))

    out3 = pl.pallas_call(
        _fused_kernel,
        out_shape=jax.ShapeDtypeStruct((B, 1, out_size), jnp.float32),
        grid=(B,),
        in_specs=in_specs,
        out_specs=pl.BlockSpec((1, 1, out_size), lambda i: (i, 0, 0)),
        scratch_shapes=[
            pltpu.VMEM((pbuf_rows, CMAX), jnp.float32),               # padded acts
            pltpu.VMEM((1, CMAX * OUTPUT_LEN), jnp.float32),          # flat features
        ],
        compiler_params=pltpu.CompilerParams(
            dimension_semantics=("parallel",)),
        cost_estimate=pl.CostEstimate(flops=flops, transcendentals=0,
                                      bytes_accessed=bytes_accessed),
    )(*args)
    return out3[:, 0, :]


# ----------------------------------------------------------------------------
# Pure-JAX reference (same math, channels-last) for a correctness check.
# ----------------------------------------------------------------------------
def _reference(x, params):
    B, L = x.shape
    h = x[:, :, None].astype(jnp.float32)                       # (B, L, 1)
    for (w_k, b_k), cin, cout in zip(params["convs"],
                                     CONV_CHANNELS[:-1], CONV_CHANNELS[1:]):
        hp = jnp.pad(h, ((0, 0), (PAD, PAD), (0, 0)))
        acc = jnp.zeros((B, L, cout), jnp.float32)
        for k in range(KSIZE):
            acc = acc + jnp.einsum("blc,co->blo", hp[:, k:k + L, :],
                                   w_k[k, :cin, :cout])
        h = jnp.maximum(acc + b_k[0, :cout], 0.0)
    kpool = max(1, L // OUTPUT_LEN)
    h = h.reshape(B, OUTPUT_LEN, kpool, CONV_CHANNELS[-1]).mean(axis=2)
    feats = h.reshape(B, -1)                                    # j = p*128 + c
    return feats @ params["fc_w"].T + params["fc_b"][0]


if __name__ == "__main__":
    key = jax.random.PRNGKey(0)
    kx, kp = jax.random.split(key)

    B, L, out_size = 2, 50, 10                                  # in_size = L = 50
    x = jax.random.normal(kx, (B, L), jnp.float32)
    params = init_params(kp, out_size)

    y = dynamic_pooling_cnn(x, params)
    jax.block_until_ready(y)
    assert y.shape == (B, out_size) and y.dtype == jnp.float32
    assert bool(jnp.all(jnp.isfinite(y)))

    ref = _reference(x, params)
    assert float(jnp.max(jnp.abs(y - ref))) < 5e-2

    print("KERNEL_OK")
</pallas_src>

<mosaic_0001>
module attributes {stable_mosaic.version = 11 : i64} {
  func.func @_fused_kernel(%arg0: i32, %arg1: memref<1x50x1xf32, #tpu.memory_space<vmem>>, %arg2: memref<5x128x128xf32, #tpu.memory_space<vmem>>, %arg3: memref<1x128xf32, #tpu.memory_space<vmem>>, %arg4: memref<5x128x128xf32, #tpu.memory_space<vmem>>, %arg5: memref<1x128xf32, #tpu.memory_space<vmem>>, %arg6: memref<5x128x128xf32, #tpu.memory_space<vmem>>, %arg7: memref<1x128xf32, #tpu.memory_space<vmem>>, %arg8: memref<5x128x128xf32, #tpu.memory_space<vmem>>, %arg9: memref<1x128xf32, #tpu.memory_space<vmem>>, %arg10: memref<10x6400xf32, #tpu.memory_space<vmem>>, %arg11: memref<1x10xf32, #tpu.memory_space<vmem>>, %arg12: memref<1x1x10xf32, #tpu.memory_space<vmem>>, %arg13: memref<56x128xf32, #tpu.memory_space<vmem>>, %arg14: memref<1x6400xf32, #tpu.memory_space<vmem>>) attributes {dimension_semantics = [#tpu.dimension_semantics<parallel>], iteration_bounds = array<i64: 2>, scalar_prefetch = 0 : i64, scratch_operands = 2 : i64, tpu.core_type = #tpu.core_type<tc>, window_params = [{transform_indices = @transform_0, window_bounds = array<i64: 1, 50, 1>}, {pipeline_mode = #tpu.pipeline_mode<synchronous>, transform_indices = @transform_1, window_bounds = array<i64: 5, 128, 128>}, {pipeline_mode = #tpu.pipeline_mode<synchronous>, transform_indices = @transform_2, window_bounds = array<i64: 1, 128>}, {pipeline_mode = #tpu.pipeline_mode<synchronous>, transform_indices = @transform_3, window_bounds = array<i64: 5, 128, 128>}, {pipeline_mode = #tpu.pipeline_mode<synchronous>, transform_indices = @transform_4, window_bounds = array<i64: 1, 128>}, {pipeline_mode = #tpu.pipeline_mode<synchronous>, transform_indices = @transform_5, window_bounds = array<i64: 5, 128, 128>}, {pipeline_mode = #tpu.pipeline_mode<synchronous>, transform_indices = @transform_6, window_bounds = array<i64: 1, 128>}, {pipeline_mode = #tpu.pipeline_mode<synchronous>, transform_indices = @transform_7, window_bounds = array<i64: 5, 128, 128>}, {pipeline_mode = #tpu.pipeline_mode<synchronous>, transform_indices = @transform_8, window_bounds = array<i64: 1, 128>}, {pipeline_mode = #tpu.pipeline_mode<synchronous>, transform_indices = @transform_9, window_bounds = array<i64: 10, 6400>}, {pipeline_mode = #tpu.pipeline_mode<synchronous>, transform_indices = @transform_10, window_bounds = array<i64: 1, 10>}, {transform_indices = @transform_11, window_bounds = array<i64: 1, 1, 10>}]} {
    %cst = arith.constant 0.000000e+00 : f32
    %0 = vector.broadcast %cst : f32 to vector<56x128xf32>
    %c0 = arith.constant 0 : index
    %c0_0 = arith.constant 0 : index
    %1 = vector.load %arg13[%c0, %c0_0] : memref<56x128xf32, #tpu.memory_space<vmem>>, vector<56x128xf32>
    tpu.vector_store %arg13[%c0, %c0_0], %0 {strides = array<i32>} : memref<56x128xf32, #tpu.memory_space<vmem>>, vector<56x128xf32>,
    %c0_1 = arith.constant 0 : index
    %c0_2 = arith.constant 0 : index
    %c0_3 = arith.constant 0 : index
    %2 = vector.load %arg1[%c0_1, %c0_2, %c0_3] : memref<1x50x1xf32, #tpu.memory_space<vmem>>, vector<1x50x1xf32>
    %3 = vector.shape_cast %2 : vector<1x50x1xf32> to vector<50x1xf32>
    %c2 = arith.constant 2 : index
    %c0_4 = arith.constant 0 : index
    %4 = vector.load %arg13[%c2, %c0_4] : memref<56x128xf32, #tpu.memory_space<vmem>>, vector<50x1xf32>
    tpu.vector_store %arg13[%c2, %c0_4], %3 {strides = array<i32>} : memref<56x128xf32, #tpu.memory_space<vmem>>, vector<50x1xf32>,
    %c0_5 = arith.constant 0 : index
    %c0_6 = arith.constant 0 : index
    %5 = vector.load %arg13[%c0_5, %c0_6] : memref<56x128xf32, #tpu.memory_space<vmem>>, vector<50x128xf32>
    %c0_7 = arith.constant 0 : index
    %c0_8 = arith.constant 0 : index
    %c0_9 = arith.constant 0 : index
    %6 = vector.load %arg2[%c0_7, %c0_8, %c0_9] : memref<5x128x128xf32, #tpu.memory_space<vmem>>, vector<1x128x128xf32>
    %7 = vector.shape_cast %6 : vector<1x128x128xf32> to vector<128x128xf32>
    %cst_10 = arith.constant dense<0.000000e+00> : vector<50x128xf32>
    %8 = tpu.matmul %5, %7, %cst_10 {dimension_numbers = #tpu.dot_dimension_numbers<[1], [0], [0], [1], [0, 0, 1, 1], [], []>} : vector<50x128xf32>, vector<128x128xf32>, vector<50x128xf32> -> vector<50x128xf32>
    %c1 = arith.constant 1 : index
    %c0_11 = arith.constant 0 : index
    %9 = vector.load %arg13[%c1, %c0_11] : memref<56x128xf32, #tpu.memory_space<vmem>>, vector<50x128xf32>
    %c1_12 = arith.constant 1 : index
    %c0_13 = arith.constant 0 : index
    %c0_14 = arith.constant 0 : index
    %10 = vector.load %arg2[%c1_12, %c0_13, %c0_14] : memref<5x128x128xf32, #tpu.memory_space<vmem>>, vector<1x128x128xf32>
    %11 = vector.shape_cast %10 : vector<1x128x128xf32> to vector<128x128xf32>
    %cst_15 = arith.constant dense<0.000000e+00> : vector<50x128xf32>
    %12 = tpu.matmul %9, %11, %cst_15 {dimension_numbers = #tpu.dot_dimension_numbers<[1], [0], [0], [1], [0, 0, 1, 1], [], []>} : vector<50x128xf32>, vector<128x128xf32>, vector<50x128xf32> -> vector<50x128xf32>
    %13 = arith.addf %8, %12 : vector<50x128xf32>
    %c2_16 = arith.constant 2 : index
    %c0_17 = arith.constant 0 : index
    %14 = vector.load %arg13[%c2_16, %c0_17] : memref<56x128xf32, #tpu.memory_space<vmem>>, vector<50x128xf32>
    %c2_18 = arith.constant 2 : index
    %c0_19 = arith.constant 0 : index
    %c0_20 = arith.constant 0 : index
    %15 = vector.load %arg2[%c2_18, %c0_19, %c0_20] : memref<5x128x128xf32, #tpu.memory_space<vmem>>, vector<1x128x128xf32>
    %16 = vector.shape_cast %15 : vector<1x128x128xf32> to vector<128x128xf32>
    %cst_21 = arith.constant dense<0.000000e+00> : vector<50x128xf32>
    %17 = tpu.matmul %14, %16, %cst_21 {dimension_numbers = #tpu.dot_dimension_numbers<[1], [0], [0], [1], [0, 0, 1, 1], [], []>} : vector<50x128xf32>, vector<128x128xf32>, vector<50x128xf32> -> vector<50x128xf32>
    %18 = arith.addf %13, %17 : vector<50x128xf32>
    %c3 = arith.constant 3 : index
    %c0_22 = arith.constant 0 : index
    %19 = vector.load %arg13[%c3, %c0_22] : memref<56x128xf32, #tpu.memory_space<vmem>>, vector<50x128xf32>
    %c3_23 = arith.constant 3 : index
    %c0_24 = arith.constant 0 : index
    %c0_25 = arith.constant 0 : index
    %20 = vector.load %arg2[%c3_23, %c0_24, %c0_25] : memref<5x128x128xf32, #tpu.memory_space<vmem>>, vector<1x128x128xf32>
    %21 = vector.shape_cast %20 : vector<1x128x128xf32> to vector<128x128xf32>
    %cst_26 = arith.constant dense<0.000000e+00> : vector<50x128xf32>
    %22 = tpu.matmul %19, %21, %cst_26 {dimension_numbers = #tpu.dot_dimension_numbers<[1], [0], [0], [1], [0, 0, 1, 1], [], []>} : vector<50x128xf32>, vector<128x128xf32>, vector<50x128xf32> -> vector<50x128xf32>
    %23 = arith.addf %18, %22 : vector<50x128xf32>
    %c4 = arith.constant 4 : index
    %c0_27 = arith.constant 0 : index
    %24 = vector.load %arg13[%c4, %c0_27] : memref<56x128xf32, #tpu.memory_space<vmem>>, vector<50x128xf32>
    %c4_28 = arith.constant 4 : index
    %c0_29 = arith.constant 0 : index
    %c0_30 = arith.constant 0 : index
    %25 = vector.load %arg2[%c4_28, %c0_29, %c0_30] : memref<5x128x128xf32, #tpu.memory_space<vmem>>, vector<1x128x128xf32>
    %26 = vector.shape_cast %25 : vector<1x128x128xf32> to vector<128x128xf32>
    %cst_31 = arith.constant dense<0.000000e+00> : vector<50x128xf32>
    %27 = tpu.matmul %24, %26, %cst_31 {dimension_numbers = #tpu.dot_dimension_numbers<[1], [0], [0], [1], [0, 0, 1, 1], [], []>} : vector<50x128xf32>, vector<128x128xf32>, vector<50x128xf32> -> vector<50x128xf32>
    %28 = arith.addf %23, %27 : vector<50x128xf32>
    %c0_32 = arith.constant 0 : index
    %c0_33 = arith.constant 0 : index
    %29 = vector.load %arg3[%c0_32, %c0_33] : memref<1x128xf32, #tpu.memory_space<vmem>>, vector<1x128xf32>
    %30 = vector.broadcast %29 : vector<1x128xf32> to vector<50x128xf32>
    %31 = arith.addf %28, %30 : vector<50x128xf32>
    %cst_34 = arith.constant 0.000000e+00 : f32
    %32 = vector.broadcast %cst_34 : f32 to vector<50x128xf32>
    %33 = arith.maximumf %31, %32 : vector<50x128xf32>
    %c2_35 = arith.constant 2 : index
    %c0_36 = arith.constant 0 : index
    %34 = vector.load %arg13[%c2_35, %c0_36] : memref<56x128xf32, #tpu.memory_space<vmem>>, vector<50x128xf32>
    tpu.vector_store %arg13[%c2_35, %c0_36], %33 {strides = array<i32>} : memref<56x128xf32, #tpu.memory_space<vmem>>, vector<50x128xf32>,
    %c0_37 = arith.constant 0 : index
    %c0_38 = arith.constant 0 : index
    %35 = vector.load %arg13[%c0_37, %c0_38] : memref<56x128xf32, #tpu.memory_space<vmem>>, vector<50x128xf32>
    %c0_39 = arith.constant 0 : index
    %c0_40 = arith.constant 0 : index
    %c0_41 = arith.constant 0 : index
    %36 = vector.load %arg4[%c0_39, %c0_40, %c0_41] : memref<5x128x128xf32, #tpu.memory_space<vmem>>, vector<1x128x128xf32>
    %37 = vector.shape_cast %36 : vector<1x128x128xf32> to vector<128x128xf32>
    %cst_42 = arith.constant dense<0.000000e+00> : vector<50x128xf32>
    %38 = tpu.matmul %35, %37, %cst_42 {dimension_numbers = #tpu.dot_dimension_numbers<[1], [0], [0], [1], [0, 0, 1, 1], [], []>} : vector<50x128xf32>, vector<128x128xf32>, vector<50x128xf32> -> vector<50x128xf32>
    %c1_43 = arith.constant 1 : index
    %c0_44 = arith.constant 0 : index
    %39 = vector.load %arg13[%c1_43, %c0_44] : memref<56x128xf32, #tpu.memory_space<vmem>>, vector<50x128xf32>
    %c1_45 = arith.constant 1 : index
    %c0_46 = arith.constant 0 : index
    %c0_47 = arith.constant 0 : index
    %40 = vector.load %arg4[%c1_45, %c0_46, %c0_47] : memref<5x128x128xf32, #tpu.memory_space<vmem>>, vector<1x128x128xf32>
    %41 = vector.shape_cast %40 : vector<1x128x128xf32> to vector<128x128xf32>
    %cst_48 = arith.constant dense<0.000000e+00> : vector<50x128xf32>
    %42 = tpu.matmul %39, %41, %cst_48 {dimension_numbers = #tpu.dot_dimension_numbers<[1], [0], [0], [1], [0, 0, 1, 1], [], []>} : vector<50x128xf32>, vector<128x128xf32>, vector<50x128xf32> -> vector<50x128xf32>
    %43 = arith.addf %38, %42 : vector<50x128xf32>
    %c2_49 = arith.constant 2 : index
    %c0_50 = arith.constant 0 : index
    %44 = vector.load %arg13[%c2_49, %c0_50] : memref<56x128xf32, #tpu.memory_space<vmem>>, vector<50x128xf32>
    %c2_51 = arith.constant 2 : index
    %c0_52 = arith.constant 0 : index
    %c0_53 = arith.constant 0 : index
    %45 = vector.load %arg4[%c2_51, %c0_52, %c0_53] : memref<5x128x128xf32, #tpu.memory_space<vmem>>, vector<1x128x128xf32>
    %46 = vector.shape_cast %45 : vector<1x128x128xf32> to vector<128x128xf32>
    %cst_54 = arith.constant dense<0.000000e+00> : vector<50x128xf32>
    %47 = tpu.matmul %44, %46, %cst_54 {dimension_numbers = #tpu.dot_dimension_numbers<[1], [0], [0], [1], [0, 0, 1, 1], [], []>} : vector<50x128xf32>, vector<128x128xf32>, vector<50x128xf32> -> vector<50x128xf32>
    %48 = arith.addf %43, %47 : vector<50x128xf32>
    %c3_55 = arith.constant 3 : index
    %c0_56 = arith.constant 0 : index
    %49 = vector.load %arg13[%c3_55, %c0_56] : memref<56x128xf32, #tpu.memory_space<vmem>>, vector<50x128xf32>
    %c3_57 = arith.constant 3 : index
    %c0_58 = arith.constant 0 : index
    %c0_59 = arith.constant 0 : index
    %50 = vector.load %arg4[%c3_57, %c0_58, %c0_59] : memref<5x128x128xf32, #tpu.memory_space<vmem>>, vector<1x128x128xf32>
    %51 = vector.shape_cast %50 : vector<1x128x128xf32> to vector<128x128xf32>
    %cst_60 = arith.constant dense<0.000000e+00> : vector<50x128xf32>
    %52 = tpu.matmul %49, %51, %cst_60 {dimension_numbers = #tpu.dot_dimension_numbers<[1], [0], [0], [1], [0, 0, 1, 1], [], []>} : vector<50x128xf32>, vector<128x128xf32>, vector<50x128xf32> -> vector<50x128xf32>
    %53 = arith.addf %48, %52 : vector<50x128xf32>
    %c4_61 = arith.constant 4 : index
    %c0_62 = arith.constant 0 : index
    %54 = vector.load %arg13[%c4_61, %c0_62] : memref<56x128xf32, #tpu.memory_space<vmem>>, vector<50x128xf32>
    %c4_63 = arith.constant 4 : index
    %c0_64 = arith.constant 0 : index
    %c0_65 = arith.constant 0 : index
    %55 = vector.load %arg4[%c4_63, %c0_64, %c0_65] : memref<5x128x128xf32, #tpu.memory_space<vmem>>, vector<1x128x128xf32>
    %56 = vector.shape_cast %55 : vector<1x128x128xf32> to vector<128x128xf32>
    %cst_66 = arith.constant dense<0.000000e+00> : vector<50x128xf32>
    %57 = tpu.matmul %54, %56, %cst_66 {dimension_numbers = #tpu.dot_dimension_numbers<[1], [0], [0], [1], [0, 0, 1, 1], [], []>} : vector<50x128xf32>, vector<128x128xf32>, vector<50x128xf32> -> vector<50x128xf32>
    %58 = arith.addf %53, %57 : vector<50x128xf32>
    %c0_67 = arith.constant 0 : index
    %c0_68 = arith.constant 0 : index
    %59 = vector.load %arg5[%c0_67, %c0_68] : memref<1x128xf32, #tpu.memory_space<vmem>>, vector<1x128xf32>
    %60 = vector.broadcast %59 : vector<1x128xf32> to vector<50x128xf32>
    %61 = arith.addf %58, %60 : vector<50x128xf32>
    %cst_69 = arith.constant 0.000000e+00 : f32
    %62 = vector.broadcast %cst_69 : f32 to vector<50x128xf32>
    %63 = arith.maximumf %61, %62 : vector<50x128xf32>
    %c2_70 = arith.constant 2 : index
    %c0_71 = arith.constant 0 : index
    %64 = vector.load %arg13[%c2_70, %c0_71] : memref<56x128xf32, #tpu.memory_space<vmem>>, vector<50x128xf32>
    tpu.vector_store %arg13[%c2_70, %c0_71], %63 {strides = array<i32>} : memref<56x128xf32, #tpu.memory_space<vmem>>, vector<50x128xf32>,
    %c0_72 = arith.constant 0 : index
    %c0_73 = arith.constant 0 : index
    %65 = vector.load %arg13[%c0_72, %c0_73] : memref<56x128xf32, #tpu.memory_space<vmem>>, vector<50x128xf32>
    %c0_74 = arith.constant 0 : index
    %c0_75 = arith.constant 0 : index
    %c0_76 = arith.constant 0 : index
    %66 = vector.load %arg6[%c0_74, %c0_75, %c0_76] : memref<5x128x128xf32, #tpu.memory_space<vmem>>, vector<1x128x128xf32>
    %67 = vector.shape_cast %66 : vector<1x128x128xf32> to vector<128x128xf32>
    %cst_77 = arith.constant dense<0.000000e+00> : vector<50x128xf32>
    %68 = tpu.matmul %65, %67, %cst_77 {dimension_numbers = #tpu.dot_dimension_numbers<[1], [0], [0], [1], [0, 0, 1, 1], [], []>} : vector<50x128xf32>, vector<128x128xf32>, vector<50x128xf32> -> vector<50x128xf32>
    %c1_78 = arith.constant 1 : index
    %c0_79 = arith.constant 0 : index
    %69 = vector.load %arg13[%c1_78, %c0_79] : memref<56x128xf32, #tpu.memory_space<vmem>>, vector<50x128xf32>
    %c1_80 = arith.constant 1 : index
    %c0_81 = arith.constant 0 : index
    %c0_82 = arith.constant 0 : index
    %70 = vector.load %arg6[%c1_80, %c0_81, %c0_82] : memref<5x128x128xf32, #tpu.memory_space<vmem>>, vector<1x128x128xf32>
    %71 = vector.shape_cast %70 : vector<1x128x128xf32> to vector<128x128xf32>
    %cst_83 = arith.constant dense<0.000000e+00> : vector<50x128xf32>
    %72 = tpu.matmul %69, %71, %cst_83 {dimension_numbers = #tpu.dot_dimension_numbers<[1], [0], [0], [1], [0, 0, 1, 1], [], []>} : vector<50x128xf32>, vector<128x128xf32>, vector<50x128xf32> -> vector<50x128xf32>
    %73 = arith.addf %68, %72 : vector<50x128xf32>
    %c2_84 = arith.constant 2 : index
    %c0_85 = arith.constant 0 : index
    %74 = vector.load %arg13[%c2_84, %c0_85] : memref<56x128xf32, #tpu.memory_space<vmem>>, vector<50x128xf32>
    %c2_86 = arith.constant 2 : index
    %c0_87 = arith.constant 0 : index
    %c0_88 = arith.constant 0 : index
    %75 = vector.load %arg6[%c2_86, %c0_87, %c0_88] : memref<5x128x128xf32, #tpu.memory_space<vmem>>, vector<1x128x128xf32>
    %76 = vector.shape_cast %75 : vector<1x128x128xf32> to vector<128x128xf32>
    %cst_89 = arith.constant dense<0.000000e+00> : vector<50x128xf32>
    %77 = tpu.matmul %74, %76, %cst_89 {dimension_numbers = #tpu.dot_dimension_numbers<[1], [0], [0], [1], [0, 0, 1, 1], [], []>} : vector<50x128xf32>, vector<128x128xf32>, vector<50x128xf32> -> vector<50x128xf32>
    %78 = arith.addf %73, %77 : vector<50x128xf32>
    %c3_90 = arith.constant 3 : index
    %c0_91 = arith.constant 0 : index
    %79 = vector.load %arg13[%c3_90, %c0_91] : memref<56x128xf32, #tpu.memory_space<vmem>>, vector<50x128xf32>
    %c3_92 = arith.constant 3 : index
    %c0_93 = arith.constant 0 : index
    %c0_94 = arith.constant 0 : index
    %80 = vector.load %arg6[%c3_92, %c0_93, %c0_94] : memref<5x128x128xf32, #tpu.memory_space<vmem>>, vector<1x128x128xf32>
    %81 = vector.shape_cast %80 : vector<1x128x128xf32> to vector<128x128xf32>
    %cst_95 = arith.constant dense<0.000000e+00> : vector<50x128xf32>
    %82 = tpu.matmul %79, %81, %cst_95 {dimension_numbers = #tpu.dot_dimension_numbers<[1], [0], [0], [1], [0, 0, 1, 1], [], []>} : vector<50x128xf32>, vector<128x128xf32>, vector<50x128xf32> -> vector<50x128xf32>
    %83 = arith.addf %78, %82 : vector<50x128xf32>
    %c4_96 = arith.constant 4 : index
    %c0_97 = arith.constant 0 : index
    %84 = vector.load %arg13[%c4_96, %c0_97] : memref<56x128xf32, #tpu.memory_space<vmem>>, vector<50x128xf32>
    %c4_98 = arith.constant 4 : index
    %c0_99 = arith.constant 0 : index
    %c0_100 = arith.constant 0 : index
    %85 = vector.load %arg6[%c4_98, %c0_99, %c0_100] : memref<5x128x128xf32, #tpu.memory_space<vmem>>, vector<1x128x128xf32>
    %86 = vector.shape_cast %85 : vector<1x128x128xf32> to vector<128x128xf32>
    %cst_101 = arith.constant dense<0.000000e+00> : vector<50x128xf32>
    %87 = tpu.matmul %84, %86, %cst_101 {dimension_numbers = #tpu.dot_dimension_numbers<[1], [0], [0], [1], [0, 0, 1, 1], [], []>} : vector<50x128xf32>, vector<128x128xf32>, vector<50x128xf32> -> vector<50x128xf32>
    %88 = arith.addf %83, %87 : vector<50x128xf32>
    %c0_102 = arith.constant 0 : index
    %c0_103 = arith.constant 0 : index
    %89 = vector.load %arg7[%c0_102, %c0_103] : memref<1x128xf32, #tpu.memory_space<vmem>>, vector<1x128xf32>
    %90 = vector.broadcast %89 : vector<1x128xf32> to vector<50x128xf32>
    %91 = arith.addf %88, %90 : vector<50x128xf32>
    %cst_104 = arith.constant 0.000000e+00 : f32
    %92 = vector.broadcast %cst_104 : f32 to vector<50x128xf32>
    %93 = arith.maximumf %91, %92 : vector<50x128xf32>
    %c2_105 = arith.constant 2 : index
    %c0_106 = arith.constant 0 : index
    %94 = vector.load %arg13[%c2_105, %c0_106] : memref<56x128xf32, #tpu.memory_space<vmem>>, vector<50x128xf32>
    tpu.vector_store %arg13[%c2_105, %c0_106], %93 {strides = array<i32>} : memref<56x128xf32, #tpu.memory_space<vmem>>, vector<50x128xf32>,
    %c0_107 = arith.constant 0 : index
    %c0_108 = arith.constant 0 : index
    %95 = vector.load %arg13[%c0_107, %c0_108] : memref<56x128xf32, #tpu.memory_space<vmem>>, vector<50x128xf32>
    %c0_109 = arith.constant 0 : index
    %c0_110 = arith.constant 0 : index
    %c0_111 = arith.constant 0 : index
    %96 = vector.load %arg8[%c0_109, %c0_110, %c0_111] : memref<5x128x128xf32, #tpu.memory_space<vmem>>, vector<1x128x128xf32>
    %97 = vector.shape_cast %96 : vector<1x128x128xf32> to vector<128x128xf32>
    %cst_112 = arith.constant dense<0.000000e+00> : vector<50x128xf32>
    %98 = tpu.matmul %95, %97, %cst_112 {dimension_numbers = #tpu.dot_dimension_numbers<[1], [0], [0], [1], [0, 0, 1, 1], [], []>} : vector<50x128xf32>, vector<128x128xf32>, vector<50x128xf32> -> vector<50x128xf32>
    %c1_113 = arith.constant 1 : index
    %c0_114 = arith.constant 0 : index
    %99 = vector.load %arg13[%c1_113, %c0_114] : memref<56x128xf32, #tpu.memory_space<vmem>>, vector<50x128xf32>
    %c1_115 = arith.constant 1 : index
    %c0_116 = arith.constant 0 : index
    %c0_117 = arith.constant 0 : index
    %100 = vector.load %arg8[%c1_115, %c0_116, %c0_117] : memref<5x128x128xf32, #tpu.memory_space<vmem>>, vector<1x128x128xf32>
    %101 = vector.shape_cast %100 : vector<1x128x128xf32> to vector<128x128xf32>
    %cst_118 = arith.constant dense<0.000000e+00> : vector<50x128xf32>
    %102 = tpu.matmul %99, %101, %cst_118 {dimension_numbers = #tpu.dot_dimension_numbers<[1], [0], [0], [1], [0, 0, 1, 1], [], []>} : vector<50x128xf32>, vector<128x128xf32>, vector<50x128xf32> -> vector<50x128xf32>
    %103 = arith.addf %98, %102 : vector<50x128xf32>
    %c2_119 = arith.constant 2 : index
    %c0_120 = arith.constant 0 : index
    %104 = vector.load %arg13[%c2_119, %c0_120] : memref<56x128xf32, #tpu.memory_space<vmem>>, vector<50x128xf32>
    %c2_121 = arith.constant 2 : index
    %c0_122 = arith.constant 0 : index
    %c0_123 = arith.constant 0 : index
    %105 = vector.load %arg8[%c2_121, %c0_122, %c0_123] : memref<5x128x128xf32, #tpu.memory_space<vmem>>, vector<1x128x128xf32>
    %106 = vector.shape_cast %105 : vector<1x128x128xf32> to vector<128x128xf32>
    %cst_124 = arith.constant dense<0.000000e+00> : vector<50x128xf32>
    %107 = tpu.matmul %104, %106, %cst_124 {dimension_numbers = #tpu.dot_dimension_numbers<[1], [0], [0], [1], [0, 0, 1, 1], [], []>} : vector<50x128xf32>, vector<128x128xf32>, vector<50x128xf32> -> vector<50x128xf32>
    %108 = arith.addf %103, %107 : vector<50x128xf32>
    %c3_125 = arith.constant 3 : index
    %c0_126 = arith.constant 0 : index
    %109 = vector.load %arg13[%c3_125, %c0_126] : memref<56x128xf32, #tpu.memory_space<vmem>>, vector<50x128xf32>
    %c3_127 = arith.constant 3 : index
    %c0_128 = arith.constant 0 : index
    %c0_129 = arith.constant 0 : index
    %110 = vector.load %arg8[%c3_127, %c0_128, %c0_129] : memref<5x128x128xf32, #tpu.memory_space<vmem>>, vector<1x128x128xf32>
    %111 = vector.shape_cast %110 : vector<1x128x128xf32> to vector<128x128xf32>
    %cst_130 = arith.constant dense<0.000000e+00> : vector<50x128xf32>
    %112 = tpu.matmul %109, %111, %cst_130 {dimension_numbers = #tpu.dot_dimension_numbers<[1], [0], [0], [1], [0, 0, 1, 1], [], []>} : vector<50x128xf32>, vector<128x128xf32>, vector<50x128xf32> -> vector<50x128xf32>
    %113 = arith.addf %108, %112 : vector<50x128xf32>
    %c4_131 = arith.constant 4 : index
    %c0_132 = arith.constant 0 : index
    %114 = vector.load %arg13[%c4_131, %c0_132] : memref<56x128xf32, #tpu.memory_space<vmem>>, vector<50x128xf32>
    %c4_133 = arith.constant 4 : index
    %c0_134 = arith.constant 0 : index
    %c0_135 = arith.constant 0 : index
    %115 = vector.load %arg8[%c4_133, %c0_134, %c0_135] : memref<5x128x128xf32, #tpu.memory_space<vmem>>, vector<1x128x128xf32>
    %116 = vector.shape_cast %115 : vector<1x128x128xf32> to vector<128x128xf32>
    %cst_136 = arith.constant dense<0.000000e+00> : vector<50x128xf32>
    %117 = tpu.matmul %114, %116, %cst_136 {dimension_numbers = #tpu.dot_dimension_numbers<[1], [0], [0], [1], [0, 0, 1, 1], [], []>} : vector<50x128xf32>, vector<128x128xf32>, vector<50x128xf32> -> vector<50x128xf32>
    %118 = arith.addf %113, %117 : vector<50x128xf32>
    %c0_137 = arith.constant 0 : index
    %c0_138 = arith.constant 0 : index
    %119 = vector.load %arg9[%c0_137, %c0_138] : memref<1x128xf32, #tpu.memory_space<vmem>>, vector<1x128xf32>
    %120 = vector.broadcast %119 : vector<1x128xf32> to vector<50x128xf32>
    %121 = arith.addf %118, %120 : vector<50x128xf32>
    %cst_139 = arith.constant 0.000000e+00 : f32
    %122 = vector.broadcast %cst_139 : f32 to vector<50x128xf32>
    %123 = arith.maximumf %121, %122 : vector<50x128xf32>
    %c2_140 = arith.constant 2 : index
    %c0_141 = arith.constant 0 : index
    %124 = vector.load %arg13[%c2_140, %c0_141] : memref<56x128xf32, #tpu.memory_space<vmem>>, vector<50x128xf32>
    tpu.vector_store %arg13[%c2_140, %c0_141], %123 {strides = array<i32>} : memref<56x128xf32, #tpu.memory_space<vmem>>, vector<50x128xf32>,
    %c2_142 = arith.constant 2 : index
    %c0_143 = arith.constant 0 : index
    %125 = vector.load %arg13[%c2_142, %c0_143] : memref<56x128xf32, #tpu.memory_space<vmem>>, vector<1x128xf32>
    %c0_144 = arith.constant 0 : index
    %c0_145 = arith.constant 0 : index
    %126 = vector.load %arg14[%c0_144, %c0_145] : memref<1x6400xf32, #tpu.memory_space<vmem>>, vector<1x128xf32>
    tpu.vector_store %arg14[%c0_144, %c0_145], %125 {strides = array<i32>} : memref<1x6400xf32, #tpu.memory_space<vmem>>, vector<1x128xf32>,
    %c3_146 = arith.constant 3 : index
    %c0_147 = arith.constant 0 : index
    %127 = vector.load %arg13[%c3_146, %c0_147] : memref<56x128xf32, #tpu.memory_space<vmem>>, vector<1x128xf32>
    %c0_148 = arith.constant 0 : index
    %c128 = arith.constant 128 : index
    %128 = vector.load %arg14[%c0_148, %c128] : memref<1x6400xf32, #tpu.memory_space<vmem>>, vector<1x128xf32>
    tpu.vector_store %arg14[%c0_148, %c128], %127 {strides = array<i32>} : memref<1x6400xf32, #tpu.memory_space<vmem>>, vector<1x128xf32>,
    %c4_149 = arith.constant 4 : index
    %c0_150 = arith.constant 0 : index
    %129 = vector.load %arg13[%c4_149, %c0_150] : memref<56x128xf32, #tpu.memory_space<vmem>>, vector<1x128xf32>
    %c0_151 = arith.constant 0 : index
    %c256 = arith.constant 256 : index
    %130 = vector.load %arg14[%c0_151, %c256] : memref<1x6400xf32, #tpu.memory_space<vmem>>, vector<1x128xf32>
    tpu.vector_store %arg14[%c0_151, %c256], %129 {strides = array<i32>} : memref<1x6400xf32, #tpu.memory_space<vmem>>, vector<1x128xf32>,
    %c5 = arith.constant 5 : index
    %c0_152 = arith.constant 0 : index
    %131 = vector.load %arg13[%c5, %c0_152] : memref<56x128xf32, #tpu.memory_space<vmem>>, vector<1x128xf32>
    %c0_153 = arith.constant 0 : index
    %c384 = arith.constant 384 : index
    %132 = vector.load %arg14[%c0_153, %c384] : memref<1x6400xf32, #tpu.memory_space<vmem>>, vector<1x128xf32>
    tpu.vector_store %arg14[%c0_153, %c384], %131 {strides = array<i32>} : memref<1x6400xf32, #tpu.memory_space<vmem>>, vector<1x128xf32>,
    %c6 = arith.constant 6 : index
    %c0_154 = arith.constant 0 : index
    %133 = vector.load %arg13[%c6, %c0_154] : memref<56x128xf32, #tpu.memory_space<vmem>>, vector<1x128xf32>
    %c0_155 = arith.constant 0 : index
    %c512 = arith.constant 512 : index
    %134 = vector.load %arg14[%c0_155, %c512] : memref<1x6400xf32, #tpu.memory_space<vmem>>, vector<1x128xf32>
    tpu.vector_store %arg14[%c0_155, %c512], %133 {strides = array<i32>} : memref<1x6400xf32, #tpu.memory_space<vmem>>, vector<1x128xf32>,
    %c7 = arith.constant 7 : index
    %c0_156 = arith.constant 0 : index
    %135 = vector.load %arg13[%c7, %c0_156] : memref<56x128xf32, #tpu.memory_space<vmem>>, vector<1x128xf32>
    %c0_157 = arith.constant 0 : index
    %c640 = arith.constant 640 : index
    %136 = vector.load %arg14[%c0_157, %c640] : memref<1x6400xf32, #tpu.memory_space<vmem>>, vector<1x128xf32>
    tpu.vector_store %arg14[%c0_157, %c640], %135 {strides = array<i32>} : memref<1x6400xf32, #tpu.memory_space<vmem>>, vector<1x128xf32>,
    %c8 = arith.constant 8 : index
    %c0_158 = arith.constant 0 : index
    %137 = vector.load %arg13[%c8, %c0_158] : memref<56x128xf32, #tpu.memory_space<vmem>>, vector<1x128xf32>
    %c0_159 = arith.constant 0 : index
    %c768 = arith.constant 768 : index
    %138 = vector.load %arg14[%c0_159, %c768] : memref<1x6400xf32, #tpu.memory_space<vmem>>, vector<1x128xf32>
    tpu.vector_store %arg14[%c0_159, %c768], %137 {strides = array<i32>} : memref<1x6400xf32, #tpu.memory_space<vmem>>, vector<1x128xf32>,
    %c9 = arith.constant 9 : index
    %c0_160 = arith.constant 0 : index
    %139 = vector.load %arg13[%c9, %c0_160] : memref<56x128xf32, #tpu.memory_space<vmem>>, vector<1x128xf32>
    %c0_161 = arith.constant 0 : index
    %c896 = arith.constant 896 : index
    %140 = vector.load %arg14[%c0_161, %c896] : memref<1x6400xf32, #tpu.memory_space<vmem>>, vector<1x128xf32>
    tpu.vector_store %arg14[%c0_161, %c896], %139 {strides = array<i32>} : memref<1x6400xf32, #tpu.memory_space<vmem>>, vector<1x128xf32>,
    %c10 = arith.constant 10 : index
    %c0_162 = arith.constant 0 : index
    %141 = vector.load %arg13[%c10, %c0_162] : memref<56x128xf32, #tpu.memory_space<vmem>>, vector<1x128xf32>
    %c0_163 = arith.constant 0 : index
    %c1024 = arith.constant 1024 : index
    %142 = vector.load %arg14[%c0_163, %c1024] : memref<1x6400xf32, #tpu.memory_space<vmem>>, vector<1x128xf32>
    tpu.vector_store %arg14[%c0_163, %c1024], %141 {strides = array<i32>} : memref<1x6400xf32, #tpu.memory_space<vmem>>, vector<1x128xf32>,
    %c11 = arith.constant 11 : index
    %c0_164 = arith.constant 0 : index
    %143 = vector.load %arg13[%c11, %c0_164] : memref<56x128xf32, #tpu.memory_space<vmem>>, vector<1x128xf32>
    %c0_165 = arith.constant 0 : index
    %c1152 = arith.constant 1152 : index
    %144 = vector.load %arg14[%c0_165, %c1152] : memref<1x6400xf32, #tpu.memory_space<vmem>>, vector<1x128xf32>
    tpu.vector_store %arg14[%c0_165, %c1152], %143 {strides = array<i32>} : memref<1x6400xf32, #tpu.memory_space<vmem>>, vector<1x128xf32>,
    %c12 = arith.constant 12 : index
    %c0_166 = arith.constant 0 : index
    %145 = vector.load %arg13[%c12, %c0_166] : memref<56x128xf32, #tpu.memory_space<vmem>>, vector<1x128xf32>
    %c0_167 = arith.constant 0 : index
    %c1280 = arith.constant 1280 : index
    %146 = vector.load %arg14[%c0_167, %c1280] : memref<1x6400xf32, #tpu.memory_space<vmem>>, vector<1x128xf32>
    tpu.vector_store %arg14[%c0_167, %c1280], %145 {strides = array<i32>} : memref<1x6400xf32, #tpu.memory_space<vmem>>, vector<1x128xf32>,
    %c13 = arith.constant 13 : index
    %c0_168 = arith.constant 0 : index
    %147 = vector.load %arg13[%c13, %c0_168] : memref<56x128xf32, #tpu.memory_space<vmem>>, vector<1x128xf32>
    %c0_169 = arith.constant 0 : index
    %c1408 = arith.constant 1408 : index
    %148 = vector.load %arg14[%c0_169, %c1408] : memref<1x6400xf32, #tpu.memory_space<vmem>>, vector<1x128xf32>
    tpu.vector_store %arg14[%c0_169, %c1408], %147 {strides = array<i32>} : memref<1x6400xf32, #tpu.memory_space<vmem>>, vector<1x128xf32>,
    %c14 = arith.constant 14 : index
    %c0_170 = arith.constant 0 : index
    %149 = vector.load %arg13[%c14, %c0_170] : memref<56x128xf32, #tpu.memory_space<vmem>>, vector<1x128xf32>
    %c0_171 = arith.constant 0 : index
    %c1536 = arith.constant 1536 : index
    %150 = vector.load %arg14[%c0_171, %c1536] : memref<1x6400xf32, #tpu.memory_space<vmem>>, vector<1x128xf32>
    tpu.vector_store %arg14[%c0_171, %c1536], %149 {strides = array<i32>} : memref<1x6400xf32, #tpu.memory_space<vmem>>, vector<1x128xf32>,
    %c15 = arith.constant 15 : index
    %c0_172 = arith.constant 0 : index
    %151 = vector.load %arg13[%c15, %c0_172] : memref<56x128xf32, #tpu.memory_space<vmem>>, vector<1x128xf32>
    %c0_173 = arith.constant 0 : index
    %c1664 = arith.constant 1664 : index
    %152 = vector.load %arg14[%c0_173, %c1664] : memref<1x6400xf32, #tpu.memory_space<vmem>>, vector<1x128xf32>
    tpu.vector_store %arg14[%c0_173, %c1664], %151 {strides = array<i32>} : memref<1x6400xf32, #tpu.memory_space<vmem>>, vector<1x128xf32>,
    %c16 = arith.constant 16 : index
    %c0_174 = arith.constant 0 : index
    %153 = vector.load %arg13[%c16, %c0_174] : memref<56x128xf32, #tpu.memory_space<vmem>>, vector<1x128xf32>
    %c0_175 = arith.constant 0 : index
    %c1792 = arith.constant 1792 : index
    %154 = vector.load %arg14[%c0_175, %c1792] : memref<1x6400xf32, #tpu.memory_space<vmem>>, vector<1x128xf32>
    tpu.vector_store %arg14[%c0_175, %c1792], %153 {strides = array<i32>} : memref<1x6400xf32, #tpu.memory_space<vmem>>, vector<1x128xf32>,
    %c17 = arith.constant 17 : index
    %c0_176 = arith.constant 0 : index
    %155 = vector.load %arg13[%c17, %c0_176] : memref<56x128xf32, #tpu.memory_space<vmem>>, vector<1x128xf32>
    %c0_177 = arith.constant 0 : index
    %c1920 = arith.constant 1920 : index
    %156 = vector.load %arg14[%c0_177, %c1920] : memref<1x6400xf32, #tpu.memory_space<vmem>>, vector<1x128xf32>
    tpu.vector_store %arg14[%c0_177, %c1920], %155 {strides = array<i32>} : memref<1x6400xf32, #tpu.memory_space<vmem>>, vector<1x128xf32>,
    %c18 = arith.constant 18 : index
    %c0_178 = arith.constant 0 : index
    %157 = vector.load %arg13[%c18, %c0_178] : memref<56x128xf32, #tpu.memory_space<vmem>>, vector<1x128xf32>
    %c0_179 = arith.constant 0 : index
    %c2048 = arith.constant 2048 : index
    %158 = vector.load %arg14[%c0_179, %c2048] : memref<1x6400xf32, #tpu.memory_space<vmem>>, vector<1x128xf32>
    tpu.vector_store %arg14[%c0_179, %c2048], %157 {strides = array<i32>} : memref<1x6400xf32, #tpu.memory_space<vmem>>, vector<1x128xf32>,
    %c19 = arith.constant 19 : index
    %c0_180 = arith.constant 0 : index
    %159 = vector.load %arg13[%c19, %c0_180] : memref<56x128xf32, #tpu.memory_space<vmem>>, vector<1x128xf32>
    %c0_181 = arith.constant 0 : index
    %c2176 = arith.constant 2176 : index
    %160 = vector.load %arg14[%c0_181, %c2176] : memref<1x6400xf32, #tpu.memory_space<vmem>>, vector<1x128xf32>
    tpu.vector_store %arg14[%c0_181, %c2176], %159 {strides = array<i32>} : memref<1x6400xf32, #tpu.memory_space<vmem>>, vector<1x128xf32>,
    %c20 = arith.constant 20 : index
    %c0_182 = arith.constant 0 : index
    %161 = vector.load %arg13[%c20, %c0_182] : memref<56x128xf32, #tpu.memory_space<vmem>>, vector<1x128xf32>
    %c0_183 = arith.constant 0 : index
    %c2304 = arith.constant 2304 : index
    %162 = vector.load %arg14[%c0_183, %c2304] : memref<1x6400xf32, #tpu.memory_space<vmem>>, vector<1x128xf32>
    tpu.vector_store %arg14[%c0_183, %c2304], %161 {strides = array<i32>} : memref<1x6400xf32, #tpu.memory_space<vmem>>, vector<1x128xf32>,
    %c21 = arith.constant 21 : index
    %c0_184 = arith.constant 0 : index
    %163 = vector.load %arg13[%c21, %c0_184] : memref<56x128xf32, #tpu.memory_space<vmem>>, vector<1x128xf32>
    %c0_185 = arith.constant 0 : index
    %c2432 = arith.constant 2432 : index
    %164 = vector.load %arg14[%c0_185, %c2432] : memref<1x6400xf32, #tpu.memory_space<vmem>>, vector<1x128xf32>
    tpu.vector_store %arg14[%c0_185, %c2432], %163 {strides = array<i32>} : memref<1x6400xf32, #tpu.memory_space<vmem>>, vector<1x128xf32>,
    %c22 = arith.constant 22 : index
    %c0_186 = arith.constant 0 : index
    %165 = vector.load %arg13[%c22, %c0_186] : memref<56x128xf32, #tpu.memory_space<vmem>>, vector<1x128xf32>
    %c0_187 = arith.constant 0 : index
    %c2560 = arith.constant 2560 : index
    %166 = vector.load %arg14[%c0_187, %c2560] : memref<1x6400xf32, #tpu.memory_space<vmem>>, vector<1x128xf32>
    tpu.vector_store %arg14[%c0_187, %c2560], %165 {strides = array<i32>} : memref<1x6400xf32, #tpu.memory_space<vmem>>, vector<1x128xf32>,
    %c23 = arith.constant 23 : index
    %c0_188 = arith.constant 0 : index
    %167 = vector.load %arg13[%c23, %c0_188] : memref<56x128xf32, #tpu.memory_space<vmem>>, vector<1x128xf32>
    %c0_189 = arith.constant 0 : index
    %c2688 = arith.constant 2688 : index
    %168 = vector.load %arg14[%c0_189, %c2688] : memref<1x6400xf32, #tpu.memory_space<vmem>>, vector<1x128xf32>
    tpu.vector_store %arg14[%c0_189, %c2688], %167 {strides = array<i32>} : memref<1x6400xf32, #tpu.memory_space<vmem>>, vector<1x128xf32>,
    %c24 = arith.constant 24 : index
    %c0_190 = arith.constant 0 : index
    %169 = vector.load %arg13[%c24, %c0_190] : memref<56x128xf32, #tpu.memory_space<vmem>>, vector<1x128xf32>
    %c0_191 = arith.constant 0 : index
    %c2816 = arith.constant 2816 : index
    %170 = vector.load %arg14[%c0_191, %c2816] : memref<1x6400xf32, #tpu.memory_space<vmem>>, vector<1x128xf32>
    tpu.vector_store %arg14[%c0_191, %c2816], %169 {strides = array<i32>} : memref<1x6400xf32, #tpu.memory_space<vmem>>, vector<1x128xf32>,
    %c25 = arith.constant 25 : index
    %c0_192 = arith.constant 0 : index
    %171 = vector.load %arg13[%c25, %c0_192] : memref<56x128xf32, #tpu.memory_space<vmem>>, vector<1x128xf32>
    %c0_193 = arith.constant 0 : index
    %c2944 = arith.constant 2944 : index
    %172 = vector.load %arg14[%c0_193, %c2944] : memref<1x6400xf32, #tpu.memory_space<vmem>>, vector<1x128xf32>
    tpu.vector_store %arg14[%c0_193, %c2944], %171 {strides = array<i32>} : memref<1x6400xf32, #tpu.memory_space<vmem>>, vector<1x128xf32>,
    %c26 = arith.constant 26 : index
    %c0_194 = arith.constant 0 : index
    %173 = vector.load %arg13[%c26, %c0_194] : memref<56x128xf32, #tpu.memory_space<vmem>>, vector<1x128xf32>
    %c0_195 = arith.constant 0 : index
    %c3072 = arith.constant 3072 : index
    %174 = vector.load %arg14[%c0_195, %c3072] : memref<1x6400xf32, #tpu.memory_space<vmem>>, vector<1x128xf32>
    tpu.vector_store %arg14[%c0_195, %c3072], %173 {strides = array<i32>} : memref<1x6400xf32, #tpu.memory_space<vmem>>, vector<1x128xf32>,
    %c27 = arith.constant 27 : index
    %c0_196 = arith.constant 0 : index
    %175 = vector.load %arg13[%c27, %c0_196] : memref<56x128xf32, #tpu.memory_space<vmem>>, vector<1x128xf32>
    %c0_197 = arith.constant 0 : index
    %c3200 = arith.constant 3200 : index
    %176 = vector.load %arg14[%c0_197, %c3200] : memref<1x6400xf32, #tpu.memory_space<vmem>>, vector<1x128xf32>
    tpu.vector_store %arg14[%c0_197, %c3200], %175 {strides = array<i32>} : memref<1x6400xf32, #tpu.memory_space<vmem>>, vector<1x128xf32>,
    %c28 = arith.constant 28 : index
    %c0_198 = arith.constant 0 : index
    %177 = vector.load %arg13[%c28, %c0_198] : memref<56x128xf32, #tpu.memory_space<vmem>>, vector<1x128xf32>
    %c0_199 = arith.constant 0 : index
    %c3328 = arith.constant 3328 : index
    %178 = vector.load %arg14[%c0_199, %c3328] : memref<1x6400xf32, #tpu.memory_space<vmem>>, vector<1x128xf32>
    tpu.vector_store %arg14[%c0_199, %c3328], %177 {strides = array<i32>} : memref<1x6400xf32, #tpu.memory_space<vmem>>, vector<1x128xf32>,
    %c29 = arith.constant 29 : index
    %c0_200 = arith.constant 0 : index
    %179 = vector.load %arg13[%c29, %c0_200] : memref<56x128xf32, #tpu.memory_space<vmem>>, vector<1x128xf32>
    %c0_201 = arith.constant 0 : index
    %c3456 = arith.constant 3456 : index
    %180 = vector.load %arg14[%c0_201, %c3456] : memref<1x6400xf32, #tpu.memory_space<vmem>>, vector<1x128xf32>
    tpu.vector_store %arg14[%c0_201, %c3456], %179 {strides = array<i32>} : memref<1x6400xf32, #tpu.memory_space<vmem>>, vector<1x128xf32>,
    %c30 = arith.constant 30 : index
    %c0_202 = arith.constant 0 : index
    %181 = vector.load %arg13[%c30, %c0_202] : memref<56x128xf32, #tpu.memory_space<vmem>>, vector<1x128xf32>
    %c0_203 = arith.constant 0 : index
    %c3584 = arith.constant 3584 : index
    %182 = vector.load %arg14[%c0_203, %c3584] : memref<1x6400xf32, #tpu.memory_space<vmem>>, vector<1x128xf32>
    tpu.vector_store %arg14[%c0_203, %c3584], %181 {strides = array<i32>} : memref<1x6400xf32, #tpu.memory_space<vmem>>, vector<1x128xf32>,
    %c31 = arith.constant 31 : index
    %c0_204 = arith.constant 0 : index
    %183 = vector.load %arg13[%c31, %c0_204] : memref<56x128xf32, #tpu.memory_space<vmem>>, vector<1x128xf32>
    %c0_205 = arith.constant 0 : index
    %c3712 = arith.constant 3712 : index
    %184 = vector.load %arg14[%c0_205, %c3712] : memref<1x6400xf32, #tpu.memory_space<vmem>>, vector<1x128xf32>
    tpu.vector_store %arg14[%c0_205, %c3712], %183 {strides = array<i32>} : memref<1x6400xf32, #tpu.memory_space<vmem>>, vector<1x128xf32>,
    %c32 = arith.constant 32 : index
    %c0_206 = arith.constant 0 : index
    %185 = vector.load %arg13[%c32, %c0_206] : memref<56x128xf32, #tpu.memory_space<vmem>>, vector<1x128xf32>
    %c0_207 = arith.constant 0 : index
    %c3840 = arith.constant 3840 : index
    %186 = vector.load %arg14[%c0_207, %c3840] : memref<1x6400xf32, #tpu.memory_space<vmem>>, vector<1x128xf32>
    tpu.vector_store %arg14[%c0_207, %c3840], %185 {strides = array<i32>} : memref<1x6400xf32, #tpu.memory_space<vmem>>, vector<1x128xf32>,
    %c33 = arith.constant 33 : index
    %c0_208 = arith.constant 0 : index
    %187 = vector.load %arg13[%c33, %c0_208] : memref<56x128xf32, #tpu.memory_space<vmem>>, vector<1x128xf32>
    %c0_209 = arith.constant 0 : index
    %c3968 = arith.constant 3968 : index
    %188 = vector.load %arg14[%c0_209, %c3968] : memref<1x6400xf32, #tpu.memory_space<vmem>>, vector<1x128xf32>
    tpu.vector_store %arg14[%c0_209, %c3968], %187 {strides = array<i32>} : memref<1x6400xf32, #tpu.memory_space<vmem>>, vector<1x128xf32>,
    %c34 = arith.constant 34 : index
    %c0_210 = arith.constant 0 : index
    %189 = vector.load %arg13[%c34, %c0_210] : memref<56x128xf32, #tpu.memory_space<vmem>>, vector<1x128xf32>
    %c0_211 = arith.constant 0 : index
    %c4096 = arith.constant 4096 : index
    %190 = vector.load %arg14[%c0_211, %c4096] : memref<1x6400xf32, #tpu.memory_space<vmem>>, vector<1x128xf32>
    tpu.vector_store %arg14[%c0_211, %c4096], %189 {strides = array<i32>} : memref<1x6400xf32, #tpu.memory_space<vmem>>, vector<1x128xf32>,
    %c35 = arith.constant 35 : index
    %c0_212 = arith.constant 0 : index
    %191 = vector.load %arg13[%c35, %c0_212] : memref<56x128xf32, #tpu.memory_space<vmem>>, vector<1x128xf32>
    %c0_213 = arith.constant 0 : index
    %c4224 = arith.constant 4224 : index
    %192 = vector.load %arg14[%c0_213, %c4224] : memref<1x6400xf32, #tpu.memory_space<vmem>>, vector<1x128xf32>
    tpu.vector_store %arg14[%c0_213, %c4224], %191 {strides = array<i32>} : memref<1x6400xf32, #tpu.memory_space<vmem>>, vector<1x128xf32>,
    %c36 = arith.constant 36 : index
    %c0_214 = arith.constant 0 : index
    %193 = vector.load %arg13[%c36, %c0_214] : memref<56x128xf32, #tpu.memory_space<vmem>>, vector<1x128xf32>
    %c0_215 = arith.constant 0 : index
    %c4352 = arith.constant 4352 : index
    %194 = vector.load %arg14[%c0_215, %c4352] : memref<1x6400xf32, #tpu.memory_space<vmem>>, vector<1x128xf32>
    tpu.vector_store %arg14[%c0_215, %c4352], %193 {strides = array<i32>} : memref<1x6400xf32, #tpu.memory_space<vmem>>, vector<1x128xf32>,
    %c37 = arith.constant 37 : index
    %c0_216 = arith.constant 0 : index
    %195 = vector.load %arg13[%c37, %c0_216] : memref<56x128xf32, #tpu.memory_space<vmem>>, vector<1x128xf32>
    %c0_217 = arith.constant 0 : index
    %c4480 = arith.constant 4480 : index
    %196 = vector.load %arg14[%c0_217, %c4480] : memref<1x6400xf32, #tpu.memory_space<vmem>>, vector<1x128xf32>
    tpu.vector_store %arg14[%c0_217, %c4480], %195 {strides = array<i32>} : memref<1x6400xf32, #tpu.memory_space<vmem>>, vector<1x128xf32>,
    %c38 = arith.constant 38 : index
    %c0_218 = arith.constant 0 : index
    %197 = vector.load %arg13[%c38, %c0_218] : memref<56x128xf32, #tpu.memory_space<vmem>>, vector<1x128xf32>
    %c0_219 = arith.constant 0 : index
    %c4608 = arith.constant 4608 : index
    %198 = vector.load %arg14[%c0_219, %c4608] : memref<1x6400xf32, #tpu.memory_space<vmem>>, vector<1x128xf32>
    tpu.vector_store %arg14[%c0_219, %c4608], %197 {strides = array<i32>} : memref<1x6400xf32, #tpu.memory_space<vmem>>, vector<1x128xf32>,
    %c39 = arith.constant 39 : index
    %c0_220 = arith.constant 0 : index
    %199 = vector.load %arg13[%c39, %c0_220] : memref<56x128xf32, #tpu.memory_space<vmem>>, vector<1x128xf32>
    %c0_221 = arith.constant 0 : index
    %c4736 = arith.constant 4736 : index
    %200 = vector.load %arg14[%c0_221, %c4736] : memref<1x6400xf32, #tpu.memory_space<vmem>>, vector<1x128xf32>
    tpu.vector_store %arg14[%c0_221, %c4736], %199 {strides = array<i32>} : memref<1x6400xf32, #tpu.memory_space<vmem>>, vector<1x128xf32>,
    %c40 = arith.constant 40 : index
    %c0_222 = arith.constant 0 : index
    %201 = vector.load %arg13[%c40, %c0_222] : memref<56x128xf32, #tpu.memory_space<vmem>>, vector<1x128xf32>
    %c0_223 = arith.constant 0 : index
    %c4864 = arith.constant 4864 : index
    %202 = vector.load %arg14[%c0_223, %c4864] : memref<1x6400xf32, #tpu.memory_space<vmem>>, vector<1x128xf32>
    tpu.vector_store %arg14[%c0_223, %c4864], %201 {strides = array<i32>} : memref<1x6400xf32, #tpu.memory_space<vmem>>, vector<1x128xf32>,
    %c41 = arith.constant 41 : index
    %c0_224 = arith.constant 0 : index
    %203 = vector.load %arg13[%c41, %c0_224] : memref<56x128xf32, #tpu.memory_space<vmem>>, vector<1x128xf32>
    %c0_225 = arith.constant 0 : index
    %c4992 = arith.constant 4992 : index
    %204 = vector.load %arg14[%c0_225, %c4992] : memref<1x6400xf32, #tpu.memory_space<vmem>>, vector<1x128xf32>
    tpu.vector_store %arg14[%c0_225, %c4992], %203 {strides = array<i32>} : memref<1x6400xf32, #tpu.memory_space<vmem>>, vector<1x128xf32>,
    %c42 = arith.constant 42 : index
    %c0_226 = arith.constant 0 : index
    %205 = vector.load %arg13[%c42, %c0_226] : memref<56x128xf32, #tpu.memory_space<vmem>>, vector<1x128xf32>
    %c0_227 = arith.constant 0 : index
    %c5120 = arith.constant 5120 : index
    %206 = vector.load %arg14[%c0_227, %c5120] : memref<1x6400xf32, #tpu.memory_space<vmem>>, vector<1x128xf32>
    tpu.vector_store %arg14[%c0_227, %c5120], %205 {strides = array<i32>} : memref<1x6400xf32, #tpu.memory_space<vmem>>, vector<1x128xf32>,
    %c43 = arith.constant 43 : index
    %c0_228 = arith.constant 0 : index
    %207 = vector.load %arg13[%c43, %c0_228] : memref<56x128xf32, #tpu.memory_space<vmem>>, vector<1x128xf32>
    %c0_229 = arith.constant 0 : index
    %c5248 = arith.constant 5248 : index
    %208 = vector.load %arg14[%c0_229, %c5248] : memref<1x6400xf32, #tpu.memory_space<vmem>>, vector<1x128xf32>
    tpu.vector_store %arg14[%c0_229, %c5248], %207 {strides = array<i32>} : memref<1x6400xf32, #tpu.memory_space<vmem>>, vector<1x128xf32>,
    %c44 = arith.constant 44 : index
    %c0_230 = arith.constant 0 : index
    %209 = vector.load %arg13[%c44, %c0_230] : memref<56x128xf32, #tpu.memory_space<vmem>>, vector<1x128xf32>
    %c0_231 = arith.constant 0 : index
    %c5376 = arith.constant 5376 : index
    %210 = vector.load %arg14[%c0_231, %c5376] : memref<1x6400xf32, #tpu.memory_space<vmem>>, vector<1x128xf32>
    tpu.vector_store %arg14[%c0_231, %c5376], %209 {strides = array<i32>} : memref<1x6400xf32, #tpu.memory_space<vmem>>, vector<1x128xf32>,
    %c45 = arith.constant 45 : index
    %c0_232 = arith.constant 0 : index
    %211 = vector.load %arg13[%c45, %c0_232] : memref<56x128xf32, #tpu.memory_space<vmem>>, vector<1x128xf32>
    %c0_233 = arith.constant 0 : index
    %c5504 = arith.constant 5504 : index
    %212 = vector.load %arg14[%c0_233, %c5504] : memref<1x6400xf32, #tpu.memory_space<vmem>>, vector<1x128xf32>
    tpu.vector_store %arg14[%c0_233, %c5504], %211 {strides = array<i32>} : memref<1x6400xf32, #tpu.memory_space<vmem>>, vector<1x128xf32>,
    %c46 = arith.constant 46 : index
    %c0_234 = arith.constant 0 : index
    %213 = vector.load %arg13[%c46, %c0_234] : memref<56x128xf32, #tpu.memory_space<vmem>>, vector<1x128xf32>
    %c0_235 = arith.constant 0 : index
    %c5632 = arith.constant 5632 : index
    %214 = vector.load %arg14[%c0_235, %c5632] : memref<1x6400xf32, #tpu.memory_space<vmem>>, vector<1x128xf32>
    tpu.vector_store %arg14[%c0_235, %c5632], %213 {strides = array<i32>} : memref<1x6400xf32, #tpu.memory_space<vmem>>, vector<1x128xf32>,
    %c47 = arith.constant 47 : index
    %c0_236 = arith.constant 0 : index
    %215 = vector.load %arg13[%c47, %c0_236] : memref<56x128xf32, #tpu.memory_space<vmem>>, vector<1x128xf32>
    %c0_237 = arith.constant 0 : index
    %c5760 = arith.constant 5760 : index
    %216 = vector.load %arg14[%c0_237, %c5760] : memref<1x6400xf32, #tpu.memory_space<vmem>>, vector<1x128xf32>
    tpu.vector_store %arg14[%c0_237, %c5760], %215 {strides = array<i32>} : memref<1x6400xf32, #tpu.memory_space<vmem>>, vector<1x128xf32>,
    %c48 = arith.constant 48 : index
    %c0_238 = arith.constant 0 : index
    %217 = vector.load %arg13[%c48, %c0_238] : memref<56x128xf32, #tpu.memory_space<vmem>>, vector<1x128xf32>
    %c0_239 = arith.constant 0 : index
    %c5888 = arith.constant 5888 : index
    %218 = vector.load %arg14[%c0_239, %c5888] : memref<1x6400xf32, #tpu.memory_space<vmem>>, vector<1x128xf32>
    tpu.vector_store %arg14[%c0_239, %c5888], %217 {strides = array<i32>} : memref<1x6400xf32, #tpu.memory_space<vmem>>, vector<1x128xf32>,
    %c49 = arith.constant 49 : index
    %c0_240 = arith.constant 0 : index
    %219 = vector.load %arg13[%c49, %c0_240] : memref<56x128xf32, #tpu.memory_space<vmem>>, vector<1x128xf32>
    %c0_241 = arith.constant 0 : index
    %c6016 = arith.constant 6016 : index
    %220 = vector.load %arg14[%c0_241, %c6016] : memref<1x6400xf32, #tpu.memory_space<vmem>>, vector<1x128xf32>
    tpu.vector_store %arg14[%c0_241, %c6016], %219 {strides = array<i32>} : memref<1x6400xf32, #tpu.memory_space<vmem>>, vector<1x128xf32>,
    %c50 = arith.constant 50 : index
    %c0_242 = arith.constant 0 : index
    %221 = vector.load %arg13[%c50, %c0_242] : memref<56x128xf32, #tpu.memory_space<vmem>>, vector<1x128xf32>
    %c0_243 = arith.constant 0 : index
    %c6144 = arith.constant 6144 : index
    %222 = vector.load %arg14[%c0_243, %c6144] : memref<1x6400xf32, #tpu.memory_space<vmem>>, vector<1x128xf32>
    tpu.vector_store %arg14[%c0_243, %c6144], %221 {strides = array<i32>} : memref<1x6400xf32, #tpu.memory_space<vmem>>, vector<1x128xf32>,
    %c51 = arith.constant 51 : index
    %c0_244 = arith.constant 0 : index
    %223 = vector.load %arg13[%c51, %c0_244] : memref<56x128xf32, #tpu.memory_space<vmem>>, vector<1x128xf32>
    %c0_245 = arith.constant 0 : index
    %c6272 = arith.constant 6272 : index
    %224 = vector.load %arg14[%c0_245, %c6272] : memref<1x6400xf32, #tpu.memory_space<vmem>>, vector<1x128xf32>
    tpu.vector_store %arg14[%c0_245, %c6272], %223 {strides = array<i32>} : memref<1x6400xf32, #tpu.memory_space<vmem>>, vector<1x128xf32>,
    %c0_246 = arith.constant 0 : index
    %c0_247 = arith.constant 0 : index
    %225 = vector.load %arg14[%c0_246, %c0_247] : memref<1x6400xf32, #tpu.memory_space<vmem>>, vector<1x6400xf32>
    %c0_248 = arith.constant 0 : index
    %c0_249 = arith.constant 0 : index
    %226 = vector.load %arg10[%c0_248, %c0_249] : memref<10x6400xf32, #tpu.memory_space<vmem>>, vector<10x6400xf32>
    %cst_250 = arith.constant dense<0.000000e+00> : vector<1x10xf32>
    %227 = tpu.matmul %225, %226, %cst_250 {dimension_numbers = #tpu.dot_dimension_numbers<[1], [1], [0], [0], [0, 0, 1, 0], [], []>} : vector<1x6400xf32>, vector<10x6400xf32>, vector<1x10xf32> -> vector<1x10xf32>
    %c0_251 = arith.constant 0 : index
    %c0_252 = arith.constant 0 : index
    %228 = vector.load %arg11[%c0_251, %c0_252] : memref<1x10xf32, #tpu.memory_space<vmem>>, vector<1x10xf32>
    %229 = arith.addf %227, %228 : vector<1x10xf32>
    %c0_253 = arith.constant 0 : index
    %c0_254 = arith.constant 0 : index
    %c0_255 = arith.constant 0 : index
    %230 = vector.load %arg12[%c0_253, %c0_254, %c0_255] : memref<1x1x10xf32, #tpu.memory_space<vmem>>, vector<1x1x10xf32>
    %231 = vector.shape_cast %230 : vector<1x1x10xf32> to vector<1x10xf32>
    %232 = vector.shape_cast %229 : vector<1x10xf32> to vector<1x1x10xf32>
    tpu.vector_store %arg12[%c0_253, %c0_254, %c0_255], %232 {strides = array<i32>} : memref<1x1x10xf32, #tpu.memory_space<vmem>>, vector<1x1x10xf32>,
    return
  }
  func.func @transform_0(%arg0: i32) -> (i32, i32, i32) {
    %c0_i32 = arith.constant 0 : i32
    %c0_i32_0 = arith.constant 0 : i32
    %c0_i32_1 = arith.constant 0 : i32
    return %arg0, %c0_i32, %c0_i32_0 : i32, i32, i32
  }
  func.func @transform_1(%arg0: i32) -> (i32, i32, i32) {
    %c0_i32 = arith.constant 0 : i32
    %c0_i32_0 = arith.constant 0 : i32
    %c0_i32_1 = arith.constant 0 : i32
    %c0_i32_2 = arith.constant 0 : i32
    return %c0_i32, %c0_i32_0, %c0_i32_1 : i32, i32, i32
  }
  func.func @transform_2(%arg0: i32) -> (i32, i32) {
    %c0_i32 = arith.constant 0 : i32
    %c0_i32_0 = arith.constant 0 : i32
    %c0_i32_1 = arith.constant 0 : i32
    return %c0_i32, %c0_i32_0 : i32, i32
  }
  func.func @transform_3(%arg0: i32) -> (i32, i32, i32) {
    %c0_i32 = arith.constant 0 : i32
    %c0_i32_0 = arith.constant 0 : i32
    %c0_i32_1 = arith.constant 0 : i32
    %c0_i32_2 = arith.constant 0 : i32
    return %c0_i32, %c0_i32_0, %c0_i32_1 : i32, i32, i32
  }
  func.func @transform_4(%arg0: i32) -> (i32, i32) {
    %c0_i32 = arith.constant 0 : i32
    %c0_i32_0 = arith.constant 0 : i32
    %c0_i32_1 = arith.constant 0 : i32
    return %c0_i32, %c0_i32_0 : i32, i32
  }
  func.func @transform_5(%arg0: i32) -> (i32, i32, i32) {
    %c0_i32 = arith.constant 0 : i32
    %c0_i32_0 = arith.constant 0 : i32
    %c0_i32_1 = arith.constant 0 : i32
    %c0_i32_2 = arith.constant 0 : i32
    return %c0_i32, %c0_i32_0, %c0_i32_1 : i32, i32, i32
  }
  func.func @transform_6(%arg0: i32) -> (i32, i32) {
    %c0_i32 = arith.constant 0 : i32
    %c0_i32_0 = arith.constant 0 : i32
    %c0_i32_1 = arith.constant 0 : i32
    return %c0_i32, %c0_i32_0 : i32, i32
  }
  func.func @transform_7(%arg0: i32) -> (i32, i32, i32) {
    %c0_i32 = arith.constant 0 : i32
    %c0_i32_0 = arith.constant 0 : i32
    %c0_i32_1 = arith.constant 0 : i32
    %c0_i32_2 = arith.constant 0 : i32
    return %c0_i32, %c0_i32_0, %c0_i32_1 : i32, i32, i32
  }
  func.func @transform_8(%arg0: i32) -> (i32, i32) {
    %c0_i32 = arith.constant 0 : i32
    %c0_i32_0 = arith.constant 0 : i32
    %c0_i32_1 = arith.constant 0 : i32
    return %c0_i32, %c0_i32_0 : i32, i32
  }
  func.func @transform_9(%arg0: i32) -> (i32, i32) {
    %c0_i32 = arith.constant 0 : i32
    %c0_i32_0 = arith.constant 0 : i32
    %c0_i32_1 = arith.constant 0 : i32
    return %c0_i32, %c0_i32_0 : i32, i32
  }
  func.func @transform_10(%arg0: i32) -> (i32, i32) {
    %c0_i32 = arith.constant 0 : i32
    %c0_i32_0 = arith.constant 0 : i32
    %c0_i32_1 = arith.constant 0 : i32
    return %c0_i32, %c0_i32_0 : i32, i32
  }
  func.func @transform_11(%arg0: i32) -> (i32, i32, i32) {
    %c0_i32 = arith.constant 0 : i32
    %c0_i32_0 = arith.constant 0 : i32
    %c0_i32_1 = arith.constant 0 : i32
    return %arg0, %c0_i32, %c0_i32_0 : i32, i32, i32
  }
}

</mosaic_0001>

<bundles_post_ra>
// kernel: tpu_custom_call.1
= control target key start
LH: loop header
LB: loop body
LE: loop exit
PB: predicated region body
PF: predicated region fallthrough
CT: control target
= control target key end

     0   :  { %s4176_s0 = inlined_call_operand.vmem [shape: f32[2,50,1], index: 0, kind: input, shape index: {}]   ;;  %s4177_s1 = inlined_call_operand.hbm [shape: f32[5,128,128], index: 1, kind: input, shape index: {}]   ;;  %s4178_s2 = inlined_call_operand.vmem [shape: f32[1,128], index: 2, kind: input, shape index: {}]   ;;  %s4179_s3 = inlined_call_operand.hbm [shape: f32[5,128,128], index: 3, kind: input, shape index: {}]   ;;  %s4180_s4 = inlined_call_operand.vmem [shape: f32[1,128], index: 4, kind: input, shape index: {}]   ;;  %s4181_s5 = inlined_call_operand.hbm [shape: f32[5,128,128], index: 5, kind: input, shape index: {}]   ;;  %s4182_s6 = inlined_call_operand.vmem [shape: f32[1,128], index: 6, kind: input, shape index: {}]   ;;  %s4183_s7 = inlined_call_operand.hbm [shape: f32[5,128,128], index: 7, kind: input, shape index: {}]   ;;  %s4184_s8 = inlined_call_operand.vmem [shape: f32[1,128], index: 8, kind: input, shape index: {}]   ;;  %s4185_s9 = inlined_call_operand.hbm [shape: f32[10,6400], index: 9, kind: input, shape index: {}]   ;;  %s4186_s10 = inlined_call_operand.vmem [shape: f32[1,10], index: 10, kind: input, shape index: {}]   ;;  %s4187_s11 = inlined_call_operand.hbm [shape: f32[2,1,10], index: 11, kind: output, shape index: {}]  }
   0x1   :  { %4193 = sst [smem:[#allocation23_spill]] %s4179_s3 }
   0x2   :  { %4194 = sst [smem:[#allocation24_spill]] %s4183_s7 }
   0x3   :  { %16 = vsyncpa [#allocation5], 0 }
   0x4   :  { %17 = vsyncpa [#allocation8], 0 }
   0x5   :  { %18 = vsyncpa [#allocation11], 0 }
   0x6   :  { %19 = vsyncpa [#allocation6], 0 }
   0x7   :  { %21 = vsyncpa [#allocation6 + $0x1], 0  ;;  %s3762_s17 = smov 0   ;;  %s3764_s18 = smov 0  }
   0x8   :  { %s3766_s19 = smov 0   ;;  %s3768_s20 = smov 0  }
   0x9 LB: > { %4195 = sst [smem:[#allocation18_spill]] %s3678_s17  ;;  %s3783_s21 = sadd.s32 4294967295, %s3690_s20   ;;  %s3690_s20 = sphi %s3768_s20, %s4210_s20   ;;  %s3686_s19 = sphi %s3766_s19, %s4212_s19   ;;  %s3682_s18 = sphi %s3764_s18, %s4214_s18   ;;  %s3678_s17 = sphi %s3762_s17, %s4213_s17  }
   0xa   : > { %4196 = sst [smem:[#allocation19_spill]] %s3686_s19  ;;  %s3349_s22 = sadd.s32 4294967294, %s3690_s20  }
   0xb   : > { %s3787_s23 = sadd.s32 1, %s3690_s20   ;;  %s270_s24 = sadd.s32 1, %s3686_s19 }
   0xc   : > { %4197 = sst [smem:[#allocation20_spill]] %s3787_s23  ;;  %s267_s25 = ssub.s32 %s3690_s20, %s3787_s23 }
   0xd   : > { %p280_p0 = scmp.ne.s32.totalorder %s3686_s19, %s3682_s18  ;;  %p268_p1 = scmp.eq.s32.totalorder %s267_s25, 0 }
   0xe   : > { %p281_p2 = scmp.eq.s32.totalorder %s3783_s21, 1  ;;  %p286_p3 = scmp.ne.s32.totalorder %s3682_s18, %s3678_s17 }
   0xf   : > { %p287_p4 = scmp.eq.s32.totalorder %s3349_s22, 1  ;;  %p3350_p7 = scmp.ge.s32.totalorder %s3690_s20, 1 }
  0x10   : > { %s3798_s26 = scalar_select %p268_p1, %s3686_s19, %s270_s24  }
  0x11   : > { %p3800_p5 = por %p281_p2, %p280_p0  ;;  %p3804_p6 = por %p287_p4, %p286_p3 }
  0x12   : > { %4198 = sst [smem:[#allocation21_spill]] %s3798_s26  ;;  %p294_p8 = scmp.lt.s32.totalorder %s3690_s20, 3 }
  0x13   : > { %s4200_s28 = scalar_select %p3804_p6, 1, 0 }
  0x14   : > { %p3409_p9 = scmp.eq.s32.totalorder %s3783_s21, 0  ;;  %p3811_p10 = pnand %p3350_p7, %p294_p8 }
  0x15   : > { %4201 = sst [smem:[#allocation22_spill]] %s4200_s28  ;;  %s3692_s24 = smov [#allocation7]  }
  0x16   : > { %s4203_s3 = sld [smem:[#allocation23_spill]]  ;;  %p3389_p11 = pneg %p3811_p10 }
  0x17   : > { %s4204_s7 = sld [smem:[#allocation24_spill]]  ;;  %s324_s25 = sshll.u32 %s3692_s24, 4  ;;  %s325_s25 = int_to_ptr.vmem [resolvable:$true] %s324_s25 }
  0x18   : > { %p3825_p12 = pnand %p3409_p9, %p3389_p11  ;;  %s3693_s30 = smov 128  }
  0x19   : > { %s3694_s12 = smov 8   ;;  %s339_s23 = sshll.u32 %s4181_s5, 4  ;;  %s340_s23 = int_to_ptr.hbm [resolvable:$true] %s339_s23 }
  0x1a   : > { %s3696_s28 = smov [#allocation4]   ;;  %s373_s15 = sshll.u32 %s4185_s9, 4  ;;  %s374_s15 = int_to_ptr.hbm [resolvable:$true] %s373_s15 }
  0x1b   : > { %s307_s17 = sshll.u32 %s3696_s28, 4  ;;  %s3700_s24 = smov 400   ;;  %s308_s17 = int_to_ptr.vmem [resolvable:$true] %s307_s17 }
  0x1c   : > { %s322_s13 = sshll.u32 %s4203_s3, 4  ;;  %s3695_s3 = smov [#allocation10]   ;;  %s323_s13 = int_to_ptr.hbm [resolvable:$true] %s322_s13 }
  0x1d   : > { %s356_s16 = sshll.u32 %s4204_s7, 4  ;;  %s358_s26 = sshll.u32 %s3695_s3, 4  ;;  %s357_s16 = int_to_ptr.hbm [resolvable:$true] %s356_s16  ;;  %s359_s26 = int_to_ptr.vmem [resolvable:$true] %s358_s26 }
  0x1e   : > { %3395 = dma.hbm_to_vmem [thread:$0]  (!%p3825_p12), %s323_s13, 10240, %s325_s25, [#allocation8], %s3693_s30, %s3693_s30, %s3694_s12  }
  0x1f   : > { %s305_s7 = sshll.u32 %s4177_s1, 4  ;;  %s3697_s3 = smov [#allocation9]   ;;  %s306_s7 = int_to_ptr.hbm [resolvable:$true] %s305_s7 }
  0x20   : > { %3401 = dma.hbm_to_vmem [thread:$0]  (!%p3825_p12), %s357_s16, 10240, %s359_s26, [#allocation11], %s3693_s30, %s3693_s30, %s3694_s12  }
  0x21   : > { %3392 = dma.hbm_to_vmem [thread:$0]  (!%p3825_p12), %s306_s7, 10240, %s308_s17, [#allocation5], %s3693_s30, %s3693_s30, %s3694_s12  }
  0x22   : > { %s341_s13 = sshll.u32 %s3697_s3, 4  ;;  %s3698_s26 = smov [#allocation12]   ;;  %s342_s13 = int_to_ptr.vmem [resolvable:$true] %s341_s13 }
  0x23   : > { %3398 = dma.hbm_to_vmem [thread:$0]  (!%p3825_p12), %s340_s23, 10240, %s342_s13, [#allocation8], %s3693_s30, %s3693_s30, %s3694_s12  }
  0x24   : > { %s375_s19 = sshll.u32 %s3698_s26, 4  ;;  %s3699_s16 = smov 6400   ;;  %s376_s19 = int_to_ptr.vmem [resolvable:$true] %s375_s19 }
  0x25   : > { %3404 = dma.hbm_to_vmem [thread:$0]  (!%p3825_p12), %s374_s15, 12800, %s376_s19, [#allocation11], %s3699_s16, %s3699_s16, %s3700_s24  }
  0x26   : > { %402 = sbr.rel (%p3811_p10) target bundleno = 1129 (0x469), region = 64 }
  0x2b   : > { %3661 = dma.done.wait (%p3409_p9), [#allocation5], 10240  }
  0x2c   : > { %3663 = vsyncadd (%p3409_p9), [#allocation5], 4294957056 }
  0x2d   : > { %3665 = dma.done.wait (%p3409_p9), [#allocation8], 20480  }
  0x2e   : > { %3667 = vsyncadd (%p3409_p9), [#allocation8], 4294946816 }
  0x2f   : > { %3669 = dma.done.wait (%p3409_p9), [#allocation11], 23040  }
  0x30   : > { %3671 = vsyncadd (%p3409_p9), [#allocation11], 4294944256  ;;  %v3701_v0 = vmov 0.0   ;;  %v536_v1 = vld [vmem:[#allocation4 + $0xf8] sm:$0xff]  ;;  %v535_v4 = vld [vmem:[#allocation4 + $0xf0] sm:$0xff]  ;;  %p462_p13 = scmp.lt.s32.totalorder %s3783_s21, 1 }
  0x31   : > { %467 = vst [vmem:[#allocation2] sm:$0xff] %v3701_v0  ;;  %v512_v2 = vld [vmem:[#allocation4 + $0x78] sm:$0xff]  ;;  %537 = vmatpush.msra.mxu0 %v536_v1  ;;  %v511_v5 = vld [vmem:[#allocation4 + $0x70] sm:$0xff]  ;;  %v534_v8 = vld [vmem:[#allocation4 + $0xe8] sm:$0xff]  ;;  %vm481_vm0 = vcmask 7168   ;;  %vm488_vm1 = vcmask 1024  }
  0x32   : > { %468 = vst [vmem:[#allocation2 + $0x8] sm:$0xff] %v3701_v0  ;;  %v636_v3 = vld [vmem:[#allocation4 + $0x178] sm:$0xff]  ;;  %575 = vmatpush.msra.mxu1 %v512_v2  ;;  %v635_v6 = vld [vmem:[#allocation4 + $0x170] sm:$0xff]  ;;  %v510_v9 = vld [vmem:[#allocation4 + $0x68] sm:$0xff]  ;;  %s3866_s7 = scalar_select %p462_p13, %s3783_s21, 1  ;;  %vm3229_vm3 = vcmask 73728  }
  0x33   : > { %469 = vst [vmem:[#allocation2 + $0x10] sm:$0xff] %v3701_v0  ;;  %637 = vmatpush.msra.mxu2 %v636_v3  ;;  %v705_v7 = vld [vmem:[#allocation4 + $0x1f8] sm:$0xff]  ;;  %538 = vmatpush.msra.mxu0 %v535_v4  ;;  %v634_v10 = vld [vmem:[#allocation4 + $0x168] sm:$0xff]  ;;  %v704_v11 = vld [vmem:[#allocation4 + $0x1f0] sm:$0xff]  ;;  %s460_s16 = sand.u32 1, %s3682_s18   ;;  %s3636_s13 = scalar_lea.hbm %s4187_s11, 2 }
  0x34   : > { %473 = vst [vmem:[#allocation2 + $0x30] sm:$0xff] %v3701_v0  ;;  %576 = vmatpush.msra.mxu1 %v511_v5  ;;  %706 = vmatpush.msra.mxu3 %v705_v7  ;;  %v533_v12 = vld [vmem:[#allocation4 + $0xe0] sm:$0xff]  ;;  %v703_v15 = vld [vmem:[#allocation4 + $0x1e8] sm:$0xff]  ;;  %v532_v16 = vld [vmem:[#allocation4 + $0xd8] sm:$0xff]  ;;  %s3366_s17 = smul.u32 56, %s3866_s7  ;;  %s461_s23 = scalar_lea.vmem [#allocation13], %s460_s16 }
  0x35   : > { %470 = vst [vmem:[#allocation2 + $0x18] sm:$0xff] %v3701_v0  ;;  %638 = vmatpush.msra.mxu2 %v635_v6  ;;  %v509_v13 = vld [vmem:[#allocation4 + $0x60] sm:$0xff]  ;;  %539 = vmatpush.msra.mxu0 %v534_v8  ;;  %v508_v17 = vld [vmem:[#allocation4 + $0x58] sm:$0xff]  ;;  %v531_v20 = vld [vmem:[#allocation4 + $0xd0] sm:$0xff]  ;;  %s3242_s28 = sshll.u32 %s461_s23, 4  ;;  %s3232_s22 = scalar_lea.sflag [#allocation6], %s460_s16  ;;  %s3243_s28 = int_to_ptr.vmem [resolvable:$true] %s3242_s28 }
  0x36   : > { %471 = vst [vmem:[#allocation2 + $0x20] sm:$0xff] %v3701_v0  ;;  %577 = vmatpush.msra.mxu1 %v510_v9  ;;  %v633_v14 = vld [vmem:[#allocation4 + $0x160] sm:$0xff]  ;;  %707 = vmatpush.msra.mxu3 %v704_v11  ;;  %v632_v18 = vld [vmem:[#allocation4 + $0x158] sm:$0xff]  ;;  %v507_v21 = vld [vmem:[#allocation4 + $0x50] sm:$0xff]  ;;  %s3872_s29 = scalar_lea.vmem %s4176_s0, %s3366_s17  ;;  %s3240_s17 = scalar_lea.hbm %s4187_s11, %s3783_s21 }
  0x37   : > { %472 = vst [vmem:[#allocation2 + $0x28] sm:$0xff] %v3701_v0  ;;  %639 = vmatpush.msra.mxu2 %v634_v10  ;;  %540 = vmatpush.msra.mxu0 %v533_v12  ;;  %v702_v19 = vld [vmem:[#allocation4 + $0x1e0] sm:$0xff]  ;;  %v631_v22 = vld [vmem:[#allocation4 + $0x150] sm:$0xff]  ;;  %v701_v23 = vld [vmem:[#allocation4 + $0x1d8] sm:$0xff] }
  0x38   : > { %578 = vmatpush.msra.mxu1 %v509_v13  ;;  %708 = vmatpush.msra.mxu3 %v703_v15  ;;  %v530_v24 = vld [vmem:[#allocation4 + $0xc8] sm:$0xff]  ;;  %v700_v27 = vld [vmem:[#allocation4 + $0x1d0] sm:$0xff]  ;;  %v529_v28 = vld [vmem:[#allocation4 + $0xc0] sm:$0xff] }
  0x39   : > { %640 = vmatpush.msra.mxu2 %v633_v14  ;;  %541 = vmatpush.msra.mxu0 %v532_v16  ;;  %v506_v25 = vld [vmem:[#allocation4 + $0x48] sm:$0xff]  ;;  %v505_v29 = vld [vmem:[#allocation4 + $0x40] sm:$0xff]  ;;  %v528_v32 = vld [vmem:[#allocation4 + $0xb8] sm:$0xff] }
  0x3a   : > { %579 = vmatpush.msra.mxu1 %v508_v17  ;;  %709 = vmatpush.msra.mxu3 %v702_v19  ;;  %v630_v26 = vld [vmem:[#allocation4 + $0x148] sm:$0xff]  ;;  %v629_v30 = vld [vmem:[#allocation4 + $0x140] sm:$0xff]  ;;  %v504_v33 = vld [vmem:[#allocation4 + $0x38] sm:$0xff] }
  0x3b   : > { %641 = vmatpush.msra.mxu2 %v632_v18  ;;  %542 = vmatpush.msra.mxu0 %v531_v20  ;;  %v699_v31 = vld [vmem:[#allocation4 + $0x1c8] sm:$0xff]  ;;  %v628_v34 = vld [vmem:[#allocation4 + $0x138] sm:$0xff]  ;;  %v698_v35 = vld [vmem:[#allocation4 + $0x1c0] sm:$0xff] }
  0x3c   : > { %580 = vmatpush.msra.mxu1 %v507_v21  ;;  %710 = vmatpush.msra.mxu3 %v701_v23  ;;  %v527_v36 = vld [vmem:[#allocation4 + $0xb0] sm:$0xff]  ;;  %v697_v39 = vld [vmem:[#allocation4 + $0x1b8] sm:$0xff]  ;;  %v526_v40 = vld [vmem:[#allocation4 + $0xa8] sm:$0xff] }
  0x3d   : > { %642 = vmatpush.msra.mxu2 %v631_v22  ;;  %543 = vmatpush.msra.mxu0 %v530_v24  ;;  %v503_v37 = vld [vmem:[#allocation4 + $0x30] sm:$0xff]  ;;  %v502_v41 = vld [vmem:[#allocation4 + $0x28] sm:$0xff]  ;;  %v525_v44 = vld [vmem:[#allocation4 + $0xa0] sm:$0xff] }
  0x3e   : > { %581 = vmatpush.msra.mxu1 %v506_v25  ;;  %711 = vmatpush.msra.mxu3 %v700_v27  ;;  %v627_v38 = vld [vmem:[#allocation4 + $0x130] sm:$0xff]  ;;  %v626_v42 = vld [vmem:[#allocation4 + $0x128] sm:$0xff]  ;;  %v501_v45 = vld [vmem:[#allocation4 + $0x20] sm:$0xff] }
  0x3f   : > { %643 = vmatpush.msra.mxu2 %v630_v26  ;;  %544 = vmatpush.msra.mxu0 %v529_v28  ;;  %v696_v43 = vld [vmem:[#allocation4 + $0x1b0] sm:$0xff]  ;;  %v625_v46 = vld [vmem:[#allocation4 + $0x120] sm:$0xff]  ;;  %v695_v47 = vld [vmem:[#allocation4 + $0x1a8] sm:$0xff] }
  0x40   : > { %582 = vmatpush.msra.mxu1 %v505_v29  ;;  %712 = vmatpush.msra.mxu3 %v699_v31  ;;  %v524_v48 = vld [vmem:[#allocation4 + $0x98] sm:$0xff]  ;;  %v694_v53 = vld [vmem:[#allocation4 + $0x1a0] sm:$0xff]  ;;  %v523_v54 = vld [vmem:[#allocation4 + $0x90] sm:$0xff] }
  0x41   : > { %644 = vmatpush.msra.mxu2 %v629_v30  ;;  %545 = vmatpush.msra.mxu0 %v528_v32  ;;  %v500_v49 = vld [vmem:[#allocation4 + $0x18] sm:$0xff]  ;;  %v499_v55 = vld [vmem:[#allocation4 + $0x10] sm:$0xff]  ;;  %v476_v57 = vld [vmem:[%s3872_s29 + $0x10] sm:$0xff] }
  0x42   : > { %583 = vmatpush.msra.mxu1 %v504_v33  ;;  %713 = vmatpush.msra.mxu3 %v698_v35  ;;  %v474_v50 = vld [vmem:[%s3872_s29] sm:$0xff]  ;;  %v475_v51 = vld [vmem:[%s3872_s29 + $0x8] sm:$0xff]  ;;  %v522_v59 = vld [vmem:[#allocation4 + $0x88] sm:$0xff]  ;;  %484 = vst.msk [vmem:[#allocation2 + $0x12] sm:$0xff] %vm481_vm0, %v476_v57 }
  0x43   : > { %645 = vmatpush.msra.mxu2 %v628_v34  ;;  %546 = vmatpush.msra.mxu0 %v527_v36  ;;  %v624_v52 = vld [vmem:[#allocation4 + $0x118] sm:$0xff]  ;;  %482 = vst.msk [vmem:[#allocation2 + $0x2] sm:$0xff] %vm481_vm0, %v474_v50  ;;  %v623_v56 = vld [vmem:[#allocation4 + $0x110] sm:$0xff]  ;;  %v498_v62 = vld [vmem:[#allocation4 + $0x8] sm:$0xff] }
  0x44   : > { %584 = vmatpush.msra.mxu1 %v503_v37  ;;  %714 = vmatpush.msra.mxu3 %v697_v39  ;;  %483 = vst.msk [vmem:[#allocation2 + $0xa] sm:$0xff] %vm481_vm0, %v475_v51  ;;  %v693_v58 = vld [vmem:[#allocation4 + $0x198] sm:$0xff]  ;;  %v477_v60 = vld [vmem:[%s3872_s29 + $0x18] sm:$0xff]  ;;  %v521_v2 = vld [vmem:[#allocation4 + $0x80] sm:$0xff] }
  0x45   : > { %646 = vmatpush.msra.mxu2 %v627_v38  ;;  %547 = vmatpush.msra.mxu0 %v526_v40  ;;  %485 = vst.msk [vmem:[#allocation2 + $0x1a] sm:$0xff] %vm481_vm0, %v477_v60  ;;  %v478_v61 = vld [vmem:[%s3872_s29 + $0x20] sm:$0xff]  ;;  %v622_v63 = vld [vmem:[#allocation4 + $0x108] sm:$0xff]  ;;  %v479_v1 = vld [vmem:[%s3872_s29 + $0x28] sm:$0xff] }
  0x46   : > { %585 = vmatpush.msra.mxu1 %v502_v41  ;;  %715 = vmatpush.msra.mxu3 %v696_v43  ;;  %486 = vst.msk [vmem:[#allocation2 + $0x22] sm:$0xff] %vm481_vm0, %v478_v61  ;;  %v692_v0 = vld [vmem:[#allocation4 + $0x190] sm:$0xff]  ;;  %v497_v3 = vld [vmem:[#allocation4] sm:$0xff]  ;;  %v691_v5 = vld [vmem:[#allocation4 + $0x188] sm:$0xff] }
  0x47   : > { %647 = vmatpush.msra.mxu2 %v626_v42  ;;  %548 = vmatpush.msra.mxu0 %v525_v44  ;;  %487 = vst.msk [vmem:[#allocation2 + $0x2a] sm:$0xff] %vm481_vm0, %v479_v1  ;;  %v621_v4 = vld [vmem:[#allocation4 + $0x100] sm:$0xff]  ;;  %v774_v9 = vld [vmem:[#allocation4 + $0x278] sm:$0xff]  ;;  %v773_v12 = vld [vmem:[#allocation4 + $0x270] sm:$0xff] }
  0x48   : > { %586 = vmatpush.msra.mxu1 %v501_v45  ;;  %716 = vmatpush.msra.mxu3 %v695_v47  ;;  %v690_v10 = vld [vmem:[#allocation4 + $0x180] sm:$0xff]  ;;  %v772_v13 = vld [vmem:[#allocation4 + $0x268] sm:$0xff]  ;;  %v770_v19 = vld [vmem:[#allocation4 + $0x258] sm:$0xff] }
  0x49   : > { %648 = vmatpush.msra.mxu2 %v625_v46  ;;  %549 = vmatpush.msra.mxu0 %v524_v48  ;;  %v771_v14 = vld [vmem:[#allocation4 + $0x260] sm:$0xff]  ;;  %v769_v21 = vld [vmem:[#allocation4 + $0x250] sm:$0xff]  ;;  %v768_v22 = vld [vmem:[#allocation4 + $0x248] sm:$0xff] }
  0x4a   : > { %587 = vmatpush.msra.mxu1 %v500_v49  ;;  %717 = vmatpush.msra.mxu3 %v694_v53  ;;  %v513_v6 = vld [vmem:[#allocation2 + $0x1] sm:$0xff]  ;;  %v480_v15 = vld [vmem:[%s3872_s29 + $0x30] sm:$0x3]  ;;  %v615_v26 = vld [vmem:[#allocation2 + $0x12] sm:$0xff]  ;;  %s3244_s29 = sshll.u32 %s3240_s17, 4  ;;  %s3245_s29 = int_to_ptr.hbm [resolvable:$true] %s3244_s29 }
  0x4b   : > { %649 = vmatpush.msra.mxu2 %v624_v52  ;;  %550 = vmatpush.msra.mxu0 %v523_v54  ;;  %v490_v7 = vld [vmem:[#allocation2] sm:$0xff]  ;;  %v514_v16 = vld [vmem:[#allocation2 + $0x9] sm:$0xff]  ;;  %489 = vst.msk [vmem:[#allocation2 + $0x32] sm:$0x3] %vm488_vm1, %v480_v15  ;;  %v515_v24 = vld [vmem:[#allocation2 + $0x11] sm:$0xff]  ;;  %s3630_s30 = sshra.s32 %s3245_s29, 4  ;;  %s3631_s30 = int_to_ptr.hbm [resolvable:$true] %s3630_s30 }
  0x4c   : > { %588 = vmatpush.msra.mxu1 %v499_v55  ;;  %718 = vmatpush.msra.mxu3 %v693_v58  ;;  %v613_v8 = vld [vmem:[#allocation2 + $0x2] sm:$0xff]  ;;  %v614_v18 = vld [vmem:[#allocation2 + $0xa] sm:$0xff]  ;;  %v684_v28 = vld [vmem:[#allocation2 + $0x13] sm:$0xff]  ;;  %s3632_s12 = scalar_lea.hbm %s3631_s30, 1  ;;  %p3637_p3 = scmp.lt.s32.totalorder %s3631_s30, %s4187_s11 }
  0x4d   : > { %650 = vmatpush.msra.mxu2 %v623_v56  ;;  %551 = vmatpush.msra.mxu0 %v522_v59  ;;  %v682_v11 = vld [vmem:[#allocation2 + $0x3] sm:$0xff]  ;;  %v683_v20 = vld [vmem:[#allocation2 + $0xb] sm:$0xff]  ;;  %v765_v29 = vld [vmem:[#allocation4 + $0x230] sm:$0xff]  ;;  %p3633_p0 = scmp.ne.s32.totalorder %s3631_s30, %s3632_s12  ;;  %p3638_p4 = scmp.lt.s32.totalorder %s3636_s13, %s3632_s12 }
  0x4e   : > { %589 = vmatpush.msra.mxu1 %v498_v62  ;;  %719 = vmatpush.msra.mxu3 %v692_v0  ;;  %v491_v17 = vld [vmem:[#allocation2 + $0x8] sm:$0xff]  ;;  %v492_v25 = vld [vmem:[#allocation2 + $0x10] sm:$0xff]  ;;  %v516_v32 = vld [vmem:[#allocation2 + $0x19] sm:$0xff] }
  0x4f   : > { %651 = vmatpush.msra.mxu2 %v622_v63  ;;  %552 = vmatpush.msra.mxu0 %v521_v2  ;;  %v767_v23 = vld [vmem:[#allocation4 + $0x240] sm:$0xff]  ;;  %v766_v27 = vld [vmem:[#allocation4 + $0x238] sm:$0xff]  ;;  %v764_v30 = vld [vmem:[#allocation4 + $0x228] sm:$0xff]  ;;  %p3634_p1 = pnand %p3633_p0, %p3800_p5  ;;  %p3639_p7 = por %p3638_p4, %p3637_p3 }
  0x50   : > { %590 = vmatpush.msra.mxu1 %v497_v3  ;;  %720 = vmatpush.msra.mxu3 %v691_v5  ;;  %v763_v31 = vld [vmem:[#allocation4 + $0x220] sm:$0xff]  ;;  %v493_v33 = vld [vmem:[#allocation2 + $0x18] sm:$0xff]  ;;  %v762_v35 = vld [vmem:[#allocation4 + $0x218] sm:$0xff] }
  0x51   : > { %652 = vmatpush.msra.mxu2 %v621_v4  ;;  %553 = vmatmul.f32.vlgmr.msra.gmra.mxu0 %v513_v6  ;;  %v616_v34 = vld [vmem:[#allocation2 + $0x1a] sm:$0xff]  ;;  %v760_v38 = vld [vmem:[#allocation4 + $0x208] sm:$0xff]  ;;  %v759_v39 = vld [vmem:[#allocation4 + $0x200] sm:$0xff]  ;;  %p3635_p2 = pneg %p3634_p1 }
  0x52   : > { %591 = vmatmul.f32.vlgmr.msra.gmra.mxu1 %v490_v7  ;;  %653 = vmatmul.f32.vlgmr.msra.gmra.mxu2 %v613_v8  ;;  %v685_v36 = vld [vmem:[#allocation2 + $0x1b] sm:$0xff]  ;;  %v686_v43 = vld [vmem:[#allocation2 + $0x23] sm:$0xff]  ;;  %v687_v47 = vld [vmem:[#allocation2 + $0x2b] sm:$0xff] }
  0x53   : > { %775 = vmatpush.msrb.mxu0 %v774_v9  ;;  %721 = vmatpush.msra.mxu3 %v690_v10  ;;  %v761_v37 = vld [vmem:[#allocation4 + $0x210] sm:$0xff]  ;;  %v617_v42 = vld [vmem:[#allocation2 + $0x22] sm:$0xff]  ;;  %v618_v46 = vld [vmem:[#allocation2 + $0x2a] sm:$0xff]  ;;  %p3640_p8 = pnand %p3639_p7, %p3635_p2 }
  0x54   : > { %722 = vmatmul.f32.vlgmr.msra.gmra.mxu3 %v682_v11  ;;  %v517_v40 = vld [vmem:[#allocation2 + $0x21] sm:$0xff]  ;;  %v518_v44 = vld [vmem:[#allocation2 + $0x29] sm:$0xff]  ;;  %v519_v48 = vld [vmem:[#allocation2 + $0x31] sm:$0x3] }
  0x55   : > { %776 = vmatpush.msrb.mxu0 %v773_v12  ;;  %v494_v41 = vld [vmem:[#allocation2 + $0x20] sm:$0xff]  ;;  %v495_v45 = vld [vmem:[#allocation2 + $0x28] sm:$0xff]  ;;  %v496_v49 = vld [vmem:[#allocation2 + $0x30] sm:$0x3] }
  0x56   : > { %v619_v50 = vld [vmem:[#allocation2 + $0x32] sm:$0x3]  ;;  %v751_v52 = vld [vmem:[#allocation2 + $0x4] sm:$0xff]  ;;  %v753_v54 = vld [vmem:[#allocation2 + $0x14] sm:$0xff] }
  0x57   : > { %777 = vmatpush.msrb.mxu0 %v772_v13  ;;  %v688_v51 = vld [vmem:[#allocation2 + $0x33] sm:$0x3]  ;;  %v754_v55 = vld [vmem:[#allocation2 + $0x1c] sm:$0xff]  ;;  %v755_v56 = vld [vmem:[#allocation2 + $0x24] sm:$0xff] }
  0x58   : > { %v752_v53 = vld [vmem:[#allocation2 + $0xc] sm:$0xff]  ;;  %v757_v58 = vld [vmem:[#allocation2 + $0x34] sm:$0x3]  ;;  %v891_v59 = vld [vmem:[#allocation7 + $0xf8] sm:$0xff] }
  0x59   : > { %778 = vmatpush.msrb.mxu0 %v771_v14  ;;  %v756_v57 = vld [vmem:[#allocation2 + $0x2c] sm:$0xff]  ;;  %892 = vmatpush.msrb.mxu1 %v891_v59  ;;  %v890_v60 = vld [vmem:[#allocation7 + $0xf0] sm:$0xff]  ;;  %v887_v63 = vld [vmem:[#allocation7 + $0xd8] sm:$0xff] }
  0x5a   : > { %556 = vmatmul.f32.gmra.mxu0 %v514_v16  ;;  %594 = vmatmul.f32.gmra.mxu1 %v491_v17  ;;  %v889_v61 = vld [vmem:[#allocation7 + $0xe8] sm:$0xff]  ;;  %v888_v62 = vld [vmem:[#allocation7 + $0xe0] sm:$0xff]  ;;  %v991_v1 = vld [vmem:[#allocation7 + $0x178] sm:$0xff] }
  0x5b   : > { %656 = vmatmul.f32.gmra.mxu2 %v614_v18  ;;  %779 = vmatpush.msrb.mxu0 %v770_v19  ;;  %v886_v2 = vld [vmem:[#allocation7 + $0xd0] sm:$0xff]  ;;  %v885_v3 = vld [vmem:[#allocation7 + $0xc8] sm:$0xff]  ;;  %v988_v6 = vld [vmem:[#allocation7 + $0x160] sm:$0xff] }
  0x5c   : > { %725 = vmatmul.f32.gmra.mxu3 %v683_v20  ;;  %893 = vmatpush.msrb.mxu1 %v890_v60  ;;  %v990_v4 = vld [vmem:[#allocation7 + $0x170] sm:$0xff]  ;;  %v989_v5 = vld [vmem:[#allocation7 + $0x168] sm:$0xff]  ;;  %v867_v8 = vld [vmem:[#allocation7 + $0x78] sm:$0xff] }
  0x5d   : > { %780 = vmatpush.msrb.mxu0 %v769_v21  ;;  %992 = vmatpush.msrb.mxu3 %v991_v1  ;;  %v987_v9 = vld [vmem:[#allocation7 + $0x158] sm:$0xff]  ;;  %v884_v10 = vld [vmem:[#allocation7 + $0xc0] sm:$0xff]  ;;  %v866_v11 = vld [vmem:[#allocation7 + $0x70] sm:$0xff] }
  0x5e   : > { %894 = vmatpush.msrb.mxu1 %v889_v61  ;;  %930 = vmatpush.msrb.mxu2 %v867_v8  ;;  %v883_v12 = vld [vmem:[#allocation7 + $0xb8] sm:$0xff]  ;;  %v865_v13 = vld [vmem:[#allocation7 + $0x68] sm:$0xff]  ;;  %v986_v14 = vld [vmem:[#allocation7 + $0x150] sm:$0xff] }
  0x5f   : > { %781 = vmatpush.msrb.mxu0 %v768_v22  ;;  %993 = vmatpush.msrb.mxu3 %v990_v4  ;;  %v985_v15 = vld [vmem:[#allocation7 + $0x148] sm:$0xff]  ;;  %v864_v16 = vld [vmem:[#allocation7 + $0x60] sm:$0xff]  ;;  %v882_v19 = vld [vmem:[#allocation7 + $0xb0] sm:$0xff] }
  0x60   : > { %895 = vmatpush.msrb.mxu1 %v888_v62  ;;  %931 = vmatpush.msrb.mxu2 %v866_v11  ;;  %v984_v17 = vld [vmem:[#allocation7 + $0x140] sm:$0xff]  ;;  %v863_v20 = vld [vmem:[#allocation7 + $0x58] sm:$0xff] }
  0x61   : > { %782 = vmatpush.msrb.mxu0 %v767_v23  ;;  %994 = vmatpush.msrb.mxu3 %v989_v5  ;;  %v1060_v21 = vld [vmem:[#allocation7 + $0x1f8] sm:$0xff]  ;;  %v881_v23 = vld [vmem:[#allocation7 + $0xa8] sm:$0xff]  ;;  %v876_v59 = vld [vmem:[#allocation7 + $0x80] sm:$0xff] }
  0x62   : > { %559 = vmatmul.f32.gmra.mxu0 %v515_v24  ;;  %597 = vmatmul.f32.gmra.mxu1 %v492_v25  ;;  %v983_v22 = vld [vmem:[#allocation7 + $0x138] sm:$0xff]  ;;  %v862_v24 = vld [vmem:[#allocation7 + $0x50] sm:$0xff]  ;;  %v852_v60 = vld [vmem:[#allocation7] sm:$0xff] }
  0x63   : > { %659 = vmatmul.f32.gmra.mxu2 %v615_v26  ;;  %783 = vmatpush.msrb.mxu0 %v766_v27  ;;  %v1059_v25 = vld [vmem:[#allocation7 + $0x1f0] sm:$0xff]  ;;  %v861_v26 = vld [vmem:[#allocation7 + $0x48] sm:$0xff]  ;;  %v1049_v61 = vld [vmem:[#allocation7 + $0x1a0] sm:$0xff] }
  0x64   : > { %728 = vmatmul.f32.gmra.mxu3 %v684_v28  ;;  %896 = vmatpush.msrb.mxu1 %v887_v63  ;;  %v1058_v27 = vld [vmem:[#allocation7 + $0x1e8] sm:$0xff]  ;;  %v982_v28 = vld [vmem:[#allocation7 + $0x130] sm:$0xff]  ;;  %v1129_v62 = vld [vmem:[#allocation7 + $0x278] sm:$0xff] }
  0x65   : > { %784 = vmatpush.msrb.mxu0 %v765_v29  ;;  %995 = vmatpush.msrb.mxu3 %v988_v6  ;;  %v981_v29 = vld [vmem:[#allocation7 + $0x128] sm:$0xff]  ;;  %v1045_v8 = vld [vmem:[#allocation7 + $0x180] sm:$0xff] }
  0x66   : > { %897 = vmatpush.msrb.mxu1 %v886_v2  ;;  %932 = vmatpush.msrb.mxu2 %v865_v13  ;;  %v1048_v2 = vld [vmem:[#allocation7 + $0x198] sm:$0xff]  ;;  %v1046_v5 = vld [vmem:[#allocation7 + $0x188] sm:$0xff] }
  0x67   : > { %785 = vmatpush.msrb.mxu0 %v764_v30  ;;  %996 = vmatpush.msrb.mxu3 %v987_v9  ;;  %v860_v30 = vld [vmem:[#allocation7 + $0x40] sm:$0xff]  ;;  %v1128_v9 = vld [vmem:[#allocation7 + $0x270] sm:$0xff] }
  0x68   : > { %898 = vmatpush.msrb.mxu1 %v885_v3  ;;  %933 = vmatpush.msrb.mxu2 %v864_v16  ;;  %v1047_v3 = vld [vmem:[#allocation7 + $0x190] sm:$0xff] }
  0x69   : > { %786 = vmatpush.msrb.mxu0 %v763_v31  ;;  %997 = vmatpush.msrb.mxu3 %v986_v14  ;;  %v1057_v31 = vld [vmem:[#allocation7 + $0x1e0] sm:$0xff] }
  0x6a   : > { %562 = vmatmul.f32.gmra.mxu0 %v516_v32  ;;  %600 = vmatmul.f32.gmra.mxu1 %v493_v33  ;;  %v980_v32 = vld [vmem:[#allocation7 + $0x120] sm:$0xff] }
  0x6b   : > { %662 = vmatmul.f32.gmra.mxu2 %v616_v34  ;;  %787 = vmatpush.msrb.mxu0 %v762_v35  ;;  %v880_v34 = vld [vmem:[#allocation7 + $0xa0] sm:$0xff]  ;;  %v859_v35 = vld [vmem:[#allocation7 + $0x38] sm:$0xff] }
  0x6c   : > { %731 = vmatmul.f32.gmra.mxu3 %v685_v36  ;;  %899 = vmatpush.msrb.mxu1 %v884_v10  ;;  %v1056_v36 = vld [vmem:[#allocation7 + $0x1d8] sm:$0xff]  ;;  %v1127_v10 = vld [vmem:[#allocation7 + $0x268] sm:$0xff] }
  0x6d   : > { %788 = vmatpush.msrb.mxu0 %v761_v37  ;;  %998 = vmatpush.msrb.mxu3 %v985_v15  ;;  %v979_v37 = vld [vmem:[#allocation7 + $0x118] sm:$0xff] }
  0x6e   : > { %900 = vmatpush.msrb.mxu1 %v883_v12  ;;  %934 = vmatpush.msrb.mxu2 %v863_v20  ;;  %v1125_v20 = vld [vmem:[#allocation7 + $0x258] sm:$0xff] }
  0x6f   : > { %789 = vmatpush.msrb.mxu0 %v760_v38  ;;  %999 = vmatpush.msrb.mxu3 %v984_v17  ;;  %v858_v38 = vld [vmem:[#allocation7 + $0x30] sm:$0xff] }
  0x70   : > { %901 = vmatpush.msrb.mxu1 %v882_v19  ;;  %935 = vmatpush.msrb.mxu2 %v862_v24  ;;  %v3905_v17 = vld [vmem:[%s4178_s2] ss:$0 sm:$0xff]  ;;  %v1126_v19 = vld [vmem:[#allocation7 + $0x260] sm:$0xff] }
  0x71   : > { %790 = vmatpush.msrb.mxu0 %v759_v39  ;;  %1000 = vmatpush.msrb.mxu3 %v983_v22  ;;  %v1055_v39 = vld [vmem:[#allocation7 + $0x1d0] sm:$0xff] }
  0x72   : > { %565 = vmatmul.f32.gmra.mxu0 %v517_v40  ;;  %603 = vmatmul.f32.gmra.mxu1 %v494_v41  ;;  %v978_v40 = vld [vmem:[#allocation7 + $0x110] sm:$0xff]  ;;  %v857_v41 = vld [vmem:[#allocation7 + $0x28] sm:$0xff] }
  0x73   : > { %665 = vmatmul.f32.gmra.mxu2 %v617_v42  ;;  %1061 = vmatpush.msra.mxu0 %v1060_v21  ;;  %v1054_v42 = vld [vmem:[#allocation7 + $0x1c8] sm:$0xff] }
  0x74   : > { %734 = vmatmul.f32.gmra.mxu3 %v686_v43  ;;  %902 = vmatpush.msrb.mxu1 %v881_v23  ;;  %v977_v43 = vld [vmem:[#allocation7 + $0x108] sm:$0xff] }
  0x75   : > { %1062 = vmatpush.msra.mxu0 %v1059_v25  ;;  %1001 = vmatpush.msrb.mxu3 %v982_v28 }
  0x76   : > { %936 = vmatpush.msrb.mxu2 %v861_v26  ;;  %903 = vmatpush.msrb.mxu1 %v880_v34 }
  0x77   : > { %1063 = vmatpush.msra.mxu0 %v1058_v27  ;;  %1002 = vmatpush.msrb.mxu3 %v981_v29  ;;  %v1124_v29 = vld [vmem:[#allocation7 + $0x250] sm:$0xff] }
  0x78   : > { %937 = vmatpush.msrb.mxu2 %v860_v30  ;;  %v1123_v30 = vld [vmem:[#allocation7 + $0x248] sm:$0xff] }
  0x79   : > { %1064 = vmatpush.msra.mxu0 %v1057_v31  ;;  %1003 = vmatpush.msrb.mxu3 %v980_v32 }
  0x7a   : > { %568 = vmatmul.f32.gmra.mxu0 %v518_v44  ;;  %606 = vmatmul.f32.gmra.mxu1 %v495_v45  ;;  %v856_v44 = vld [vmem:[#allocation7 + $0x20] sm:$0xff] }
  0x7b   : > { %668 = vmatmul.f32.gmra.mxu2 %v618_v46  ;;  %1065 = vmatpush.msra.mxu0 %v1056_v36  ;;  %v1053_v45 = vld [vmem:[#allocation7 + $0x1c0] sm:$0xff] }
  0x7c   : > { %737 = vmatmul.f32.gmra.mxu3 %v687_v47  ;;  %938 = vmatpush.msrb.mxu2 %v859_v35  ;;  %v976_v46 = vld [vmem:[#allocation7 + $0x100] sm:$0xff]  ;;  %v879_v47 = vld [vmem:[#allocation7 + $0x98] sm:$0xff] }
  0x7d   : > { %1004 = vmatpush.msrb.mxu3 %v979_v37  ;;  %1066 = vmatpush.msra.mxu0 %v1055_v39 }
  0x7e   : > { %939 = vmatpush.msrb.mxu2 %v858_v38  ;;  %904 = vmatpush.msrb.mxu1 %v879_v47  ;;  %v1120_v47 = vld [vmem:[#allocation7 + $0x230] sm:$0xff] }
  0x7f   : > { %1005 = vmatpush.msrb.mxu3 %v978_v40  ;;  %1067 = vmatpush.msra.mxu0 %v1054_v42 }
  0x80   : > { %940 = vmatpush.msrb.mxu2 %v857_v41 }
  0x81   : > { %1006 = vmatpush.msrb.mxu3 %v977_v43  ;;  %1068 = vmatpush.msra.mxu0 %v1053_v45  ;;  %v1122_v43 = vld [vmem:[#allocation7 + $0x240] sm:$0xff] }
  0x82   : > { %571 = vmatmul.f32.gmra.mxu0 %v519_v48  ;;  %609 = vmatmul.f32.gmra.mxu1 %v496_v49  ;;  %v878_v48 = vld [vmem:[#allocation7 + $0x90] sm:$0xff] }
  0x83   : > { %671 = vmatmul.f32.gmra.mxu2 %v619_v50  ;;  %v855_v50 = vld [vmem:[#allocation7 + $0x18] sm:$0xff]  ;;  %1007 = vmatpush.msrb.mxu3 %v976_v46 }
  0x84   : > { %740 = vmatmul.f32.gmra.mxu3 %v688_v51  ;;  %941 = vmatpush.msrb.mxu2 %v856_v44  ;;  %v1052_v51 = vld [vmem:[#allocation7 + $0x1b8] sm:$0xff] }
  0x85   : > { %905 = vmatpush.msrb.mxu1 %v878_v48  ;;  %1069 = vmatpush.msra.mxu0 %v1052_v51  ;;  %v1121_v44 = vld [vmem:[#allocation7 + $0x238] sm:$0xff] }
  0x86   : > { %942 = vmatpush.msrb.mxu2 %v855_v50 }
  0x8a   : > { %791 = vmatmul.f32.vlgmr.msrb.gmra.mxu0 %v751_v52 }
  0x92   : > { %794 = vmatmul.f32.gmra.mxu0 %v752_v53  ;;  %v854_v53 = vld [vmem:[#allocation7 + $0x10] sm:$0xff] }
  0x93   : > { %943 = vmatpush.msrb.mxu2 %v854_v53 }
  0x9a   : > { %797 = vmatmul.f32.gmra.mxu0 %v753_v54  ;;  %v1051_v54 = vld [vmem:[#allocation7 + $0x1b0] sm:$0xff] }
  0x9b   : > { %1070 = vmatpush.msra.mxu0 %v1051_v54 }
  0xa2   : > { %800 = vmatmul.f32.gmra.mxu0 %v754_v55 }
  0xaa   : > { %803 = vmatmul.f32.gmra.mxu0 %v755_v56  ;;  %v877_v56 = vld [vmem:[#allocation7 + $0x88] sm:$0xff] }
  0xab   : > { %906 = vmatpush.msrb.mxu1 %v877_v56 }
  0xad   : > { %907 = vmatpush.msrb.mxu1 %v876_v59 }
  0xaf   : > { %1130 = vmatpush.msra.mxu1 %v1129_v62 }
  0xb1   : > { %1131 = vmatpush.msra.mxu1 %v1128_v9 }
  0xb2   : > { %806 = vmatmul.f32.gmra.mxu0 %v756_v57  ;;  %v853_v57 = vld [vmem:[#allocation7 + $0x8] sm:$0xff] }
  0xb3   : > { %944 = vmatpush.msrb.mxu2 %v853_v57  ;;  %1132 = vmatpush.msra.mxu1 %v1127_v10 }
  0xb5   : > { %945 = vmatpush.msrb.mxu2 %v852_v60  ;;  %1133 = vmatpush.msra.mxu1 %v1126_v19  ;;  %v1118_v60 = vld [vmem:[#allocation7 + $0x220] sm:$0xff] }
  0xb7   : > { %1134 = vmatpush.msra.mxu1 %v1125_v20  ;;  %v1114_v20 = vld [vmem:[#allocation7 + $0x200] sm:$0xff] }
  0xb9   : > { %1135 = vmatpush.msra.mxu1 %v1124_v29 }
  0xba   : > { %809 = vmatmul.f32.gmra.mxu0 %v757_v58  ;;  %v1050_v58 = vld [vmem:[#allocation7 + $0x1a8] sm:$0xff] }
  0xbb   : > { %1071 = vmatpush.msra.mxu0 %v1050_v58  ;;  %1136 = vmatpush.msra.mxu1 %v1123_v30  ;;  %v1119_v58 = vld [vmem:[#allocation7 + $0x228] sm:$0xff] }
  0xbd   : > { %1072 = vmatpush.msra.mxu0 %v1049_v61  ;;  %1137 = vmatpush.msra.mxu1 %v1122_v43 }
  0xbf   : > { %1073 = vmatpush.msra.mxu0 %v1048_v2  ;;  %1138 = vmatpush.msra.mxu1 %v1121_v44 }
  0xc1   : > { %1074 = vmatpush.msra.mxu0 %v1047_v3  ;;  %1139 = vmatpush.msra.mxu1 %v1120_v47 }
  0xc3   : > { %1075 = vmatpush.msra.mxu0 %v1046_v5  ;;  %1140 = vmatpush.msra.mxu1 %v1119_v58  ;;  %v1244_v58 = vld [vmem:[#allocation9 + $0xe8] sm:$0xff] }
  0xc5   : > { %1076 = vmatpush.msra.mxu0 %v1045_v8  ;;  %1141 = vmatpush.msra.mxu1 %v1118_v60 }
  0xce   : > { %v3887_v0 = vpop.f32.mrf.mxu0 }
  0xcf   : > { %v592_v52 = vpop.f32.mrf.mxu1 }
  0xd0   : > { %v593_v12 = vadd.f32 %v592_v52, %v3887_v0 }
  0xd5   : > { %v654_v55 = vpop.f32.mrf.mxu2 }
  0xd6   : > { %v675_v14 = vadd.f32 %v654_v55, %v593_v12 }
  0xd7   : > { %v3889_v7 = vpop.f32.mrf.mxu0  ;;  %v723_v63 = vpop.f32.mrf.mxu3 }
  0xd8   : > { %v595_v4 = vpop.f32.mrf.mxu1  ;;  %v744_v16 = vadd.f32 %v723_v63, %v675_v14  ;;  %v1117_v63 = vld [vmem:[#allocation7 + $0x218] sm:$0xff]  ;;  %v1115_v14 = vld [vmem:[#allocation7 + $0x208] sm:$0xff] }
  0xd9   : > { %v596_v23 = vadd.f32 %v595_v4, %v3889_v7  ;;  %1142 = vmatpush.msra.mxu1 %v1117_v63  ;;  %v1241_v63 = vld [vmem:[#allocation9 + $0xd0] sm:$0xff] }
  0xde   : > { %v657_v6 = vpop.f32.mrf.mxu2 }
  0xdf   : > { %v3891_v18 = vpop.f32.mrf.mxu0  ;;  %v726_v13 = vpop.f32.mrf.mxu3  ;;  %v676_v0 = vadd.f32 %v657_v6, %v596_v23  ;;  %v1116_v6 = vld [vmem:[#allocation7 + $0x210] sm:$0xff] }
  0xe0   : > { %v598_v15 = vpop.f32.mrf.mxu1  ;;  %1143 = vmatpush.msra.mxu1 %v1116_v6  ;;  %v1222_v6 = vld [vmem:[#allocation9 + $0x78] sm:$0xff] }
  0xe1   : > { %v745_v28 = vadd.f32 %v726_v13, %v676_v0  ;;  %v599_v34 = vadd.f32 %v598_v15, %v3891_v18  ;;  %1285 = vmatpush.msra.mxu3 %v1222_v6 }
  0xe2   : > { %1144 = vmatpush.msra.mxu1 %v1115_v14  ;;  %v1340_v14 = vld [vmem:[#allocation9 + $0x148] sm:$0xff] }
  0xe4   : > { %1145 = vmatpush.msra.mxu1 %v1114_v20  ;;  %v1218_v20 = vld [vmem:[#allocation9 + $0x58] sm:$0xff] }
  0xe6   : > { %v660_v21 = vpop.f32.mrf.mxu2 }
  0xe7   : > { %v3893_v33 = vpop.f32.mrf.mxu0  ;;  %v729_v26 = vpop.f32.mrf.mxu3  ;;  %v677_v7 = vadd.f32 %v660_v21, %v599_v34 }
  0xe8   : > { %v601_v31 = vpop.f32.mrf.mxu1 }
  0xe9   : > { %v746_v42 = vadd.f32 %v729_v26, %v677_v7  ;;  %v602_v18 = vadd.f32 %v601_v31, %v3893_v33 }
  0xee   : > { %v663_v36 = vpop.f32.mrf.mxu2 }
  0xef   : > { %v3895_v49 = vpop.f32.mrf.mxu0  ;;  %v732_v39 = vpop.f32.mrf.mxu3  ;;  %v678_v50 = vadd.f32 %v663_v36, %v602_v18 }
  0xf0   : > { %v604_v48 = vpop.f32.mrf.mxu1 }
  0xf1   : > { %v747_v57 = vadd.f32 %v732_v39, %v678_v50  ;;  %v605_v61 = vadd.f32 %v604_v48, %v3895_v49 }
  0xf6   : > { %v666_v52 = vpop.f32.mrf.mxu2 }
  0xf7   : > { %v3897_v1 = vpop.f32.mrf.mxu0  ;;  %v735_v59 = vpop.f32.mrf.mxu3  ;;  %v679_v2 = vadd.f32 %v666_v52, %v605_v61  ;;  %v1346_v61 = vld [vmem:[#allocation9 + $0x178] sm:$0xff] }
  0xf8   : > { %v607_v4 = vpop.f32.mrf.mxu1  ;;  %1347 = vmatpush.msrb.mxu0 %v1346_v61  ;;  %v1403_v61 = vld [vmem:[#allocation9 + $0x198] sm:$0xff] }
  0xf9   : > { %v748_v13 = vadd.f32 %v735_v59, %v679_v2  ;;  %v608_v15 = vadd.f32 %v607_v4, %v3897_v1  ;;  %v1243_v59 = vld [vmem:[#allocation9 + $0xe0] sm:$0xff]  ;;  %v1240_v2 = vld [vmem:[#allocation9 + $0xc8] sm:$0xff] }
  0xfa   : > { %v1343_v4 = vld [vmem:[#allocation9 + $0x160] sm:$0xff] }
  0xfe   : > { %v669_v8 = vpop.f32.mrf.mxu2 }
  0xff   : > { %v3899_v11 = vpop.f32.mrf.mxu0  ;;  %v738_v19 = vpop.f32.mrf.mxu3  ;;  %v680_v21 = vadd.f32 %v669_v8, %v608_v15  ;;  %v1342_v8 = vld [vmem:[#allocation9 + $0x158] sm:$0xff]  ;;  %v1219_v15 = vld [vmem:[#allocation9 + $0x60] sm:$0xff] }
 0x107   : > { %v792_v22 = vpop.f32.mrf.mxu0  ;;  %v741_v34 = vpop.f32.mrf.mxu3 }
 0x108   : > { %v813_v24 = vadd.f32 %v792_v22, %v744_v16 }
 0x10a   : > { %v824_v25 = vadd.f32 %v3905_v17, %v813_v24  ;;  %v610_v24 = vpop.f32.mrf.mxu1 }
 0x10b   : > { %v611_v29 = vadd.f32 %v610_v24, %v3899_v11  ;;  %v1217_v24 = vld [vmem:[#allocation9 + $0x50] sm:$0xff] }
 0x10c   : > { %v831_v27 = vmax.f32 %v824_v25, 0.0 }
 0x10e   : > { %838 = vst [vmem:[#allocation2 + $0x2] sm:$0xff] %v831_v27  ;;  %1008 = vmatmul.f32.vlgmr.msrb.gmra.mxu3 %v831_v27  ;;  %v749_v27 = vadd.f32 %v738_v19, %v680_v21  ;;  %v1415_v21 = vld [vmem:[#allocation9 + $0x1f8] sm:$0xff] }
 0x10f   : > { %v795_v32 = vpop.f32.mrf.mxu0 }
 0x110   : > { %v814_v35 = vadd.f32 %v795_v32, %v745_v28  ;;  %v672_v28 = vpop.f32.mrf.mxu2 }
 0x111   : > { %v681_v31 = vadd.f32 %v672_v28, %v611_v29  ;;  %v1413_v28 = vld [vmem:[#allocation9 + $0x1e8] sm:$0xff]  ;;  %v1215_v29 = vld [vmem:[#allocation9 + $0x40] sm:$0xff] }
 0x112   : > { %v825_v37 = vadd.f32 %v3905_v17, %v814_v35 }
 0x114   : > { %v832_v38 = vmax.f32 %v825_v37, 0.0 }
 0x115   : > { %v868_v40 = vld [vmem:[#allocation2 + $0x1] sm:$0xff] }
 0x116   : > { %v845_v41 = vld [vmem:[#allocation2] sm:$0xff]  ;;  %839 = vst [vmem:[#allocation2 + $0xa] sm:$0xff] %v832_v38  ;;  %908 = vmatmul.f32.vlgmr.msrb.gmra.mxu1 %v868_v40  ;;  %1011 = vmatmul.f32.gmra.mxu3 %v832_v38  ;;  %v750_v38 = vadd.f32 %v741_v34, %v681_v31  ;;  %v1335_v31 = vld [vmem:[#allocation9 + $0x120] sm:$0xff] }
 0x117   : > { %946 = vmatmul.f32.vlgmr.msrb.gmra.mxu2 %v845_v41  ;;  %v798_v45 = vpop.f32.mrf.mxu0  ;;  %1416 = vmatpush.msrb.mxu1 %v1415_v21  ;;  %v1214_v34 = vld [vmem:[#allocation9 + $0x38] sm:$0xff] }
 0x118   : > { %v815_v46 = vadd.f32 %v798_v45, %v746_v42  ;;  %v1480_v21 = vld [vmem:[#allocation9 + $0x258] sm:$0xff] }
 0x11a   : > { %v826_v51 = vadd.f32 %v3905_v17, %v815_v46 }
 0x11c   : > { %v833_v53 = vmax.f32 %v826_v51, 0.0 }
 0x11d   : > { %v869_v54 = vld [vmem:[#allocation2 + $0x9] sm:$0xff] }
 0x11e   : > { %v846_v55 = vld [vmem:[#allocation2 + $0x8] sm:$0xff]  ;;  %840 = vst [vmem:[#allocation2 + $0x12] sm:$0xff] %v833_v53  ;;  %911 = vmatmul.f32.gmra.mxu1 %v869_v54  ;;  %1014 = vmatmul.f32.gmra.mxu3 %v833_v53 }
 0x11f   : > { %v1037_v56 = vld [vmem:[#allocation2 + $0x3] sm:$0xff]  ;;  %949 = vmatmul.f32.gmra.mxu2 %v846_v55  ;;  %v801_v33 = vpop.f32.mrf.mxu0  ;;  %v1112_v55 = vld [vmem:[#allocation2 + $0x34] sm:$0x3] }
 0x120   : > { %1077 = vmatmul.f32.vlgmr.msra.gmra.mxu0 %v1037_v56  ;;  %v816_v62 = vadd.f32 %v801_v33, %v747_v57  ;;  %v1106_v48 = vld [vmem:[#allocation2 + $0x4] sm:$0xff]  ;;  %v1245_v57 = vld [vmem:[#allocation9 + $0xf0] sm:$0xff] }
 0x121   : > { %v1246_v56 = vld [vmem:[#allocation9 + $0xf8] sm:$0xff] }
 0x122   : > { %v827_v3 = vadd.f32 %v3905_v17, %v816_v62  ;;  %1247 = vmatpush.msra.mxu2 %v1246_v56  ;;  %v1242_v33 = vld [vmem:[#allocation9 + $0xd8] sm:$0xff]  ;;  %v1345_v62 = vld [vmem:[#allocation9 + $0x170] sm:$0xff]  ;;  %v1207_v56 = vld [vmem:[#allocation9] sm:$0xff] }
 0x123   : > { %1348 = vmatpush.msrb.mxu0 %v1345_v62 }
 0x124   : > { %v834_v5 = vmax.f32 %v827_v3, 0.0  ;;  %1248 = vmatpush.msra.mxu2 %v1245_v57  ;;  %v1344_v3 = vld [vmem:[#allocation9 + $0x168] sm:$0xff]  ;;  %v1404_v57 = vld [vmem:[#allocation9 + $0x1a0] sm:$0xff] }
 0x125   : > { %v870_v9 = vld [vmem:[#allocation2 + $0x11] sm:$0xff]  ;;  %1349 = vmatpush.msrb.mxu0 %v1344_v3 }
 0x126   : > { %v847_v10 = vld [vmem:[#allocation2 + $0x10] sm:$0xff]  ;;  %841 = vst [vmem:[#allocation2 + $0x1a] sm:$0xff] %v834_v5  ;;  %914 = vmatmul.f32.gmra.mxu1 %v870_v9  ;;  %1017 = vmatmul.f32.gmra.mxu3 %v834_v5  ;;  %v1221_v9 = vld [vmem:[#allocation9 + $0x70] sm:$0xff] }
 0x127   : > { %v1038_v12 = vld [vmem:[#allocation2 + $0xb] sm:$0xff]  ;;  %952 = vmatmul.f32.gmra.mxu2 %v847_v10  ;;  %v804_v49 = vpop.f32.mrf.mxu0  ;;  %1350 = vmatpush.msrb.mxu0 %v1343_v4  ;;  %v1341_v10 = vld [vmem:[#allocation9 + $0x150] sm:$0xff] }
 0x128   : > { %1080 = vmatmul.f32.gmra.mxu0 %v1038_v12  ;;  %v817_v16 = vadd.f32 %v804_v49, %v748_v13  ;;  %1249 = vmatpush.msra.mxu2 %v1244_v58  ;;  %v1239_v12 = vld [vmem:[#allocation9 + $0xc0] sm:$0xff]  ;;  %v1238_v13 = vld [vmem:[#allocation9 + $0xb8] sm:$0xff]  ;;  %v1220_v49 = vld [vmem:[#allocation9 + $0x68] sm:$0xff] }
 0x129   : > { %1351 = vmatpush.msrb.mxu0 %v1342_v8  ;;  %1286 = vmatpush.msra.mxu3 %v1221_v9  ;;  %v1484_v58 = vld [vmem:[#allocation9 + $0x278] sm:$0xff]  ;;  %v1401_v3 = vld [vmem:[#allocation9 + $0x188] sm:$0xff]  ;;  %v1400_v4 = vld [vmem:[#allocation9 + $0x180] sm:$0xff] }
 0x12a   : > { %v828_v22 = vadd.f32 %v3905_v17, %v817_v16  ;;  %1250 = vmatpush.msra.mxu2 %v1243_v59  ;;  %v1339_v16 = vld [vmem:[#allocation9 + $0x140] sm:$0xff]  ;;  %v1483_v8 = vld [vmem:[#allocation9 + $0x270] sm:$0xff]  ;;  %v1482_v9 = vld [vmem:[#allocation9 + $0x268] sm:$0xff] }
 0x12b   : > { %1352 = vmatpush.msrb.mxu0 %v1341_v10  ;;  %1287 = vmatpush.msra.mxu3 %v1220_v49 }
 0x12c   : > { %v835_v23 = vmax.f32 %v828_v22, 0.0  ;;  %1251 = vmatpush.msra.mxu2 %v1242_v33  ;;  %v1338_v22 = vld [vmem:[#allocation9 + $0x138] sm:$0xff] }
 0x12d   : > { %v871_v0 = vld [vmem:[#allocation2 + $0x19] sm:$0xff]  ;;  %1353 = vmatpush.msrb.mxu0 %v1340_v14  ;;  %1288 = vmatpush.msra.mxu3 %v1219_v15 }
 0x12e   : > { %v848_v25 = vld [vmem:[#allocation2 + $0x18] sm:$0xff]  ;;  %842 = vst [vmem:[#allocation2 + $0x22] sm:$0xff] %v835_v23  ;;  %917 = vmatmul.f32.gmra.mxu1 %v871_v0  ;;  %1020 = vmatmul.f32.gmra.mxu3 %v835_v23 }
 0x12f   : > { %v1039_v26 = vld [vmem:[#allocation2 + $0x13] sm:$0xff]  ;;  %955 = vmatmul.f32.gmra.mxu2 %v848_v25  ;;  %v807_v1 = vpop.f32.mrf.mxu0  ;;  %1354 = vmatpush.msrb.mxu0 %v1339_v16 }
 0x130   : > { %1083 = vmatmul.f32.gmra.mxu0 %v1039_v26  ;;  %v818_v30 = vadd.f32 %v807_v1, %v749_v27  ;;  %v1108_v51 = vld [vmem:[#allocation2 + $0x14] sm:$0xff]  ;;  %1252 = vmatpush.msra.mxu2 %v1241_v63 }
 0x131   : > { %v1237_v23 = vld [vmem:[#allocation9 + $0xb0] sm:$0xff]  ;;  %1289 = vmatpush.msra.mxu3 %v1218_v20  ;;  %1355 = vmatpush.msrb.mxu0 %v1338_v22  ;;  %v1236_v26 = vld [vmem:[#allocation9 + $0xa8] sm:$0xff] }
 0x132   : > { %v829_v32 = vadd.f32 %v3905_v17, %v818_v30  ;;  %1253 = vmatpush.msra.mxu2 %v1240_v2  ;;  %v1414_v0 = vld [vmem:[#allocation9 + $0x1f0] sm:$0xff]  ;;  %v1216_v27 = vld [vmem:[#allocation9 + $0x48] sm:$0xff]  ;;  %v1412_v30 = vld [vmem:[#allocation9 + $0x1e0] sm:$0xff] }
 0x133   : > { %v1337_v25 = vld [vmem:[#allocation9 + $0x130] sm:$0xff]  ;;  %1290 = vmatpush.msra.mxu3 %v1217_v24  ;;  %1417 = vmatpush.msrb.mxu1 %v1414_v0  ;;  %v1336_v1 = vld [vmem:[#allocation9 + $0x128] sm:$0xff] }
 0x134   : > { %v836_v35 = vmax.f32 %v829_v32, 0.0  ;;  %1254 = vmatpush.msra.mxu2 %v1239_v12  ;;  %1356 = vmatpush.msrb.mxu0 %v1337_v25  ;;  %v1402_v2 = vld [vmem:[#allocation9 + $0x190] sm:$0xff] }
 0x135   : > { %v872_v36 = vld [vmem:[#allocation2 + $0x21] sm:$0xff]  ;;  %1291 = vmatpush.msra.mxu3 %v1216_v27  ;;  %1418 = vmatpush.msrb.mxu1 %v1413_v28  ;;  %v3939_v20 = vld [vmem:[%s4180_s4] ss:$0 sm:$0xff] }
 0x136   : > { %v849_v7 = vld [vmem:[#allocation2 + $0x20] sm:$0xff]  ;;  %843 = vst [vmem:[#allocation2 + $0x2a] sm:$0xff] %v836_v35  ;;  %920 = vmatmul.f32.gmra.mxu1 %v872_v36  ;;  %1023 = vmatmul.f32.gmra.mxu3 %v836_v35 }
 0x137   : > { %v1040_v37 = vld [vmem:[#allocation2 + $0x1b] sm:$0xff]  ;;  %958 = vmatmul.f32.gmra.mxu2 %v849_v7  ;;  %v810_v39 = vpop.f32.mrf.mxu0  ;;  %1357 = vmatpush.msrb.mxu0 %v1336_v1  ;;  %v1235_v7 = vld [vmem:[#allocation9 + $0xa0] sm:$0xff] }
 0x138   : > { %1086 = vmatmul.f32.gmra.mxu0 %v1040_v37  ;;  %v819_v40 = vadd.f32 %v810_v39, %v750_v38  ;;  %v1109_v52 = vld [vmem:[#allocation2 + $0x1c] sm:$0xff]  ;;  %1255 = vmatpush.msra.mxu2 %v1238_v13 }
 0x139   : > { %1292 = vmatpush.msra.mxu3 %v1215_v29  ;;  %1419 = vmatpush.msrb.mxu1 %v1412_v30  ;;  %v1411_v35 = vld [vmem:[#allocation9 + $0x1d8] sm:$0xff]  ;;  %v1213_v37 = vld [vmem:[#allocation9 + $0x30] sm:$0xff]  ;;  %v1478_v30 = vld [vmem:[#allocation9 + $0x248] sm:$0xff] }
 0x13a   : > { %v830_v41 = vadd.f32 %v3905_v17, %v819_v40  ;;  %v1107_v17 = vld [vmem:[#allocation2 + $0xc] sm:$0xff]  ;;  %1256 = vmatpush.msra.mxu2 %v1237_v23  ;;  %1358 = vmatpush.msrb.mxu0 %v1335_v31  ;;  %v1334_v36 = vld [vmem:[#allocation9 + $0x118] sm:$0xff]  ;;  %v1410_v38 = vld [vmem:[#allocation9 + $0x1d0] sm:$0xff] }
 0x13b   : > { %1293 = vmatpush.msra.mxu3 %v1214_v34  ;;  %1420 = vmatpush.msrb.mxu1 %v1411_v35  ;;  %v1333_v39 = vld [vmem:[#allocation9 + $0x110] sm:$0xff]  ;;  %v1212_v40 = vld [vmem:[#allocation9 + $0x28] sm:$0xff] }
 0x13c   : > { %v837_v11 = vmax.f32 %v830_v41, 0.0  ;;  %1257 = vmatpush.msra.mxu2 %v1236_v26  ;;  %1359 = vmatpush.msrb.mxu0 %v1334_v36  ;;  %v1409_v41 = vld [vmem:[#allocation9 + $0x1c8] sm:$0xff]  ;;  %v1479_v29 = vld [vmem:[#allocation9 + $0x250] sm:$0xff] }
 0x13d   : > { %v873_v42 = vld [vmem:[#allocation2 + $0x29] sm:$0xff]  ;;  %1294 = vmatpush.msra.mxu3 %v1213_v37  ;;  %1421 = vmatpush.msrb.mxu1 %v1410_v38 }
 0x13e   : > { %v850_v43 = vld [vmem:[#allocation2 + $0x28] sm:$0xff]  ;;  %844 = vst [vmem:[#allocation2 + $0x32] sm:$0x3] %v837_v11  ;;  %923 = vmatmul.f32.gmra.mxu1 %v873_v42  ;;  %v851_v45 = vld [vmem:[#allocation2 + $0x30] sm:$0x3]  ;;  %1258 = vmatpush.msra.mxu2 %v1235_v7  ;;  %v1332_v11 = vld [vmem:[#allocation9 + $0x108] sm:$0xff] }
 0x13f   : > { %v1041_v44 = vld [vmem:[#allocation2 + $0x23] sm:$0xff]  ;;  %961 = vmatmul.f32.gmra.mxu2 %v850_v43  ;;  %1360 = vmatpush.msrb.mxu0 %v1333_v39 }
 0x140   : > { %1089 = vmatmul.f32.gmra.mxu0 %v1041_v44  ;;  %v1110_v53 = vld [vmem:[#allocation2 + $0x24] sm:$0xff]  ;;  %1295 = vmatpush.msra.mxu3 %v1212_v40 }
 0x141   : > { %1422 = vmatpush.msrb.mxu1 %v1409_v41  ;;  %v1211_v42 = vld [vmem:[#allocation9 + $0x20] sm:$0xff]  ;;  %1361 = vmatpush.msrb.mxu0 %v1332_v11 }
 0x142   : > { %v1408_v43 = vld [vmem:[#allocation9 + $0x1c0] sm:$0xff]  ;;  %1296 = vmatpush.msra.mxu3 %v1211_v42  ;;  %v1476_v42 = vld [vmem:[#allocation9 + $0x238] sm:$0xff] }
 0x143   : > { %v1331_v44 = vld [vmem:[#allocation9 + $0x100] sm:$0xff]  ;;  %1423 = vmatpush.msrb.mxu1 %v1408_v43 }
 0x144   : > { %1362 = vmatpush.msrb.mxu0 %v1331_v44 }
 0x145   : > { %v874_v18 = vld [vmem:[#allocation2 + $0x31] sm:$0x3]  ;;  %v1043_v50 = vld [vmem:[#allocation2 + $0x33] sm:$0x3] }
 0x146   : > { %v974_v46 = vld [vmem:[#allocation2 + $0x32] sm:$0x3]  ;;  %926 = vmatmul.f32.gmra.mxu1 %v874_v18  ;;  %v1233_v18 = vld [vmem:[#allocation9 + $0x90] sm:$0xff] }
 0x147   : > { %v1042_v47 = vld [vmem:[#allocation2 + $0x2b] sm:$0xff]  ;;  %964 = vmatmul.f32.gmra.mxu2 %v851_v45  ;;  %1026 = vmatmul.f32.gmra.mxu3 %v974_v46  ;;  %v1234_v45 = vld [vmem:[#allocation9 + $0x98] sm:$0xff] }
 0x148   : > { %1092 = vmatmul.f32.gmra.mxu0 %v1042_v47  ;;  %v1111_v54 = vld [vmem:[#allocation2 + $0x2c] sm:$0xff]  ;;  %1259 = vmatpush.msra.mxu2 %v1234_v45 }
 0x14a   : > { %1260 = vmatpush.msra.mxu2 %v1233_v18  ;;  %v1475_v18 = vld [vmem:[#allocation9 + $0x230] sm:$0xff] }
 0x14e   : > { %1146 = vmatmul.f32.vlgmr.msra.gmra.mxu1 %v1106_v48  ;;  %v1210_v48 = vld [vmem:[#allocation9 + $0x18] sm:$0xff] }
 0x14f   : > { %1297 = vmatpush.msra.mxu3 %v1210_v48 }
 0x150   : > { %1095 = vmatmul.f32.gmra.mxu0 %v1043_v50  ;;  %v1407_v50 = vld [vmem:[#allocation9 + $0x1b8] sm:$0xff] }
 0x151   : > { %1424 = vmatpush.msrb.mxu1 %v1407_v50 }
 0x156   : > { %1149 = vmatmul.f32.gmra.mxu1 %v1107_v17  ;;  %v1209_v17 = vld [vmem:[#allocation9 + $0x10] sm:$0xff] }
 0x157   : > { %1298 = vmatpush.msra.mxu3 %v1209_v17 }
 0x15e   : > { %1152 = vmatmul.f32.gmra.mxu1 %v1108_v51  ;;  %v1406_v51 = vld [vmem:[#allocation9 + $0x1b0] sm:$0xff] }
 0x15f   : > { %1425 = vmatpush.msrb.mxu1 %v1406_v51 }
 0x166   : > { %1155 = vmatmul.f32.gmra.mxu1 %v1109_v52  ;;  %v1232_v52 = vld [vmem:[#allocation9 + $0x88] sm:$0xff] }
 0x167   : > { %1261 = vmatpush.msra.mxu2 %v1232_v52 }
 0x16e   : > { %1158 = vmatmul.f32.gmra.mxu1 %v1110_v53  ;;  %v1208_v53 = vld [vmem:[#allocation9 + $0x8] sm:$0xff] }
 0x16f   : > { %1299 = vmatpush.msra.mxu3 %v1208_v53 }
 0x171   : > { %1300 = vmatpush.msra.mxu3 %v1207_v56 }
 0x176   : > { %1161 = vmatmul.f32.gmra.mxu1 %v1111_v54  ;;  %v1405_v54 = vld [vmem:[#allocation9 + $0x1a8] sm:$0xff] }
 0x177   : > { %1426 = vmatpush.msrb.mxu1 %v1405_v54  ;;  %v1474_v54 = vld [vmem:[#allocation9 + $0x228] sm:$0xff] }
 0x179   : > { %1427 = vmatpush.msrb.mxu1 %v1404_v57  ;;  %v1473_v57 = vld [vmem:[#allocation9 + $0x220] sm:$0xff] }
 0x17b   : > { %1428 = vmatpush.msrb.mxu1 %v1403_v61 }
 0x17d   : > { %1429 = vmatpush.msrb.mxu1 %v1402_v2 }
 0x17e   : > { %1164 = vmatmul.f32.gmra.mxu1 %v1112_v55  ;;  %v1231_v55 = vld [vmem:[#allocation9 + $0x80] sm:$0xff] }
 0x17f   : > { %1262 = vmatpush.msra.mxu2 %v1231_v55  ;;  %1430 = vmatpush.msrb.mxu1 %v1401_v3 }
 0x181   : > { %1485 = vmatpush.msrb.mxu2 %v1484_v58  ;;  %1431 = vmatpush.msrb.mxu1 %v1400_v4 }
 0x183   : > { %1486 = vmatpush.msrb.mxu2 %v1483_v8 }
 0x185   : > { %1487 = vmatpush.msrb.mxu2 %v1482_v9 }
 0x191   : > { %v1009_v59 = vpop.f32.mrf.mxu3 }
 0x193   : > { %v3920_v60 = vpop.f32.mrf.mxu1 }
 0x199   : > { %v1012_v12 = vpop.f32.mrf.mxu3 }
 0x19a   : > { %v947_v46 = vpop.f32.mrf.mxu2 }
 0x19b   : > { %v3922_v5 = vpop.f32.mrf.mxu1  ;;  %v948_v6 = vadd.f32 %v947_v46, %v3920_v60  ;;  %v1481_v60 = vld [vmem:[#allocation9 + $0x260] sm:$0xff] }
 0x19c   : > { %1488 = vmatpush.msrb.mxu2 %v1481_v60 }
 0x19d   : > { %v1078_v62 = vpop.f32.mrf.mxu0  ;;  %v1030_v13 = vadd.f32 %v1009_v59, %v948_v6 }
 0x19e   : > { %1489 = vmatpush.msrb.mxu2 %v1480_v21 }
 0x19f   : > { %v1099_v15 = vadd.f32 %v1078_v62, %v1030_v13  ;;  %v1472_v62 = vld [vmem:[#allocation9 + $0x218] sm:$0xff] }
 0x1a0   : > { %1490 = vmatpush.msrb.mxu2 %v1479_v29 }
 0x1a1   : > { %v1015_v25 = vpop.f32.mrf.mxu3 }
 0x1a2   : > { %v950_v63 = vpop.f32.mrf.mxu2  ;;  %1491 = vmatpush.msrb.mxu2 %v1478_v30 }
 0x1a3   : > { %v3924_v19 = vpop.f32.mrf.mxu1  ;;  %v951_v16 = vadd.f32 %v950_v63, %v3922_v5 }
 0x1a5   : > { %v1081_v49 = vpop.f32.mrf.mxu0  ;;  %v1031_v24 = vadd.f32 %v1012_v12, %v951_v16  ;;  %v1469_v16 = vld [vmem:[#allocation9 + $0x200] sm:$0xff] }
 0x1a7   : > { %v1100_v1 = vadd.f32 %v1081_v49, %v1031_v24  ;;  %v1470_v49 = vld [vmem:[#allocation9 + $0x208] sm:$0xff] }
 0x1a9   : > { %v1018_v37 = vpop.f32.mrf.mxu3 }
 0x1aa   : > { %v953_v14 = vpop.f32.mrf.mxu2 }
 0x1ab   : > { %v3926_v32 = vpop.f32.mrf.mxu1  ;;  %v954_v5 = vadd.f32 %v953_v14, %v3924_v19  ;;  %v1477_v19 = vld [vmem:[#allocation9 + $0x240] sm:$0xff] }
 0x1ac   : > { %1492 = vmatpush.msrb.mxu2 %v1477_v19 }
 0x1ad   : > { %v1084_v26 = vpop.f32.mrf.mxu0  ;;  %v1032_v35 = vadd.f32 %v1015_v25, %v954_v5 }
 0x1ae   : > { %1493 = vmatpush.msrb.mxu2 %v1476_v42 }
 0x1af   : > { %v1101_v40 = vadd.f32 %v1084_v26, %v1032_v35 }
 0x1b0   : > { %1494 = vmatpush.msrb.mxu2 %v1475_v18 }
 0x1b1   : > { %v1021_v55 = vpop.f32.mrf.mxu3 }
 0x1b2   : > { %v956_v28 = vpop.f32.mrf.mxu2  ;;  %1495 = vmatpush.msrb.mxu2 %v1474_v54  ;;  %v1599_v54 = vld [vmem:[#allocation10 + $0xe8] sm:$0xff] }
 0x1b3   : > { %v3928_v47 = vpop.f32.mrf.mxu1  ;;  %v957_v41 = vadd.f32 %v956_v28, %v3926_v32 }
 0x1b4   : > { %1496 = vmatpush.msrb.mxu2 %v1473_v57 }
 0x1b5   : > { %v1087_v11 = vpop.f32.mrf.mxu0  ;;  %v1033_v46 = vadd.f32 %v1018_v37, %v957_v41 }
 0x1b6   : > { %1497 = vmatpush.msrb.mxu2 %v1472_v62  ;;  %v1699_v62 = vld [vmem:[#allocation10 + $0x168] sm:$0xff] }
 0x1b7   : > { %v1102_v52 = vadd.f32 %v1087_v11, %v1033_v46 }
 0x1ba   : > { %v959_v43 = vpop.f32.mrf.mxu2 }
 0x1bb   : > { %v3930_v33 = vpop.f32.mrf.mxu1  ;;  %v960_v53 = vadd.f32 %v959_v43, %v3928_v47  ;;  %v1471_v47 = vld [vmem:[#allocation9 + $0x210] sm:$0xff] }
 0x1bc   : > { %1498 = vmatpush.msrb.mxu2 %v1471_v47  ;;  %v1577_v47 = vld [vmem:[#allocation10 + $0x78] sm:$0xff] }
 0x1bd   : > { %v1090_v59 = vpop.f32.mrf.mxu0  ;;  %v1034_v63 = vadd.f32 %v1021_v55, %v960_v53  ;;  %v1600_v53 = vld [vmem:[#allocation10 + $0xf0] sm:$0xff]  ;;  %v1598_v55 = vld [vmem:[#allocation10 + $0xe0] sm:$0xff]  ;;  %1640 = vmatpush.msra.mxu0 %v1577_v47 }
 0x1be   : > { %1499 = vmatpush.msrb.mxu2 %v1470_v49  ;;  %v1593_v49 = vld [vmem:[#allocation10 + $0xb8] sm:$0xff] }
 0x1bf   : > { %v1103_v9 = vadd.f32 %v1090_v59, %v1034_v63  ;;  %v1596_v59 = vld [vmem:[#allocation10 + $0xd0] sm:$0xff]  ;;  %v1595_v63 = vld [vmem:[#allocation10 + $0xc8] sm:$0xff] }
 0x1c0   : > { %1500 = vmatpush.msrb.mxu2 %v1469_v16  ;;  %v1694_v16 = vld [vmem:[#allocation10 + $0x140] sm:$0xff] }
 0x1c2   : > { %v962_v61 = vpop.f32.mrf.mxu2 }
 0x1c3   : > { %v3933_v10 = vpop.f32.mrf.mxu1  ;;  %v963_v12 = vadd.f32 %v962_v61, %v3930_v33  ;;  %v1700_v61 = vld [vmem:[#allocation10 + $0x170] sm:$0xff] }
 0x1cb   : > { %v1147_v22 = vpop.f32.mrf.mxu1 }
 0x1cc   : > { %v1168_v23 = vadd.f32 %v1147_v22, %v1099_v15  ;;  %v1024_v15 = vpop.f32.mrf.mxu3  ;;  %v1093_v22 = vpop.f32.mrf.mxu0 }
 0x1cd   : > { %v1035_v60 = vadd.f32 %v1024_v15, %v963_v12  ;;  %v1575_v12 = vld [vmem:[#allocation10 + $0x68] sm:$0xff]  ;;  %v1592_v15 = vld [vmem:[#allocation10 + $0xb0] sm:$0xff] }
 0x1ce   : > { %v1179_v0 = vadd.f32 %v3939_v20, %v1168_v23  ;;  %v965_v23 = vpop.f32.mrf.mxu2 }
 0x1cf   : > { %v1104_v26 = vadd.f32 %v1093_v22, %v1035_v60  ;;  %v1770_v22 = vld [vmem:[#allocation10 + $0x1f8] sm:$0xff] }
 0x1d0   : > { %v1186_v27 = vmax.f32 %v1179_v0, 0.0 }
 0x1d2   : > { %1193 = vst [vmem:[#allocation2 + $0x2] sm:$0xff] %v1186_v27  ;;  %1363 = vmatmul.f32.vlgmr.msrb.gmra.mxu0 %v1186_v27  ;;  %v966_v27 = vadd.f32 %v965_v23, %v3933_v10  ;;  %v1693_v23 = vld [vmem:[#allocation10 + $0x138] sm:$0xff] }
 0x1d3   : > { %v1150_v31 = vpop.f32.mrf.mxu1 }
 0x1d4   : > { %v1169_v34 = vadd.f32 %v1150_v31, %v1100_v1  ;;  %v1027_v5 = vpop.f32.mrf.mxu3 }
 0x1d5   : > { %v1036_v29 = vadd.f32 %v1027_v5, %v966_v27  ;;  %v1691_v27 = vld [vmem:[#allocation10 + $0x128] sm:$0xff]  ;;  %v1570_v5 = vld [vmem:[#allocation10 + $0x40] sm:$0xff] }
 0x1d6   : > { %v1180_v36 = vadd.f32 %v3939_v20, %v1169_v34  ;;  %v1096_v34 = vpop.f32.mrf.mxu0 }
 0x1d7   : > { %v1105_v37 = vadd.f32 %v1096_v34, %v1036_v29  ;;  %v1767_v29 = vld [vmem:[#allocation10 + $0x1e0] sm:$0xff]  ;;  %v1569_v34 = vld [vmem:[#allocation10 + $0x38] sm:$0xff] }
 0x1d8   : > { %v1187_v7 = vmax.f32 %v1180_v36, 0.0 }
 0x1d9   : > { %v1223_v38 = vld [vmem:[#allocation2 + $0x1] sm:$0xff] }
 0x1da   : > { %v1200_v39 = vld [vmem:[#allocation2] sm:$0xff]  ;;  %1194 = vst [vmem:[#allocation2 + $0xa] sm:$0xff] %v1187_v7  ;;  %1263 = vmatmul.f32.vlgmr.msra.gmra.mxu2 %v1223_v38  ;;  %1366 = vmatmul.f32.gmra.mxu0 %v1187_v7 }
 0x1db   : > { %1301 = vmatmul.f32.vlgmr.msra.gmra.mxu3 %v1200_v39  ;;  %v1153_v44 = vpop.f32.mrf.mxu1  ;;  %1771 = vmatpush.msra.mxu2 %v1770_v22 }
 0x1dc   : > { %v1170_v45 = vadd.f32 %v1153_v44, %v1101_v40 }
 0x1de   : > { %v1181_v48 = vadd.f32 %v3939_v20, %v1170_v45 }
 0x1e0   : > { %v1188_v50 = vmax.f32 %v1181_v48, 0.0 }
 0x1e1   : > { %v1224_v17 = vld [vmem:[#allocation2 + $0x9] sm:$0xff] }
 0x1e2   : > { %v1201_v32 = vld [vmem:[#allocation2 + $0x8] sm:$0xff]  ;;  %1195 = vst [vmem:[#allocation2 + $0x12] sm:$0xff] %v1188_v50  ;;  %1266 = vmatmul.f32.gmra.mxu2 %v1224_v17  ;;  %1369 = vmatmul.f32.gmra.mxu0 %v1188_v50 }
 0x1e3   : > { %v1392_v51 = vld [vmem:[#allocation2 + $0x3] sm:$0xff]  ;;  %1304 = vmatmul.f32.gmra.mxu3 %v1201_v32  ;;  %v1156_v56 = vpop.f32.mrf.mxu1 }
 0x1e4   : > { %1432 = vmatmul.f32.vlgmr.msrb.gmra.mxu1 %v1392_v51  ;;  %v1171_v58 = vadd.f32 %v1156_v56, %v1102_v52  ;;  %v1461_v18 = vld [vmem:[#allocation2 + $0x4] sm:$0xff]  ;;  %v1467_v51 = vld [vmem:[#allocation2 + $0x34] sm:$0x3] }
 0x1e5   : > { %v1601_v52 = vld [vmem:[#allocation10 + $0xf8] sm:$0xff] }
 0x1e6   : > { %v1182_v2 = vadd.f32 %v3939_v20, %v1171_v58  ;;  %1602 = vmatpush.msrb.mxu3 %v1601_v52  ;;  %v1597_v56 = vld [vmem:[#allocation10 + $0xd8] sm:$0xff]  ;;  %v1562_v52 = vld [vmem:[#allocation10] sm:$0xff] }
 0x1e7   : > { %v1701_v58 = vld [vmem:[#allocation10 + $0x178] sm:$0xff] }
 0x1e8   : > { %v1189_v3 = vmax.f32 %v1182_v2, 0.0  ;;  %1603 = vmatpush.msrb.mxu3 %v1600_v53  ;;  %1702 = vmatpush.msra.mxu1 %v1701_v58  ;;  %v1698_v2 = vld [vmem:[#allocation10 + $0x160] sm:$0xff]  ;;  %v1758_v58 = vld [vmem:[#allocation10 + $0x198] sm:$0xff] }
 0x1e9   : > { %v1225_v4 = vld [vmem:[#allocation2 + $0x11] sm:$0xff] }
 0x1ea   : > { %v1202_v6 = vld [vmem:[#allocation2 + $0x10] sm:$0xff]  ;;  %1196 = vst [vmem:[#allocation2 + $0x1a] sm:$0xff] %v1189_v3  ;;  %1269 = vmatmul.f32.gmra.mxu2 %v1225_v4  ;;  %1372 = vmatmul.f32.gmra.mxu0 %v1189_v3  ;;  %v1697_v4 = vld [vmem:[#allocation10 + $0x158] sm:$0xff] }
 0x1eb   : > { %v1393_v8 = vld [vmem:[#allocation2 + $0xb] sm:$0xff]  ;;  %1307 = vmatmul.f32.gmra.mxu3 %v1202_v6  ;;  %v1159_v13 = vpop.f32.mrf.mxu1  ;;  %1703 = vmatpush.msra.mxu1 %v1700_v61 }
 0x1ec   : > { %1435 = vmatmul.f32.gmra.mxu1 %v1393_v8  ;;  %v1172_v14 = vadd.f32 %v1159_v13, %v1103_v9  ;;  %1604 = vmatpush.msrb.mxu3 %v1599_v54  ;;  %v1594_v6 = vld [vmem:[#allocation10 + $0xc0] sm:$0xff]  ;;  %v1576_v8 = vld [vmem:[#allocation10 + $0x70] sm:$0xff]  ;;  %v1695_v13 = vld [vmem:[#allocation10 + $0x148] sm:$0xff] }
 0x1ed   : > { %1704 = vmatpush.msra.mxu1 %v1699_v62  ;;  %v1696_v9 = vld [vmem:[#allocation10 + $0x150] sm:$0xff]  ;;  %1641 = vmatpush.msra.mxu0 %v1576_v8  ;;  %v1759_v53 = vld [vmem:[#allocation10 + $0x1a0] sm:$0xff]  ;;  %v1839_v54 = vld [vmem:[#allocation10 + $0x278] sm:$0xff] }
 0x1ee   : > { %v1183_v21 = vadd.f32 %v3939_v20, %v1172_v14  ;;  %1605 = vmatpush.msrb.mxu3 %v1598_v55  ;;  %v1574_v14 = vld [vmem:[#allocation10 + $0x60] sm:$0xff]  ;;  %v1757_v62 = vld [vmem:[#allocation10 + $0x190] sm:$0xff] }
 0x1ef   : > { %1705 = vmatpush.msra.mxu1 %v1698_v2  ;;  %1642 = vmatpush.msra.mxu0 %v1575_v12  ;;  %v1755_v2 = vld [vmem:[#allocation10 + $0x180] sm:$0xff] }
 0x1f0   : > { %v1190_v24 = vmax.f32 %v1183_v21, 0.0  ;;  %1606 = vmatpush.msrb.mxu3 %v1597_v56  ;;  %v1573_v21 = vld [vmem:[#allocation10 + $0x58] sm:$0xff] }
 0x1f1   : > { %v1226_v33 = vld [vmem:[#allocation2 + $0x19] sm:$0xff]  ;;  %1706 = vmatpush.msra.mxu1 %v1697_v4  ;;  %1643 = vmatpush.msra.mxu0 %v1574_v14 }
 0x1f2   : > { %v1203_v0 = vld [vmem:[#allocation2 + $0x18] sm:$0xff]  ;;  %1197 = vst [vmem:[#allocation2 + $0x22] sm:$0xff] %v1190_v24  ;;  %1272 = vmatmul.f32.gmra.mxu2 %v1226_v33  ;;  %1375 = vmatmul.f32.gmra.mxu0 %v1190_v24 }
 0x1f3   : > { %v1394_v25 = vld [vmem:[#allocation2 + $0x13] sm:$0xff]  ;;  %1310 = vmatmul.f32.gmra.mxu3 %v1203_v0  ;;  %v1162_v28 = vpop.f32.mrf.mxu1  ;;  %1707 = vmatpush.msra.mxu1 %v1696_v9 }
 0x1f4   : > { %1438 = vmatmul.f32.gmra.mxu1 %v1394_v25  ;;  %v1173_v1 = vadd.f32 %v1162_v28, %v1104_v26  ;;  %v1463_v48 = vld [vmem:[#allocation2 + $0x14] sm:$0xff]  ;;  %1607 = vmatpush.msrb.mxu3 %v1596_v59 }
 0x1f5   : > { %1708 = vmatpush.msra.mxu1 %v1695_v13  ;;  %1644 = vmatpush.msra.mxu0 %v1573_v21  ;;  %v1572_v24 = vld [vmem:[#allocation10 + $0x50] sm:$0xff]  ;;  %v1571_v25 = vld [vmem:[#allocation10 + $0x48] sm:$0xff]  ;;  %v1835_v21 = vld [vmem:[#allocation10 + $0x258] sm:$0xff] }
 0x1f6   : > { %v1184_v30 = vadd.f32 %v3939_v20, %v1173_v1  ;;  %1608 = vmatpush.msrb.mxu3 %v1595_v63  ;;  %v1769_v33 = vld [vmem:[#allocation10 + $0x1f0] sm:$0xff]  ;;  %v1768_v26 = vld [vmem:[#allocation10 + $0x1e8] sm:$0xff]  ;;  %v1590_v1 = vld [vmem:[#allocation10 + $0xa0] sm:$0xff] }
 0x1f7   : > { %1709 = vmatpush.msra.mxu1 %v1694_v16  ;;  %v1692_v0 = vld [vmem:[#allocation10 + $0x130] sm:$0xff]  ;;  %1645 = vmatpush.msra.mxu0 %v1572_v24  ;;  %v1591_v28 = vld [vmem:[#allocation10 + $0xa8] sm:$0xff] }
 0x1f8   : > { %v1191_v31 = vmax.f32 %v1184_v30, 0.0  ;;  %1609 = vmatpush.msrb.mxu3 %v1594_v6  ;;  %1772 = vmatpush.msra.mxu2 %v1769_v33  ;;  %v1690_v30 = vld [vmem:[#allocation10 + $0x120] sm:$0xff]  ;;  %v1756_v63 = vld [vmem:[#allocation10 + $0x188] sm:$0xff]  ;;  %v1838_v4 = vld [vmem:[#allocation10 + $0x270] sm:$0xff] }
 0x1f9   : > { %v1227_v35 = vld [vmem:[#allocation2 + $0x21] sm:$0xff]  ;;  %1710 = vmatpush.msra.mxu1 %v1693_v23  ;;  %1646 = vmatpush.msra.mxu0 %v1571_v25  ;;  %v1837_v6 = vld [vmem:[#allocation10 + $0x268] sm:$0xff]  ;;  %v3972_v16 = vld [vmem:[%s4182_s6] ss:$0 sm:$0xff] }
 0x1fa   : > { %v1204_v36 = vld [vmem:[#allocation2 + $0x20] sm:$0xff]  ;;  %1198 = vst [vmem:[#allocation2 + $0x2a] sm:$0xff] %v1191_v31  ;;  %1275 = vmatmul.f32.gmra.mxu2 %v1227_v35  ;;  %1378 = vmatmul.f32.gmra.mxu0 %v1191_v31 }
 0x1fb   : > { %v1395_v7 = vld [vmem:[#allocation2 + $0x1b] sm:$0xff]  ;;  %1313 = vmatmul.f32.gmra.mxu3 %v1204_v36  ;;  %v1165_v10 = vpop.f32.mrf.mxu1  ;;  %1711 = vmatpush.msra.mxu1 %v1692_v0 }
 0x1fc   : > { %1441 = vmatmul.f32.gmra.mxu1 %v1395_v7  ;;  %v1174_v38 = vadd.f32 %v1165_v10, %v1105_v37  ;;  %v1464_v50 = vld [vmem:[#allocation2 + $0x1c] sm:$0xff]  ;;  %1610 = vmatpush.msrb.mxu3 %v1593_v49 }
 0x1fd   : > { %1773 = vmatpush.msra.mxu2 %v1768_v26  ;;  %1712 = vmatpush.msra.mxu1 %v1691_v27  ;;  %v1766_v35 = vld [vmem:[#allocation10 + $0x1d8] sm:$0xff]  ;;  %v1568_v7 = vld [vmem:[#allocation10 + $0x30] sm:$0xff] }
 0x1fe   : > { %v1185_v39 = vadd.f32 %v3939_v20, %v1174_v38  ;;  %v1462_v20 = vld [vmem:[#allocation2 + $0xc] sm:$0xff]  ;;  %1611 = vmatpush.msrb.mxu3 %v1592_v15  ;;  %1647 = vmatpush.msra.mxu0 %v1570_v5  ;;  %v1689_v36 = vld [vmem:[#allocation10 + $0x118] sm:$0xff]  ;;  %v1765_v37 = vld [vmem:[#allocation10 + $0x1d0] sm:$0xff] }
 0x1ff   : > { %1774 = vmatpush.msra.mxu2 %v1767_v29  ;;  %1713 = vmatpush.msra.mxu1 %v1690_v30  ;;  %v1688_v10 = vld [vmem:[#allocation10 + $0x110] sm:$0xff]  ;;  %v1567_v38 = vld [vmem:[#allocation10 + $0x28] sm:$0xff] }
 0x200   : > { %v1192_v40 = vmax.f32 %v1185_v39, 0.0  ;;  %1612 = vmatpush.msrb.mxu3 %v1591_v28  ;;  %1648 = vmatpush.msra.mxu0 %v1569_v34  ;;  %v1764_v39 = vld [vmem:[#allocation10 + $0x1c8] sm:$0xff] }
 0x201   : > { %v1228_v41 = vld [vmem:[#allocation2 + $0x29] sm:$0xff]  ;;  %1775 = vmatpush.msra.mxu2 %v1766_v35  ;;  %1714 = vmatpush.msra.mxu1 %v1689_v36  ;;  %v1833_v5 = vld [vmem:[#allocation10 + $0x248] sm:$0xff] }
 0x202   : > { %v1205_v11 = vld [vmem:[#allocation2 + $0x28] sm:$0xff]  ;;  %1199 = vst [vmem:[#allocation2 + $0x32] sm:$0x3] %v1192_v40  ;;  %1278 = vmatmul.f32.gmra.mxu2 %v1228_v41  ;;  %v1206_v42 = vld [vmem:[#allocation2 + $0x30] sm:$0x3]  ;;  %1613 = vmatpush.msrb.mxu3 %v1590_v1  ;;  %v1687_v40 = vld [vmem:[#allocation10 + $0x108] sm:$0xff] }
 0x203   : > { %v1396_v19 = vld [vmem:[#allocation2 + $0x23] sm:$0xff]  ;;  %1316 = vmatmul.f32.gmra.mxu3 %v1205_v11  ;;  %1649 = vmatpush.msra.mxu0 %v1568_v7  ;;  %v1834_v1 = vld [vmem:[#allocation10 + $0x250] sm:$0xff] }
 0x204   : > { %1444 = vmatmul.f32.gmra.mxu1 %v1396_v19  ;;  %v1465_v17 = vld [vmem:[#allocation2 + $0x24] sm:$0xff]  ;;  %1776 = vmatpush.msra.mxu2 %v1765_v37 }
 0x205   : > { %1715 = vmatpush.msra.mxu1 %v1688_v10  ;;  %1650 = vmatpush.msra.mxu0 %v1567_v38  ;;  %v1566_v41 = vld [vmem:[#allocation10 + $0x20] sm:$0xff] }
 0x206   : > { %1777 = vmatpush.msra.mxu2 %v1764_v39  ;;  %v1763_v11 = vld [vmem:[#allocation10 + $0x1c0] sm:$0xff] }
 0x207   : > { %1716 = vmatpush.msra.mxu1 %v1687_v40  ;;  %v1686_v19 = vld [vmem:[#allocation10 + $0x100] sm:$0xff]  ;;  %1651 = vmatpush.msra.mxu0 %v1566_v41  ;;  %v1831_v41 = vld [vmem:[#allocation10 + $0x238] sm:$0xff] }
 0x208   : > { %1778 = vmatpush.msra.mxu2 %v1763_v11 }
 0x209   : > { %v1229_v43 = vld [vmem:[#allocation2 + $0x31] sm:$0x3]  ;;  %v1398_v46 = vld [vmem:[#allocation2 + $0x33] sm:$0x3]  ;;  %1717 = vmatpush.msra.mxu1 %v1686_v19 }
 0x20a   : > { %v1329_v44 = vld [vmem:[#allocation2 + $0x32] sm:$0x3]  ;;  %1281 = vmatmul.f32.gmra.mxu2 %v1229_v43  ;;  %v1588_v43 = vld [vmem:[#allocation10 + $0x90] sm:$0xff] }
 0x20b   : > { %v1397_v45 = vld [vmem:[#allocation2 + $0x2b] sm:$0xff]  ;;  %1319 = vmatmul.f32.gmra.mxu3 %v1206_v42  ;;  %1381 = vmatmul.f32.gmra.mxu0 %v1329_v44  ;;  %v1589_v42 = vld [vmem:[#allocation10 + $0x98] sm:$0xff] }
 0x20c   : > { %1447 = vmatmul.f32.gmra.mxu1 %v1397_v45  ;;  %v1466_v32 = vld [vmem:[#allocation2 + $0x2c] sm:$0xff]  ;;  %1614 = vmatpush.msrb.mxu3 %v1589_v42 }
 0x20e   : > { %1615 = vmatpush.msrb.mxu3 %v1588_v43  ;;  %v1830_v43 = vld [vmem:[#allocation10 + $0x230] sm:$0xff] }
 0x212   : > { %1501 = vmatmul.f32.vlgmr.msrb.gmra.mxu2 %v1461_v18  ;;  %v1565_v18 = vld [vmem:[#allocation10 + $0x18] sm:$0xff] }
 0x213   : > { %1652 = vmatpush.msra.mxu0 %v1565_v18 }
 0x214   : > { %1450 = vmatmul.f32.gmra.mxu1 %v1398_v46  ;;  %v1762_v46 = vld [vmem:[#allocation10 + $0x1b8] sm:$0xff] }
 0x215   : > { %1779 = vmatpush.msra.mxu2 %v1762_v46 }
 0x21a   : > { %1504 = vmatmul.f32.gmra.mxu2 %v1462_v20  ;;  %v1564_v20 = vld [vmem:[#allocation10 + $0x10] sm:$0xff] }
 0x21b   : > { %1653 = vmatpush.msra.mxu0 %v1564_v20 }
 0x222   : > { %1507 = vmatmul.f32.gmra.mxu2 %v1463_v48  ;;  %v1761_v48 = vld [vmem:[#allocation10 + $0x1b0] sm:$0xff] }
 0x223   : > { %1780 = vmatpush.msra.mxu2 %v1761_v48 }
 0x22a   : > { %1510 = vmatmul.f32.gmra.mxu2 %v1464_v50  ;;  %v1587_v50 = vld [vmem:[#allocation10 + $0x88] sm:$0xff] }
 0x22b   : > { %1616 = vmatpush.msrb.mxu3 %v1587_v50 }
 0x232   : > { %1513 = vmatmul.f32.gmra.mxu2 %v1465_v17  ;;  %v1563_v17 = vld [vmem:[#allocation10 + $0x8] sm:$0xff] }
 0x233   : > { %1654 = vmatpush.msra.mxu0 %v1563_v17 }
 0x235   : > { %1655 = vmatpush.msra.mxu0 %v1562_v52 }
 0x23a   : > { %1516 = vmatmul.f32.gmra.mxu2 %v1466_v32  ;;  %v1760_v32 = vld [vmem:[#allocation10 + $0x1a8] sm:$0xff] }
 0x23b   : > { %1781 = vmatpush.msra.mxu2 %v1760_v32  ;;  %v1829_v32 = vld [vmem:[#allocation10 + $0x228] sm:$0xff] }
 0x23d   : > { %1782 = vmatpush.msra.mxu2 %v1759_v53  ;;  %v1828_v53 = vld [vmem:[#allocation10 + $0x220] sm:$0xff] }
 0x23f   : > { %1783 = vmatpush.msra.mxu2 %v1758_v58 }
 0x241   : > { %1784 = vmatpush.msra.mxu2 %v1757_v62 }
 0x242   : > { %1519 = vmatmul.f32.gmra.mxu2 %v1467_v51  ;;  %v1586_v51 = vld [vmem:[#allocation10 + $0x80] sm:$0xff] }
 0x243   : > { %1617 = vmatpush.msrb.mxu3 %v1586_v51  ;;  %1785 = vmatpush.msra.mxu2 %v1756_v63 }
 0x245   : > { %1840 = vmatpush.msra.mxu3 %v1839_v54  ;;  %1786 = vmatpush.msra.mxu2 %v1755_v2 }
 0x247   : > { %1841 = vmatpush.msra.mxu3 %v1838_v4 }
 0x249   : > { %1842 = vmatpush.msra.mxu3 %v1837_v6 }
 0x24f   : > { %v1364_v55 = vpop.f32.mrf.mxu0 }
 0x257   : > { %v1367_v9 = vpop.f32.mrf.mxu0 }
 0x25d   : > { %v3953_v57 = vpop.f32.mrf.mxu2 }
 0x25e   : > { %v1302_v44 = vpop.f32.mrf.mxu3 }
 0x25f   : > { %v1303_v47 = vadd.f32 %v1302_v44, %v3953_v57  ;;  %v1836_v57 = vld [vmem:[#allocation10 + $0x260] sm:$0xff]  ;;  %v1370_v0 = vpop.f32.mrf.mxu0 }
 0x260   : > { %1843 = vmatpush.msra.mxu3 %v1836_v57 }
 0x261   : > { %v1433_v59 = vpop.f32.mrf.mxu1  ;;  %v1385_v12 = vadd.f32 %v1364_v55, %v1303_v47 }
 0x262   : > { %1844 = vmatpush.msra.mxu3 %v1835_v21 }
 0x263   : > { %v1454_v14 = vadd.f32 %v1433_v59, %v1385_v12  ;;  %v1827_v59 = vld [vmem:[#allocation10 + $0x218] sm:$0xff] }
 0x264   : > { %1845 = vmatpush.msra.mxu3 %v1834_v1 }
 0x265   : > { %v3955_v3 = vpop.f32.mrf.mxu2 }
 0x266   : > { %v1305_v61 = vpop.f32.mrf.mxu3  ;;  %1846 = vmatpush.msra.mxu3 %v1833_v5 }
 0x267   : > { %v1306_v15 = vadd.f32 %v1305_v61, %v3955_v3  ;;  %v1373_v7 = vpop.f32.mrf.mxu0 }
 0x269   : > { %v1436_v13 = vpop.f32.mrf.mxu1  ;;  %v1386_v24 = vadd.f32 %v1367_v9, %v1306_v15  ;;  %v1824_v15 = vld [vmem:[#allocation10 + $0x200] sm:$0xff] }
 0x26b   : > { %v1455_v28 = vadd.f32 %v1436_v13, %v1386_v24  ;;  %v1825_v13 = vld [vmem:[#allocation10 + $0x208] sm:$0xff] }
 0x26d   : > { %v3957_v60 = vpop.f32.mrf.mxu2 }
 0x26e   : > { %v1308_v49 = vpop.f32.mrf.mxu3 }
 0x26f   : > { %v1309_v3 = vadd.f32 %v1308_v49, %v3957_v60  ;;  %v1832_v60 = vld [vmem:[#allocation10 + $0x240] sm:$0xff]  ;;  %v1376_v51 = vpop.f32.mrf.mxu0 }
 0x270   : > { %1847 = vmatpush.msra.mxu3 %v1832_v60 }
 0x271   : > { %v1439_v25 = vpop.f32.mrf.mxu1  ;;  %v1387_v34 = vadd.f32 %v1370_v0, %v1309_v3 }
 0x272   : > { %1848 = vmatpush.msra.mxu3 %v1831_v41 }
 0x273   : > { %v1456_v38 = vadd.f32 %v1439_v25, %v1387_v34 }
 0x274   : > { %1849 = vmatpush.msra.mxu3 %v1830_v43 }
 0x275   : > { %v3959_v31 = vpop.f32.mrf.mxu2 }
 0x276   : > { %v1311_v27 = vpop.f32.mrf.mxu3  ;;  %1850 = vmatpush.msra.mxu3 %v1829_v32  ;;  %v2074_v32 = vld [vmem:[#allocation12 + $0x1a8] sm:$0x3] }
 0x277   : > { %v1312_v39 = vadd.f32 %v1311_v27, %v3959_v31 }
 0x278   : > { %1851 = vmatpush.msra.mxu3 %v1828_v53 }
 0x279   : > { %v1442_v40 = vpop.f32.mrf.mxu1  ;;  %v1388_v44 = vadd.f32 %v1373_v7, %v1312_v39 }
 0x27a   : > { %1852 = vmatpush.msra.mxu3 %v1827_v59  ;;  %v2024_v59 = vld [vmem:[#allocation12 + $0x18] sm:$0xff] }
 0x27b   : > { %v1457_v50 = vadd.f32 %v1442_v40, %v1388_v44 }
 0x27d   : > { %v3961_v45 = vpop.f32.mrf.mxu2 }
 0x27e   : > { %v1314_v11 = vpop.f32.mrf.mxu3 }
 0x27f   : > { %v1315_v17 = vadd.f32 %v1314_v11, %v3961_v45  ;;  %v1826_v45 = vld [vmem:[#allocation10 + $0x210] sm:$0xff] }
 0x280   : > { %1853 = vmatpush.msra.mxu3 %v1826_v45 }
 0x281   : > { %v1445_v55 = vpop.f32.mrf.mxu1  ;;  %v1389_v61 = vadd.f32 %v1376_v51, %v1315_v17  ;;  %v2071_v17 = vld [vmem:[#allocation12 + $0x190] sm:$0x3]  ;;  %v2072_v51 = vld [vmem:[#allocation12 + $0x198] sm:$0x3] }
 0x282   : > { %1854 = vmatpush.msra.mxu3 %v1825_v13  ;;  %2243 = vmatpush.xpose.msrb.mxu0 %v2071_v17 }
 0x283   : > { %v1458_v6 = vadd.f32 %v1445_v55, %v1389_v61  ;;  %2263 = vmatpush.xpose.msrb.mxu1 %v2072_v51  ;;  %v2023_v55 = vld [vmem:[#allocation12 + $0x10] sm:$0xff] }
 0x284   : > { %1855 = vmatpush.msra.mxu3 %v1824_v15 }
 0x285   : > { %v3963_v56 = vpop.f32.mrf.mxu2 }
 0x286   : > { %v1317_v58 = vpop.f32.mrf.mxu3 }
 0x287   : > { %v1318_v9 = vadd.f32 %v1317_v58, %v3963_v56  ;;  %v2021_v58 = vld [vmem:[#allocation12] sm:$0xff] }
 0x288   : > { %2244 = vmatpush.xpose.msrb.mxu0 %v2021_v58 }
 0x28d   : > { %v3966_v8 = vpop.f32.mrf.mxu2 }
 0x295   : > { %v1502_v22 = vpop.f32.mrf.mxu2 }
 0x296   : > { %v1523_v23 = vadd.f32 %v1502_v22, %v1454_v14  ;;  %v1379_v14 = vpop.f32.mrf.mxu0  ;;  %v1448_v22 = vpop.f32.mrf.mxu1 }
 0x297   : > { %v1390_v57 = vadd.f32 %v1379_v14, %v1318_v9 }
 0x298   : > { %v1534_v33 = vadd.f32 %v3972_v16, %v1523_v23  ;;  %v1320_v23 = vpop.f32.mrf.mxu3 }
 0x299   : > { %v1459_v25 = vadd.f32 %v1448_v22, %v1390_v57  ;;  %v3995_v57 = vld [vmem:[%s4184_s8] ss:$0 sm:$0xff] }
 0x29a   : > { %v1541_v26 = vmax.f32 %v1534_v33, 0.0 }
 0x29c   : > { %1548 = vst [vmem:[#allocation2 + $0x2] sm:$0xff] %v1541_v26  ;;  %1718 = vmatmul.f32.vlgmr.msra.gmra.mxu1 %v1541_v26  ;;  %v1321_v26 = vadd.f32 %v1320_v23, %v3966_v8 }
 0x29d   : > { %v1505_v29 = vpop.f32.mrf.mxu2 }
 0x29e   : > { %v1524_v30 = vadd.f32 %v1505_v29, %v1455_v28  ;;  %v1382_v3 = vpop.f32.mrf.mxu0 }
 0x29f   : > { %v1391_v1 = vadd.f32 %v1382_v3, %v1321_v26 }
 0x2a0   : > { %v1535_v35 = vadd.f32 %v3972_v16, %v1524_v30  ;;  %v1451_v30 = vpop.f32.mrf.mxu1 }
 0x2a1   : > { %v1460_v7 = vadd.f32 %v1451_v30, %v1391_v1  ;;  %v2027_v1 = vld [vmem:[#allocation12 + $0x30] sm:$0xff]  ;;  %v2026_v30 = vld [vmem:[#allocation12 + $0x28] sm:$0xff] }
 0x2a2   : > { %v1542_v36 = vmax.f32 %v1535_v35, 0.0 }
 0x2a3   : > { %v1578_v37 = vld [vmem:[#allocation2 + $0x1] sm:$0xff] }
 0x2a4   : > { %v1555_v10 = vld [vmem:[#allocation2] sm:$0xff]  ;;  %1549 = vst [vmem:[#allocation2 + $0xa] sm:$0xff] %v1542_v36  ;;  %1618 = vmatmul.f32.vlgmr.msrb.gmra.mxu3 %v1578_v37  ;;  %1721 = vmatmul.f32.gmra.mxu1 %v1542_v36 }
 0x2a5   : > { %1656 = vmatmul.f32.vlgmr.msra.gmra.mxu0 %v1555_v10  ;;  %v1508_v19 = vpop.f32.mrf.mxu2  ;;  %2303 = vmatpush.xpose.msrb.mxu3 %v2074_v32 }
 0x2a6   : > { %v1525_v42 = vadd.f32 %v1508_v19, %v1456_v38 }
 0x2a8   : > { %v1536_v18 = vadd.f32 %v3972_v16, %v1525_v42 }
 0x2a9   : > { %2304 = vmatpush.xpose.msrb.mxu3 %v2024_v59 }
 0x2aa   : > { %v1543_v46 = vmax.f32 %v1536_v18, 0.0 }
 0x2ab   : > { %v1579_v20 = vld [vmem:[#allocation2 + $0x9] sm:$0xff] }
 0x2ac   : > { %v1556_v31 = vld [vmem:[#allocation2 + $0x8] sm:$0xff]  ;;  %1550 = vst [vmem:[#allocation2 + $0x12] sm:$0xff] %v1543_v46  ;;  %1621 = vmatmul.f32.gmra.mxu3 %v1579_v20  ;;  %1724 = vmatmul.f32.gmra.mxu1 %v1543_v46 }
 0x2ad   : > { %v1747_v48 = vld [vmem:[#allocation2 + $0x3] sm:$0xff]  ;;  %1659 = vmatmul.f32.gmra.mxu0 %v1556_v31  ;;  %v1511_v52 = vpop.f32.mrf.mxu2 }
 0x2ae   : > { %1787 = vmatmul.f32.vlgmr.msra.gmra.mxu2 %v1747_v48  ;;  %v1526_v54 = vadd.f32 %v1511_v52, %v1457_v50  ;;  %v1816_v43 = vld [vmem:[#allocation2 + $0x4] sm:$0xff]  ;;  %v1822_v48 = vld [vmem:[#allocation2 + $0x34] sm:$0x3] }
 0x2af   : > { %v2073_v50 = vld [vmem:[#allocation12 + $0x1a0] sm:$0x3] }
 0x2b0   : > { %v1537_v62 = vadd.f32 %v3972_v16, %v1526_v54  ;;  %2283 = vmatpush.xpose.msrb.mxu2 %v2073_v50 }
 0x2b2   : > { %v1544_v63 = vmax.f32 %v1537_v62, 0.0  ;;  %v2022_v62 = vld [vmem:[#allocation12 + $0x8] sm:$0xff] }
 0x2b3   : > { %v1580_v2 = vld [vmem:[#allocation2 + $0x11] sm:$0xff]  ;;  %2264 = vmatpush.xpose.msrb.mxu1 %v2022_v62 }
 0x2b4   : > { %v1557_v47 = vld [vmem:[#allocation2 + $0x10] sm:$0xff]  ;;  %1551 = vst [vmem:[#allocation2 + $0x1a] sm:$0xff] %v1544_v63  ;;  %1624 = vmatmul.f32.gmra.mxu3 %v1580_v2  ;;  %1727 = vmatmul.f32.gmra.mxu1 %v1544_v63 }
 0x2b5   : > { %v1748_v4 = vld [vmem:[#allocation2 + $0xb] sm:$0xff]  ;;  %1662 = vmatmul.f32.gmra.mxu0 %v1557_v47  ;;  %v1514_v12 = vpop.f32.mrf.mxu2  ;;  %2284 = vmatpush.xpose.msrb.mxu2 %v2023_v55 }
 0x2b6   : > { %1790 = vmatmul.f32.gmra.mxu2 %v1748_v4  ;;  %v1527_v49 = vadd.f32 %v1514_v12, %v1458_v6 }
 0x2b8   : > { %v1538_v21 = vadd.f32 %v3972_v16, %v1527_v49 }
 0x2ba   : > { %v1545_v24 = vmax.f32 %v1538_v21, 0.0 }
 0x2bb   : > { %v1581_v56 = vld [vmem:[#allocation2 + $0x19] sm:$0xff] }
 0x2bc   : > { %v1558_v33 = vld [vmem:[#allocation2 + $0x18] sm:$0xff]  ;;  %1552 = vst [vmem:[#allocation2 + $0x22] sm:$0xff] %v1545_v24  ;;  %1627 = vmatmul.f32.gmra.mxu3 %v1581_v56  ;;  %1730 = vmatmul.f32.gmra.mxu1 %v1545_v24 }
 0x2bd   : > { %v1749_v0 = vld [vmem:[#allocation2 + $0x13] sm:$0xff]  ;;  %1665 = vmatmul.f32.gmra.mxu0 %v1558_v33  ;;  %v1517_v27 = vpop.f32.mrf.mxu2  ;;  %v2077_v33 = vld [vmem:[#allocation12 + $0x1c0] sm:$0x3] }
 0x2be   : > { %1793 = vmatmul.f32.gmra.mxu2 %v1749_v0  ;;  %v1528_v28 = vadd.f32 %v1517_v27, %v1459_v25  ;;  %v1818_v18 = vld [vmem:[#allocation2 + $0x14] sm:$0xff]  ;;  %v2076_v25 = vld [vmem:[#allocation12 + $0x1b8] sm:$0x3]  ;;  %v2078_v27 = vld [vmem:[#allocation12 + $0x1c8] sm:$0x3] }
 0x2bf   : > { %v2075_v0 = vld [vmem:[#allocation12 + $0x1b0] sm:$0x3]  ;;  %2363 = vmatpush.xpose.msra.mxu2 %v2077_v33  ;;  %2343 = vmatpush.xpose.msra.mxu1 %v2076_v25 }
 0x2c0   : > { %v1539_v5 = vadd.f32 %v3972_v16, %v1528_v28  ;;  %2323 = vmatpush.xpose.msra.mxu0 %v2075_v0  ;;  %v2079_v33 = vld [vmem:[#allocation12 + $0x1d0] sm:$0x3] }
 0x2c2   : > { %v1546_v29 = vmax.f32 %v1539_v5, 0.0  ;;  %v2025_v5 = vld [vmem:[#allocation12 + $0x20] sm:$0xff] }
 0x2c3   : > { %v1582_v34 = vld [vmem:[#allocation2 + $0x21] sm:$0xff]  ;;  %2364 = vmatpush.xpose.msra.mxu2 %v2027_v1  ;;  %2344 = vmatpush.xpose.msra.mxu1 %v2026_v30 }
 0x2c4   : > { %v1559_v35 = vld [vmem:[#allocation2 + $0x20] sm:$0xff]  ;;  %1553 = vst [vmem:[#allocation2 + $0x2a] sm:$0xff] %v1546_v29  ;;  %1630 = vmatmul.f32.gmra.mxu3 %v1582_v34  ;;  %1733 = vmatmul.f32.gmra.mxu1 %v1546_v29 }
 0x2c5   : > { %v1750_v36 = vld [vmem:[#allocation2 + $0x1b] sm:$0xff]  ;;  %1668 = vmatmul.f32.gmra.mxu0 %v1559_v35  ;;  %v1520_v8 = vpop.f32.mrf.mxu2 }
 0x2c6   : > { %1796 = vmatmul.f32.gmra.mxu2 %v1750_v36  ;;  %v1529_v37 = vadd.f32 %v1520_v8, %v1460_v7  ;;  %v1819_v46 = vld [vmem:[#allocation2 + $0x1c] sm:$0xff]  ;;  %2324 = vmatpush.xpose.msra.mxu0 %v2025_v5 }
 0x2c7   : > { %v2028_v34 = vld [vmem:[#allocation12 + $0x38] sm:$0xff] }
 0x2c8   : > { %v1540_v10 = vadd.f32 %v3972_v16, %v1529_v37  ;;  %v1817_v16 = vld [vmem:[#allocation2 + $0xc] sm:$0xff]  ;;  %v1911_v37 = vlaneseq  ;;  %v2080_v30 = vld [vmem:[#allocation12 + $0x1d8] sm:$0x3] }
 0x2ca   : > { %v1547_v38 = vmax.f32 %v1540_v10, 0.0  ;;  %vm3999_vm2 = vcmp.lt.s32.totalorder %v1911_v37, 128 }
 0x2cb   : > { %v1583_v39 = vld [vmem:[#allocation2 + $0x29] sm:$0xff] }
 0x2cc   : > { %v1560_v40 = vld [vmem:[#allocation2 + $0x28] sm:$0xff]  ;;  %1554 = vst [vmem:[#allocation2 + $0x32] sm:$0x3] %v1547_v38  ;;  %1633 = vmatmul.f32.gmra.mxu3 %v1583_v39  ;;  %v1561_v41 = vld [vmem:[#allocation2 + $0x30] sm:$0x3] }
 0x2cd   : > { %v1751_v60 = vld [vmem:[#allocation2 + $0x23] sm:$0xff]  ;;  %1671 = vmatmul.f32.gmra.mxu0 %v1560_v40 }
 0x2ce   : > { %1799 = vmatmul.f32.gmra.mxu2 %v1751_v60  ;;  %v1820_v20 = vld [vmem:[#allocation2 + $0x24] sm:$0xff]  ;;  %v2104_v60 = vld [vmem:[#allocation12 + $0x298] sm:$0x3] }
 0x2d3   : > { %v1584_v11 = vld [vmem:[#allocation2 + $0x31] sm:$0x3]  ;;  %v1753_v44 = vld [vmem:[#allocation2 + $0x33] sm:$0x3] }
 0x2d4   : > { %v1684_v19 = vld [vmem:[#allocation2 + $0x32] sm:$0x3]  ;;  %1636 = vmatmul.f32.gmra.mxu3 %v1584_v11 }
 0x2d5   : > { %v1752_v42 = vld [vmem:[#allocation2 + $0x2b] sm:$0xff]  ;;  %1674 = vmatmul.f32.gmra.mxu0 %v1561_v41  ;;  %1736 = vmatmul.f32.gmra.mxu1 %v1684_v19 }
 0x2d6   : > { %1802 = vmatmul.f32.gmra.mxu2 %v1752_v42  ;;  %v1821_v31 = vld [vmem:[#allocation2 + $0x2c] sm:$0xff] }
 0x2dc   : > { %1856 = vmatmul.f32.vlgmr.msra.gmra.mxu3 %v1816_v43 }
 0x2dd   : > { %2383 = vmatpush.xpose.msra.mxu3 %v2078_v27 }
 0x2de   : > { %1805 = vmatmul.f32.gmra.mxu2 %v1753_v44 }
 0x2e1   : > { %2384 = vmatpush.xpose.msra.mxu3 %v2028_v34 }
 0x2e4   : > { %1859 = vmatmul.f32.gmra.mxu3 %v1817_v16 }
 0x2ec   : > { %1862 = vmatmul.f32.gmra.mxu3 %v1818_v18 }
 0x2f4   : > { %1865 = vmatmul.f32.gmra.mxu3 %v1819_v46 }
 0x2fc   : > { %1868 = vmatmul.f32.gmra.mxu3 %v1820_v20 }
 0x304   : > { %1871 = vmatmul.f32.gmra.mxu3 %v1821_v31 }
 0x30c   : > { %1874 = vmatmul.f32.gmra.mxu3 %v1822_v48 }
 0x319   : > { %v1719_v4 = vpop.f32.mrf.mxu1 }
 0x321   : > { %v1722_v49 = vpop.f32.mrf.mxu1 }
 0x322   : > { %v1657_v45 = vpop.f32.mrf.mxu0 }
 0x327   : > { %v1619_v52 = vpop.f32.mrf.mxu3 }
 0x328   : > { %v1658_v12 = vadd.f32 %v1657_v45, %v1619_v52 }
 0x329   : > { %v1725_v29 = vpop.f32.mrf.mxu1 }
 0x32a   : > { %v1660_v6 = vpop.f32.mrf.mxu0  ;;  %v1740_v14 = vadd.f32 %v1719_v4, %v1658_v12 }
 0x32f   : > { %v1622_v53 = vpop.f32.mrf.mxu3 }
 0x330   : > { %v1661_v23 = vadd.f32 %v1660_v6, %v1622_v53 }
 0x331   : > { %v1788_v2 = vpop.f32.mrf.mxu2  ;;  %v1728_v44 = vpop.f32.mrf.mxu1 }
 0x332   : > { %v1809_v15 = vadd.f32 %v1788_v2, %v1740_v14  ;;  %v1663_v21 = vpop.f32.mrf.mxu0  ;;  %v1741_v28 = vadd.f32 %v1722_v49, %v1661_v23 }
 0x337   : > { %v1625_v54 = vpop.f32.mrf.mxu3 }
 0x338   : > { %v1664_v7 = vadd.f32 %v1663_v21, %v1625_v54 }
 0x339   : > { %v1791_v13 = vpop.f32.mrf.mxu2  ;;  %v1731_v6 = vpop.f32.mrf.mxu1 }
 0x33a   : > { %v1810_v35 = vadd.f32 %v1791_v13, %v1741_v28  ;;  %v1666_v10 = vpop.f32.mrf.mxu0  ;;  %v1742_v39 = vadd.f32 %v1725_v29, %v1664_v7 }
 0x33f   : > { %v1628_v61 = vpop.f32.mrf.mxu3 }
 0x340   : > { %v1667_v46 = vadd.f32 %v1666_v10, %v1628_v61  ;;  %v2031_v10 = vld [vmem:[#allocation12 + $0x50] sm:$0xff] }
 0x341   : > { %v1794_v26 = vpop.f32.mrf.mxu2  ;;  %v1734_v37 = vpop.f32.mrf.mxu1 }
 0x342   : > { %v1811_v42 = vadd.f32 %v1794_v26, %v1742_v39  ;;  %v1669_v32 = vpop.f32.mrf.mxu0  ;;  %v1743_v51 = vadd.f32 %v1728_v44, %v1667_v46  ;;  %v2085_v44 = vld [vmem:[#allocation12 + $0x200] sm:$0x3] }
 0x347   : > { %v3986_v63 = vpop.f32.mrf.mxu3 }
 0x348   : > { %v1670_v45 = vadd.f32 %v1669_v32, %v3986_v63 }
 0x349   : > { %v1797_v41 = vpop.f32.mrf.mxu2 }
 0x34a   : > { %v1812_v55 = vadd.f32 %v1797_v41, %v1743_v51  ;;  %v1744_v63 = vadd.f32 %v1731_v6, %v1670_v45  ;;  %v1672_v21 = vpop.f32.mrf.mxu0  ;;  %v2036_v6 = vld [vmem:[#allocation12 + $0x78] sm:$0xff] }
 0x34f   : > { %v3988_v47 = vpop.f32.mrf.mxu3 }
 0x350   : > { %v1673_v5 = vadd.f32 %v1672_v21, %v3988_v47 }
 0x351   : > { %v1800_v59 = vpop.f32.mrf.mxu2 }
 0x352   : > { %v1813_v23 = vadd.f32 %v1800_v59, %v1744_v63  ;;  %v2035_v59 = vld [vmem:[#allocation12 + $0x70] sm:$0xff]  ;;  %v2089_v63 = vld [vmem:[#allocation12 + $0x220] sm:$0x3] }
 0x357   : > { %v3990_v9 = vpop.f32.mrf.mxu3 }
 0x35f   : > { %v1857_v22 = vpop.f32.mrf.mxu3 }
 0x360   : > { %v1878_v24 = vadd.f32 %v1857_v22, %v1809_v15 }
 0x362   : > { %v1889_v56 = vadd.f32 %v3995_v57, %v1878_v24 }
 0x364   : > { %v1896_v3 = vmax.f32 %v1889_v56, 0.0  ;;  %v2081_v56 = vld [vmem:[#allocation12 + $0x1e0] sm:$0x3] }
 0x366   : > { %1903 = vst [vmem:[#allocation2 + $0x2] sm:$0xff] %v1896_v3 }
 0x367   : > { %v1860_v36 = vpop.f32.mrf.mxu3 }
 0x368   : > { %v1879_v8 = vadd.f32 %v1860_v36, %v1810_v35  ;;  %v1803_v35 = vpop.f32.mrf.mxu2  ;;  %v2082_v36 = vld [vmem:[#allocation12 + $0x1e8] sm:$0x3] }
 0x36a   : > { %v1890_v38 = vadd.f32 %v3995_v57, %v1879_v8 }
 0x36c   : > { %v1897_v40 = vmax.f32 %v1890_v38, 0.0  ;;  %v1745_v38 = vadd.f32 %v1734_v37, %v1673_v5  ;;  %v2039_v5 = vld [vmem:[#allocation12 + $0x90] sm:$0xff] }
 0x36d   : > { %v1910_v11 = vld [vmem:[#allocation2 + $0x2] sm:$0x1]  ;;  %v1916_v19 = vld [vmem:[#allocation2 + $0x3] sm:$0x1]  ;;  %v1918_v43 = vld [vmem:[#allocation2 + $0x4] sm:$0x1] }
 0x36e   : > { %1904 = vst [vmem:[#allocation2 + $0xa] sm:$0xff] %v1897_v40  ;;  %v1920_v18 = vld [vmem:[#allocation2 + $0x5] sm:$0x1]  ;;  %v1922_v31 = vld [vmem:[#allocation2 + $0x6] sm:$0x1]  ;;  %v2029_v40 = vld [vmem:[#allocation12 + $0x40] sm:$0xff] }
 0x36f   : > { %v1863_v16 = vpop.f32.mrf.mxu3  ;;  %1915 = vst.msk [vmem:[#allocation3] sm:$0x1] %vm3999_vm2, %v1910_v11  ;;  %v1924_v48 = vld [vmem:[#allocation2 + $0x7] sm:$0x1]  ;;  %v1926_v17 = vld [vmem:[#allocation2 + $0x8] sm:$0x1] }
 0x370   : > { %v1880_v20 = vadd.f32 %v1863_v16, %v1811_v42  ;;  %1917 = vst.msk [vmem:[#allocation3 + $0x1] sm:$0x1] %vm3999_vm2, %v1916_v19  ;;  %v1928_v53 = vld [vmem:[#allocation2 + $0x9] sm:$0x1]  ;;  %v2030_v11 = vld [vmem:[#allocation12 + $0x48] sm:$0xff] }
 0x371   : > { %1919 = vst.msk [vmem:[#allocation3 + $0x2] sm:$0x1] %vm3999_vm2, %v1918_v43  ;;  %v2032_v19 = vld [vmem:[#allocation12 + $0x58] sm:$0xff]  ;;  %v1814_v43 = vadd.f32 %v1803_v35, %v1745_v38  ;;  %v2038_v35 = vld [vmem:[#allocation12 + $0x88] sm:$0xff] }
 0x372   : > { %v1891_v50 = vadd.f32 %v3995_v57, %v1880_v20  ;;  %1921 = vst.msk [vmem:[#allocation3 + $0x3] sm:$0x1] %vm3999_vm2, %v1920_v18  ;;  %v1675_v18 = vpop.f32.mrf.mxu0 }
 0x373   : > { %1923 = vst.msk [vmem:[#allocation3 + $0x4] sm:$0x1] %vm3999_vm2, %v1922_v31 }
 0x374   : > { %v1898_v52 = vmax.f32 %v1891_v50, 0.0  ;;  %1925 = vst.msk [vmem:[#allocation3 + $0x5] sm:$0x1] %vm3999_vm2, %v1924_v48  ;;  %v2083_v48 = vld [vmem:[#allocation12 + $0x1f0] sm:$0x3]  ;;  %v1676_v50 = vadd.f32 %v1675_v18, %v3990_v9  ;;  %v2041_v18 = vld [vmem:[#allocation12 + $0xa0] sm:$0xff] }
 0x375   : > { %1927 = vst.msk [vmem:[#allocation3 + $0x6] sm:$0x1] %vm3999_vm2, %v1926_v17  ;;  %v1930_v54 = vld [vmem:[#allocation2 + $0xa] sm:$0x1]  ;;  %v1932_v58 = vld [vmem:[#allocation2 + $0xb] sm:$0x1] }
 0x376   : > { %1905 = vst [vmem:[#allocation2 + $0x12] sm:$0xff] %v1898_v52  ;;  %v1934_v62 = vld [vmem:[#allocation2 + $0xc] sm:$0x1]  ;;  %v1936_v4 = vld [vmem:[#allocation2 + $0xd] sm:$0x1] }
 0x377   : > { %v1866_v61 = vpop.f32.mrf.mxu3  ;;  %1929 = vst.msk [vmem:[#allocation3 + $0x7] sm:$0x1] %vm3999_vm2, %v1928_v53  ;;  %v1938_v12 = vld [vmem:[#allocation2 + $0xe] sm:$0x1]  ;;  %v1940_v49 = vld [vmem:[#allocation2 + $0xf] sm:$0x1] }
 0x378   : > { %v1881_v2 = vadd.f32 %v1866_v61, %v1812_v55  ;;  %1931 = vst.msk [vmem:[#allocation3 + $0x8] sm:$0x1] %vm3999_vm2, %v1930_v54  ;;  %v1942_v15 = vld [vmem:[#allocation2 + $0x10] sm:$0x1]  ;;  %v1944_v22 = vld [vmem:[#allocation2 + $0x11] sm:$0x1]  ;;  %v1737_v55 = vpop.f32.mrf.mxu1 }
 0x379   : > { %1933 = vst.msk [vmem:[#allocation3 + $0x9] sm:$0x1] %vm3999_vm2, %v1932_v58  ;;  %v2084_v52 = vld [vmem:[#allocation12 + $0x1f8] sm:$0x3]  ;;  %v2086_v53 = vld [vmem:[#allocation12 + $0x208] sm:$0x3]  ;;  %v1806_v58 = vpop.f32.mrf.mxu2  ;;  %v1746_v61 = vadd.f32 %v1737_v55, %v1676_v50 }
 0x37a   : > { %v1892_v13 = vadd.f32 %v3995_v57, %v1881_v2  ;;  %1935 = vst.msk [vmem:[#allocation3 + $0xa] sm:$0x1] %vm3999_vm2, %v1934_v62  ;;  %v2033_v2 = vld [vmem:[#allocation12 + $0x60] sm:$0xff] }
 0x37b   : > { %1937 = vst.msk [vmem:[#allocation3 + $0xb] sm:$0x1] %vm3999_vm2, %v1936_v4  ;;  %v2034_v4 = vld [vmem:[#allocation12 + $0x68] sm:$0xff] }
 0x37c   : > { %v1899_v14 = vmax.f32 %v1892_v13, 0.0  ;;  %1939 = vst.msk [vmem:[#allocation3 + $0xc] sm:$0x1] %vm3999_vm2, %v1938_v12 }
 0x37d   : > { %1941 = vst.msk [vmem:[#allocation3 + $0xd] sm:$0x1] %vm3999_vm2, %v1940_v49  ;;  %v1946_v0 = vld [vmem:[#allocation2 + $0x12] sm:$0x1]  ;;  %v1948_v25 = vld [vmem:[#allocation2 + $0x13] sm:$0x1]  ;;  %v1815_v49 = vadd.f32 %v1806_v58, %v1746_v61 }
 0x37e   : > { %1906 = vst [vmem:[#allocation2 + $0x1a] sm:$0xff] %v1899_v14  ;;  %v4034_v24 = vld [vmem:[#allocation3] sm:$0xff]  ;;  %v1950_v34 = vld [vmem:[#allocation2 + $0x14] sm:$0x1]  ;;  %v1952_v7 = vld [vmem:[#allocation2 + $0x15] sm:$0x1] }
 0x37f   : > { %v2129_v26 = vperm.slane %v4034_v24, 0  ;;  %v2130_v27 = vperm.slane %v4034_v24, 1  ;;  %v2131_v28 = vperm.slane %v4034_v24, 2  ;;  %v2132_v3 = vperm.slane %v4034_v24, 3  ;;  %v1869_v1 = vpop.f32.mrf.mxu3  ;;  %1943 = vst.msk [vmem:[#allocation3 + $0xe] sm:$0x1] %vm3999_vm2, %v1942_v15 }
 0x380   : > { %v1882_v29 = vadd.f32 %v1869_v1, %v1813_v23  ;;  %1945 = vst.msk [vmem:[#allocation3 + $0xf] sm:$0x1] %vm3999_vm2, %v1944_v22  ;;  %v1954_v47 = vld [vmem:[#allocation2 + $0x16] sm:$0x1]  ;;  %v1956_v41 = vld [vmem:[#allocation2 + $0x17] sm:$0x1] }
 0x381   : > { %2245 = vmatmul.f32.vlgmr.msrb.gmra.mxu0 %v2129_v26  ;;  %2265 = vmatmul.f32.vlgmr.msrb.gmra.mxu1 %v2130_v27  ;;  %1947 = vst.msk [vmem:[#allocation3 + $0x10] sm:$0x1] %vm3999_vm2, %v1946_v0  ;;  %v1958_v42 = vld [vmem:[#allocation2 + $0x18] sm:$0x1]  ;;  %v1960_v16 = vld [vmem:[#allocation2 + $0x19] sm:$0x1] }
 0x382   : > { %2285 = vmatmul.f32.vlgmr.msrb.gmra.mxu2 %v2131_v28  ;;  %2305 = vmatmul.f32.vlgmr.msrb.gmra.mxu3 %v2132_v3  ;;  %v1893_v8 = vadd.f32 %v3995_v57, %v1882_v29  ;;  %1949 = vst.msk [vmem:[#allocation3 + $0x11] sm:$0x1] %vm3999_vm2, %v1948_v25  ;;  %v2133_v46 = vperm.slane %v4034_v24, 4  ;;  %v2134_v20 = vperm.slane %v4034_v24, 5  ;;  %v2135_v17 = vperm.slane %v4034_v24, 6 }
 0x383   : > { %2443 = vmatpush.xpose.msrb.mxu2 %v2081_v56  ;;  %2403 = vmatpush.xpose.msrb.mxu0 %v2079_v33  ;;  %1951 = vst.msk [vmem:[#allocation3 + $0x12] sm:$0x1] %vm3999_vm2, %v1950_v34  ;;  %v2136_v32 = vperm.slane %v4034_v24, 7  ;;  %v2087_v14 = vld [vmem:[#allocation12 + $0x210] sm:$0x3] }
 0x384   : > { %v1900_v39 = vmax.f32 %v1893_v8, 0.0  ;;  %2423 = vmatpush.xpose.msrb.mxu1 %v2080_v30  ;;  %2463 = vmatpush.xpose.msrb.mxu3 %v2082_v36  ;;  %1953 = vst.msk [vmem:[#allocation3 + $0x13] sm:$0x1] %vm3999_vm2, %v1952_v7  ;;  %v2088_v24 = vld [vmem:[#allocation12 + $0x218] sm:$0x3]  ;;  %v2037_v30 = vld [vmem:[#allocation12 + $0x80] sm:$0xff] }
 0x385   : > { %1955 = vst.msk [vmem:[#allocation3 + $0x14] sm:$0x1] %vm3999_vm2, %v1954_v47  ;;  %v1962_v54 = vld [vmem:[#allocation2 + $0x1a] sm:$0x1]  ;;  %v1964_v12 = vld [vmem:[#allocation2 + $0x1b] sm:$0x1] }
 0x386   : > { %1907 = vst [vmem:[#allocation2 + $0x22] sm:$0xff] %v1900_v39  ;;  %v1966_v13 = vld [vmem:[#allocation2 + $0x1c] sm:$0x1]  ;;  %v1968_v15 = vld [vmem:[#allocation2 + $0x1d] sm:$0x1] }
 0x387   : > { %2444 = vmatpush.xpose.msrb.mxu2 %v2031_v10  ;;  %2404 = vmatpush.xpose.msrb.mxu0 %v2029_v40  ;;  %v1872_v31 = vpop.f32.mrf.mxu3  ;;  %1957 = vst.msk [vmem:[#allocation3 + $0x15] sm:$0x1] %vm3999_vm2, %v1956_v41  ;;  %v4068_v45 = vld [vmem:[#allocation3 + $0x8] sm:$0xff]  ;;  %v1970_v56 = vld [vmem:[#allocation2 + $0x1e] sm:$0x1] }
 0x388   : > { %2424 = vmatpush.xpose.msrb.mxu1 %v2030_v11  ;;  %2464 = vmatpush.xpose.msrb.mxu3 %v2032_v19  ;;  %v1883_v51 = vadd.f32 %v1872_v31, %v1814_v43  ;;  %1959 = vst.msk [vmem:[#allocation3 + $0x16] sm:$0x1] %vm3999_vm2, %v1958_v42  ;;  %v2137_v21 = vperm.slane %v4068_v45, 0  ;;  %v2138_v22 = vperm.slane %v4068_v45, 1  ;;  %v2139_v33 = vperm.slane %v4068_v45, 2  ;;  %v2044_v31 = vld [vmem:[#allocation12 + $0xb8] sm:$0xff] }
 0x389   : > { %2325 = vmatmul.f32.vlgmr.msra.gmra.mxu0 %v2133_v46  ;;  %2345 = vmatmul.f32.vlgmr.msra.gmra.mxu1 %v2134_v20  ;;  %1961 = vst.msk [vmem:[#allocation3 + $0x17] sm:$0x1] %vm3999_vm2, %v1960_v16  ;;  %v2140_v0 = vperm.slane %v4068_v45, 3  ;;  %v1972_v26 = vld [vmem:[#allocation2 + $0x1f] sm:$0x1]  ;;  %v2141_v47 = vperm.slane %v4068_v45, 4 }
 0x38a   : > { %2365 = vmatmul.f32.vlgmr.msra.gmra.mxu2 %v2135_v17  ;;  %2385 = vmatmul.f32.vlgmr.msra.gmra.mxu3 %v2136_v32  ;;  %v1894_v9 = vadd.f32 %v3995_v57, %v1883_v51  ;;  %1963 = vst.msk [vmem:[#allocation3 + $0x18] sm:$0x1] %vm3999_vm2, %v1962_v54  ;;  %v2090_v27 = vld [vmem:[#allocation12 + $0x228] sm:$0x3]  ;;  %v1974_v28 = vld [vmem:[#allocation2 + $0x20] sm:$0x1] }
 0x38b   : > { %2523 = vmatpush.xpose.msra.mxu2 %v2085_v44  ;;  %2483 = vmatpush.xpose.msra.mxu0 %v2083_v48  ;;  %1965 = vst.msk [vmem:[#allocation3 + $0x19] sm:$0x1] %vm3999_vm2, %v1964_v12  ;;  %v1976_v1 = vld [vmem:[#allocation2 + $0x21] sm:$0x1]  ;;  %v2093_v36 = vld [vmem:[#allocation12 + $0x240] sm:$0x3] }
 0x38c   : > { %v1901_v62 = vmax.f32 %v1894_v9, 0.0  ;;  %2503 = vmatpush.xpose.msra.mxu1 %v2084_v52  ;;  %2543 = vmatpush.xpose.msra.mxu3 %v2086_v53  ;;  %1967 = vst.msk [vmem:[#allocation3 + $0x1a] sm:$0x1] %vm3999_vm2, %v1966_v13  ;;  %v2091_v7 = vld [vmem:[#allocation12 + $0x230] sm:$0x3]  ;;  %v2142_v37 = vperm.slane %v4068_v45, 5 }
 0x38d   : > { %1969 = vst.msk [vmem:[#allocation3 + $0x1b] sm:$0x1] %vm3999_vm2, %v1968_v15  ;;  %v1978_v34 = vld [vmem:[#allocation2 + $0x22] sm:$0x1]  ;;  %v1980_v8 = vld [vmem:[#allocation2 + $0x23] sm:$0x1] }
 0x38e   : > { %1908 = vst [vmem:[#allocation2 + $0x2a] sm:$0xff] %v1901_v62  ;;  %v2092_v10 = vld [vmem:[#allocation12 + $0x238] sm:$0x3]  ;;  %v1982_v38 = vld [vmem:[#allocation2 + $0x24] sm:$0x1]  ;;  %v2143_v39 = vperm.slane %v4068_v45, 6 }
 0x38f   : > { %2524 = vmatpush.xpose.msra.mxu2 %v2035_v59  ;;  %2484 = vmatpush.xpose.msra.mxu0 %v2033_v2  ;;  %v1875_v23 = vpop.f32.mrf.mxu3  ;;  %1971 = vst.msk [vmem:[#allocation3 + $0x1c] sm:$0x1] %vm3999_vm2, %v1970_v56  ;;  %v2144_v40 = vperm.slane %v4068_v45, 7  ;;  %v1984_v41 = vld [vmem:[#allocation2 + $0x25] sm:$0x1]  ;;  %v2043_v16 = vld [vmem:[#allocation12 + $0xb0] sm:$0xff] }
 0x390   : > { %2504 = vmatpush.xpose.msra.mxu1 %v2034_v4  ;;  %2544 = vmatpush.xpose.msra.mxu3 %v2036_v6  ;;  %v1884_v25 = vadd.f32 %v1875_v23, %v1815_v49  ;;  %1973 = vst.msk [vmem:[#allocation3 + $0x1d] sm:$0x1] %vm3999_vm2, %v1972_v26  ;;  %v2094_v11 = vld [vmem:[#allocation12 + $0x248] sm:$0x3]  ;;  %v1986_v19 = vld [vmem:[#allocation2 + $0x26] sm:$0x1] }
 0x391   : > { %2405 = vmatmul.f32.vlgmr.msrb.gmra.mxu0 %v2137_v21  ;;  %2425 = vmatmul.f32.vlgmr.msrb.gmra.mxu1 %v2138_v22  ;;  %1975 = vst.msk [vmem:[#allocation3 + $0x1e] sm:$0x1] %vm3999_vm2, %v1974_v28  ;;  %v1988_v42 = vld [vmem:[#allocation2 + $0x27] sm:$0x1]  ;;  %v4101_v43 = vld [vmem:[#allocation3 + $0x10] sm:$0xff]  ;;  %v2042_v20 = vld [vmem:[#allocation12 + $0xa8] sm:$0xff] }
 0x392   : > { %2445 = vmatmul.f32.vlgmr.msrb.gmra.mxu2 %v2139_v33  ;;  %2465 = vmatmul.f32.vlgmr.msrb.gmra.mxu3 %v2140_v0  ;;  %v1895_v3 = vadd.f32 %v3995_v57, %v1884_v25  ;;  %v2040_v57 = vld [vmem:[#allocation12 + $0x98] sm:$0xff]  ;;  %1977 = vst.msk [vmem:[#allocation3 + $0x1f] sm:$0x1] %vm3999_vm2, %v1976_v1  ;;  %v2145_v48 = vperm.slane %v4101_v43, 0  ;;  %v2146_v50 = vperm.slane %v4101_v43, 1  ;;  %v2147_v54 = vperm.slane %v4101_v43, 2 }
 0x393   : > { %2603 = vmatpush.xpose.msrb.mxu2 %v2089_v63  ;;  %2563 = vmatpush.xpose.msrb.mxu0 %v2087_v14  ;;  %1979 = vst.msk [vmem:[#allocation3 + $0x20] sm:$0x1] %vm3999_vm2, %v1978_v34  ;;  %v1990_v44 = vld [vmem:[#allocation2 + $0x28] sm:$0x1]  ;;  %v1992_v46 = vld [vmem:[#allocation2 + $0x29] sm:$0x1] }
 0x394   : > { %v1902_v29 = vmax.f32 %v1895_v3, 0.0  ;;  %2583 = vmatpush.xpose.msrb.mxu1 %v2088_v24  ;;  %2623 = vmatpush.xpose.msrb.mxu3 %v2090_v27  ;;  %1981 = vst.msk [vmem:[#allocation3 + $0x21] sm:$0x1] %vm3999_vm2, %v1980_v8  ;;  %v2097_v17 = vld [vmem:[#allocation12 + $0x260] sm:$0x3]  ;;  %v2148_v9 = vperm.slane %v4101_v43, 3 }
 0x395   : > { %1983 = vst.msk [vmem:[#allocation3 + $0x22] sm:$0x1] %vm3999_vm2, %v1982_v38  ;;  %v2095_v32 = vld [vmem:[#allocation12 + $0x250] sm:$0x3]  ;;  %v2096_v51 = vld [vmem:[#allocation12 + $0x258] sm:$0x3] }
 0x396   : > { %1909 = vst [vmem:[#allocation2 + $0x32] sm:$0x3] %v1902_v29  ;;  %v1994_v52 = vld [vmem:[#allocation2 + $0x2a] sm:$0x1]  ;;  %v1996_v53 = vld [vmem:[#allocation2 + $0x2b] sm:$0x1] }
 0x397   : > { %2604 = vmatpush.xpose.msrb.mxu2 %v2039_v5  ;;  %2564 = vmatpush.xpose.msrb.mxu0 %v2037_v30  ;;  %1985 = vst.msk [vmem:[#allocation3 + $0x23] sm:$0x1] %vm3999_vm2, %v1984_v41  ;;  %v1998_v55 = vld [vmem:[#allocation2 + $0x2c] sm:$0x1]  ;;  %v2098_v58 = vld [vmem:[#allocation12 + $0x268] sm:$0x3] }
 0x398   : > { %2584 = vmatpush.xpose.msrb.mxu1 %v2038_v35  ;;  %2624 = vmatpush.xpose.msrb.mxu3 %v2040_v57  ;;  %1987 = vst.msk [vmem:[#allocation3 + $0x24] sm:$0x1] %vm3999_vm2, %v1986_v19  ;;  %v2000_v59 = vld [vmem:[#allocation2 + $0x2d] sm:$0x1]  ;;  %v2002_v61 = vld [vmem:[#allocation2 + $0x2e] sm:$0x1] }
 0x399   : > { %2485 = vmatmul.f32.vlgmr.msra.gmra.mxu0 %v2141_v47  ;;  %2505 = vmatmul.f32.vlgmr.msra.gmra.mxu1 %v2142_v37  ;;  %1989 = vst.msk [vmem:[#allocation3 + $0x25] sm:$0x1] %vm3999_vm2, %v1988_v42  ;;  %v2004_v62 = vld [vmem:[#allocation2 + $0x2f] sm:$0x1]  ;;  %v2047_v45 = vld [vmem:[#allocation12 + $0xd0] sm:$0xff]  ;;  %v2046_v6 = vld [vmem:[#allocation12 + $0xc8] sm:$0xff] }
 0x39a   : > { %2525 = vmatmul.f32.vlgmr.msra.gmra.mxu2 %v2143_v39  ;;  %2545 = vmatmul.f32.vlgmr.msra.gmra.mxu3 %v2144_v40  ;;  %1991 = vst.msk [vmem:[#allocation3 + $0x26] sm:$0x1] %vm3999_vm2, %v1990_v44  ;;  %v2045_v2 = vld [vmem:[#allocation12 + $0xc0] sm:$0xff]  ;;  %v2048_v12 = vld [vmem:[#allocation12 + $0xd8] sm:$0xff]  ;;  %v2149_v49 = vperm.slane %v4101_v43, 4  ;;  %v2150_v63 = vperm.slane %v4101_v43, 5 }
 0x39b   : > { %2683 = vmatpush.xpose.msra.mxu2 %v2093_v36  ;;  %2643 = vmatpush.xpose.msra.mxu0 %v2091_v7  ;;  %1993 = vst.msk [vmem:[#allocation3 + $0x27] sm:$0x1] %vm3999_vm2, %v1992_v46  ;;  %v2006_v4 = vld [vmem:[#allocation2 + $0x30] sm:$0x1]  ;;  %v2008_v13 = vld [vmem:[#allocation2 + $0x31] sm:$0x1] }
 0x39c   : > { %2663 = vmatpush.xpose.msra.mxu1 %v2092_v10  ;;  %2703 = vmatpush.xpose.msra.mxu3 %v2094_v11  ;;  %1995 = vst.msk [vmem:[#allocation3 + $0x28] sm:$0x1] %vm3999_vm2, %v1994_v52  ;;  %v2151_v15 = vperm.slane %v4101_v43, 6  ;;  %v2152_v21 = vperm.slane %v4101_v43, 7  ;;  %v2101_v22 = vld [vmem:[#allocation12 + $0x280] sm:$0x3] }
 0x39d   : > { %1997 = vst.msk [vmem:[#allocation3 + $0x29] sm:$0x1] %vm3999_vm2, %v1996_v53  ;;  %v2010_v14 = vld [vmem:[#allocation2 + $0x32] sm:$0x1]  ;;  %v2099_v23 = vld [vmem:[#allocation12 + $0x270] sm:$0x3] }
 0x39e   : > { %1999 = vst.msk [vmem:[#allocation3 + $0x2a] sm:$0x1] %vm3999_vm2, %v1998_v55  ;;  %v2012_v24 = vld [vmem:[#allocation2 + $0x33] sm:$0x1]  ;;  %v2100_v56 = vld [vmem:[#allocation12 + $0x278] sm:$0x3] }
 0x39f   : > { %2684 = vmatpush.xpose.msra.mxu2 %v2043_v16  ;;  %2644 = vmatpush.xpose.msra.mxu0 %v2041_v18  ;;  %2001 = vst.msk [vmem:[#allocation3 + $0x2b] sm:$0x1] %vm3999_vm2, %v2000_v59  ;;  %v2102_v33 = vld [vmem:[#allocation12 + $0x288] sm:$0x3]  ;;  %v2051_v25 = vld [vmem:[#allocation12 + $0xf0] sm:$0xff]  ;;  %v2049_v26 = vld [vmem:[#allocation12 + $0xe0] sm:$0xff] }
 0x3a0   : > { %2664 = vmatpush.xpose.msra.mxu1 %v2042_v20  ;;  %2704 = vmatpush.xpose.msra.mxu3 %v2044_v31  ;;  %2003 = vst.msk [vmem:[#allocation3 + $0x2c] sm:$0x1] %vm3999_vm2, %v2002_v61  ;;  %v2017_v0 = vld [vmem:[#allocation3 + $0x18] sm:$0xff]  ;;  %v2052_v28 = vld [vmem:[#allocation12 + $0xf8] sm:$0xff]  ;;  %v2105_v30 = vld [vmem:[#allocation12 + $0x2a0] sm:$0x3] }
 0x3a1   : > { %2565 = vmatmul.f32.vlgmr.msrb.gmra.mxu0 %v2145_v48  ;;  %2585 = vmatmul.f32.vlgmr.msrb.gmra.mxu1 %v2146_v50  ;;  %2005 = vst.msk [vmem:[#allocation3 + $0x2d] sm:$0x1] %vm3999_vm2, %v2004_v62  ;;  %v2050_v27 = vld [vmem:[#allocation12 + $0xe8] sm:$0xff]  ;;  %v2153_v3 = vperm.slane %v2017_v0, 0  ;;  %v2154_v1 = vperm.slane %v2017_v0, 1  ;;  %v2155_v5 = vperm.slane %v2017_v0, 2 }
 0x3a2   : > { %2605 = vmatmul.f32.vlgmr.msrb.gmra.mxu2 %v2147_v54  ;;  %2625 = vmatmul.f32.vlgmr.msrb.gmra.mxu3 %v2148_v9  ;;  %2007 = vst.msk [vmem:[#allocation3 + $0x2e] sm:$0x1] %vm3999_vm2, %v2006_v4  ;;  %v2156_v29 = vperm.slane %v2017_v0, 3  ;;  %v2103_v34 = vld [vmem:[#allocation12 + $0x290] sm:$0x3]  ;;  %v2053_v36 = vld [vmem:[#allocation12 + $0x100] sm:$0xff] }
 0x3a3   : > { %2763 = vmatpush.xpose.msrb.mxu2 %v2097_v17  ;;  %2723 = vmatpush.xpose.msrb.mxu0 %v2095_v32  ;;  %2009 = vst.msk [vmem:[#allocation3 + $0x2f] sm:$0x1] %vm3999_vm2, %v2008_v13  ;;  %v2106_v35 = vld [vmem:[#allocation12 + $0x2a8] sm:$0x3]  ;;  %v2055_v57 = vld [vmem:[#allocation12 + $0x110] sm:$0xff]  ;;  %v2056_v8 = vld [vmem:[#allocation12 + $0x118] sm:$0xff] }
 0x3a4   : > { %2743 = vmatpush.xpose.msrb.mxu1 %v2096_v51  ;;  %2783 = vmatpush.xpose.msrb.mxu3 %v2098_v58  ;;  %2011 = vst.msk [vmem:[#allocation3 + $0x30] sm:$0x1] %vm3999_vm2, %v2010_v14  ;;  %v2054_v7 = vld [vmem:[#allocation12 + $0x108] sm:$0xff]  ;;  %v2157_v47 = vperm.slane %v2017_v0, 4  ;;  %v2158_v37 = vperm.slane %v2017_v0, 5  ;;  %v2159_v10 = vperm.slane %v2017_v0, 6 }
 0x3a5   : > { %2013 = vst.msk [vmem:[#allocation3 + $0x31] sm:$0x1] %vm3999_vm2, %v2012_v24  ;;  %v2160_v38 = vperm.slane %v2017_v0, 7  ;;  %v2109_v39 = vld [vmem:[#allocation12 + $0x2c0] sm:$0x3]  ;;  %v2018_v19 = vld [vmem:[#allocation3 + $0x20] sm:$0xff] }
 0x3a6   : > { %v2107_v40 = vld [vmem:[#allocation12 + $0x2b0] sm:$0x3]  ;;  %v2108_v41 = vld [vmem:[#allocation12 + $0x2b8] sm:$0x3]  ;;  %v2110_v11 = vld [vmem:[#allocation12 + $0x2c8] sm:$0x3] }
 0x3a7   : > { %2764 = vmatpush.xpose.msrb.mxu2 %v2047_v45  ;;  %2724 = vmatpush.xpose.msrb.mxu0 %v2045_v2  ;;  %v2059_v42 = vld [vmem:[#allocation12 + $0x130] sm:$0xff]  ;;  %v2057_v43 = vld [vmem:[#allocation12 + $0x120] sm:$0xff]  ;;  %v2058_v44 = vld [vmem:[#allocation12 + $0x128] sm:$0xff]  ;;  %v2161_v18 = vperm.slane %v2018_v19, 0  ;;  %v2162_v46 = vperm.slane %v2018_v19, 1  ;;  %v2163_v20 = vperm.slane %v2018_v19, 2 }
 0x3a8   : > { %2744 = vmatpush.xpose.msrb.mxu1 %v2046_v6  ;;  %2784 = vmatpush.xpose.msrb.mxu3 %v2048_v12  ;;  %v2060_v16 = vld [vmem:[#allocation12 + $0x138] sm:$0xff]  ;;  %v2164_v31 = vperm.slane %v2018_v19, 3  ;;  %v2113_v48 = vld [vmem:[#allocation12 + $0x2e0] sm:$0x3]  ;;  %v2111_v50 = vld [vmem:[#allocation12 + $0x2d0] sm:$0x3] }
 0x3a9   : > { %2645 = vmatmul.f32.vlgmr.msra.gmra.mxu0 %v2149_v49  ;;  %2665 = vmatmul.f32.vlgmr.msra.gmra.mxu1 %v2150_v63  ;;  %v2112_v17 = vld [vmem:[#allocation12 + $0x2d8] sm:$0x3]  ;;  %v2114_v32 = vld [vmem:[#allocation12 + $0x2e8] sm:$0x3]  ;;  %v2063_v51 = vld [vmem:[#allocation12 + $0x150] sm:$0xff]  ;;  %v2165_v9 = vperm.slane %v2018_v19, 4 }
 0x3aa   : > { %2685 = vmatmul.f32.vlgmr.msra.gmra.mxu2 %v2151_v15  ;;  %2705 = vmatmul.f32.vlgmr.msra.gmra.mxu3 %v2152_v21  ;;  %v2061_v52 = vld [vmem:[#allocation12 + $0x140] sm:$0xff]  ;;  %v2062_v53 = vld [vmem:[#allocation12 + $0x148] sm:$0xff]  ;;  %v2064_v54 = vld [vmem:[#allocation12 + $0x158] sm:$0xff]  ;;  %v2166_v55 = vperm.slane %v2018_v19, 5  ;;  %v2167_v58 = vperm.slane %v2018_v19, 6  ;;  %v2168_v59 = vperm.slane %v2018_v19, 7 }
 0x3ab   : > { %2843 = vmatpush.xpose.msra.mxu2 %v2101_v22  ;;  %2803 = vmatpush.xpose.msra.mxu0 %v2099_v23  ;;  %v2117_v61 = vld [vmem:[#allocation12 + $0x300] sm:$0x3]  ;;  %v2115_v62 = vld [vmem:[#allocation12 + $0x2f0] sm:$0x3]  ;;  %v2116_v45 = vld [vmem:[#allocation12 + $0x2f8] sm:$0x3] }
 0x3ac   : > { %2823 = vmatpush.xpose.msra.mxu1 %v2100_v56  ;;  %2863 = vmatpush.xpose.msra.mxu3 %v2102_v33  ;;  %v2118_v2 = vld [vmem:[#allocation12 + $0x308] sm:$0x3]  ;;  %v2019_v4 = vld [vmem:[#allocation3 + $0x28] sm:$0xff]  ;;  %v2065_v12 = vld [vmem:[#allocation12 + $0x160] sm:$0xff] }
 0x3ad   : > { %v2067_v6 = vld [vmem:[#allocation12 + $0x170] sm:$0xff]  ;;  %v2066_v13 = vld [vmem:[#allocation12 + $0x168] sm:$0xff]  ;;  %v2068_v49 = vld [vmem:[#allocation12 + $0x178] sm:$0xff]  ;;  %v2169_v63 = vperm.slane %v2019_v4, 0  ;;  %v2170_v14 = vperm.slane %v2019_v4, 1  ;;  %v2171_v15 = vperm.slane %v2019_v4, 2 }
 0x3ae   : > { %v2172_v21 = vperm.slane %v2019_v4, 3  ;;  %v2119_v22 = vld [vmem:[#allocation12 + $0x310] sm:$0x3]  ;;  %v2120_v23 = vld [vmem:[#allocation12 + $0x318] sm:$0x3]  ;;  %v2069_v24 = vld [vmem:[#allocation12 + $0x180] sm:$0xff] }
 0x3af   : > { %2844 = vmatpush.xpose.msra.mxu2 %v2051_v25  ;;  %2804 = vmatpush.xpose.msra.mxu0 %v2049_v26  ;;  %v2070_v56 = vld [vmem:[#allocation12 + $0x188] sm:$0xff]  ;;  %v2173_v33 = vperm.slane %v2019_v4, 4  ;;  %v2174_v0 = vperm.slane %v2019_v4, 5  ;;  %v2175_v25 = vperm.slane %v2019_v4, 6  ;;  %v2176_v26 = vperm.slane %v2019_v4, 7 }
 0x3b0   : > { %2824 = vmatpush.xpose.msra.mxu1 %v2050_v27  ;;  %2864 = vmatpush.xpose.msra.mxu3 %v2052_v28  ;;  %v2020_v27 = vld [vmem:[#allocation3 + $0x30] sm:$0x3] }
 0x3b1   : > { %2725 = vmatmul.f32.vlgmr.msrb.gmra.mxu0 %v2153_v3  ;;  %2745 = vmatmul.f32.vlgmr.msrb.gmra.mxu1 %v2154_v1  ;;  %v2177_v28 = vperm.slane %v2020_v27, 0  ;;  %v2178_v3 = vperm.slane %v2020_v27, 1  ;;  %v2121_v1 = vld [vmem:[%s4186_s10] sm:$0x1] }
 0x3b2   : > { %2765 = vmatmul.f32.vlgmr.msrb.gmra.mxu2 %v2155_v5  ;;  %2785 = vmatmul.f32.vlgmr.msrb.gmra.mxu3 %v2156_v29 }
 0x3b3   : > { %2923 = vmatpush.xpose.msrb.mxu2 %v2105_v30  ;;  %2883 = vmatpush.xpose.msrb.mxu0 %v2103_v34 }
 0x3b4   : > { %2903 = vmatpush.xpose.msrb.mxu1 %v2104_v60  ;;  %2943 = vmatpush.xpose.msrb.mxu3 %v2106_v35 }
 0x3b7   : > { %2924 = vmatpush.xpose.msrb.mxu2 %v2055_v57  ;;  %2884 = vmatpush.xpose.msrb.mxu0 %v2053_v36 }
 0x3b8   : > { %2904 = vmatpush.xpose.msrb.mxu1 %v2054_v7  ;;  %2944 = vmatpush.xpose.msrb.mxu3 %v2056_v8 }
 0x3b9   : > { %2805 = vmatmul.f32.vlgmr.msra.gmra.mxu0 %v2157_v47  ;;  %2825 = vmatmul.f32.vlgmr.msra.gmra.mxu1 %v2158_v37 }
 0x3ba   : > { %2845 = vmatmul.f32.vlgmr.msra.gmra.mxu2 %v2159_v10  ;;  %2865 = vmatmul.f32.vlgmr.msra.gmra.mxu3 %v2160_v38 }
 0x3bb   : > { %3003 = vmatpush.xpose.msra.mxu2 %v2109_v39  ;;  %2963 = vmatpush.xpose.msra.mxu0 %v2107_v40 }
 0x3bc   : > { %2983 = vmatpush.xpose.msra.mxu1 %v2108_v41  ;;  %3023 = vmatpush.xpose.msra.mxu3 %v2110_v11 }
 0x3bf   : > { %3004 = vmatpush.xpose.msra.mxu2 %v2059_v42  ;;  %2964 = vmatpush.xpose.msra.mxu0 %v2057_v43 }
 0x3c0   : > { %2984 = vmatpush.xpose.msra.mxu1 %v2058_v44  ;;  %3024 = vmatpush.xpose.msra.mxu3 %v2060_v16 }
 0x3c1   : > { %2885 = vmatmul.f32.vlgmr.msrb.gmra.mxu0 %v2161_v18  ;;  %2905 = vmatmul.f32.vlgmr.msrb.gmra.mxu1 %v2162_v46 }
 0x3c2   : > { %2925 = vmatmul.f32.vlgmr.msrb.gmra.mxu2 %v2163_v20  ;;  %2945 = vmatmul.f32.vlgmr.msrb.gmra.mxu3 %v2164_v31 }
 0x3c3   : > { %3083 = vmatpush.xpose.msrb.mxu2 %v2113_v48  ;;  %3043 = vmatpush.xpose.msrb.mxu0 %v2111_v50 }
 0x3c4   : > { %3063 = vmatpush.xpose.msrb.mxu1 %v2112_v17  ;;  %3103 = vmatpush.xpose.msrb.mxu3 %v2114_v32 }
 0x3c7   : > { %3084 = vmatpush.xpose.msrb.mxu2 %v2063_v51  ;;  %3044 = vmatpush.xpose.msrb.mxu0 %v2061_v52 }
 0x3c8   : > { %3064 = vmatpush.xpose.msrb.mxu1 %v2062_v53  ;;  %3104 = vmatpush.xpose.msrb.mxu3 %v2064_v54 }
 0x3c9   : > { %2965 = vmatmul.f32.vlgmr.msra.gmra.mxu0 %v2165_v9  ;;  %2985 = vmatmul.f32.vlgmr.msra.gmra.mxu1 %v2166_v55 }
 0x3ca   : > { %3005 = vmatmul.f32.vlgmr.msra.gmra.mxu2 %v2167_v58  ;;  %3025 = vmatmul.f32.vlgmr.msra.gmra.mxu3 %v2168_v59 }
 0x3cb   : > { %3163 = vmatpush.xpose.msra.mxu2 %v2117_v61  ;;  %3123 = vmatpush.xpose.msra.mxu0 %v2115_v62 }
 0x3cc   : > { %3143 = vmatpush.xpose.msra.mxu1 %v2116_v45  ;;  %3183 = vmatpush.xpose.msra.mxu3 %v2118_v2 }
 0x3cf   : > { %3164 = vmatpush.xpose.msra.mxu2 %v2067_v6  ;;  %3124 = vmatpush.xpose.msra.mxu0 %v2065_v12 }
 0x3d0   : > { %3144 = vmatpush.xpose.msra.mxu1 %v2066_v13  ;;  %3184 = vmatpush.xpose.msra.mxu3 %v2068_v49 }
 0x3d1   : > { %3045 = vmatmul.f32.vlgmr.msrb.gmra.mxu0 %v2169_v63  ;;  %3065 = vmatmul.f32.vlgmr.msrb.gmra.mxu1 %v2170_v14 }
 0x3d2   : > { %3085 = vmatmul.f32.vlgmr.msrb.gmra.mxu2 %v2171_v15  ;;  %3105 = vmatmul.f32.vlgmr.msrb.gmra.mxu3 %v2172_v21 }
 0x3d3   : > { %3203 = vmatpush.xpose.msrb.mxu0 %v2119_v22 }
 0x3d4   : > { %3223 = vmatpush.xpose.msrb.mxu1 %v2120_v23 }
 0x3d7   : > { %3204 = vmatpush.xpose.msrb.mxu0 %v2069_v24 }
 0x3d8   : > { %3224 = vmatpush.xpose.msrb.mxu1 %v2070_v56 }
 0x3d9   : > { %3125 = vmatmul.f32.vlgmr.msra.gmra.mxu0 %v2173_v33  ;;  %3145 = vmatmul.f32.vlgmr.msra.gmra.mxu1 %v2174_v0 }
 0x3da   : > { %3165 = vmatmul.f32.vlgmr.msra.gmra.mxu2 %v2175_v25  ;;  %3185 = vmatmul.f32.vlgmr.msra.gmra.mxu3 %v2176_v26 }
 0x3e1   : > { %3205 = vmatmul.f32.vlgmr.msrb.gmra.mxu0 %v2177_v28  ;;  %3225 = vmatmul.f32.vlgmr.msrb.gmra.mxu1 %v2178_v3 }
 0x3fe   : > { %v2246_v5 = vpop.f32.mrf.mxu0  ;;  %v2266_v29 = vpop.f32.mrf.mxu1 }
 0x3ff   : > { %v2247_v30 = vadd.f32 %v2246_v5, %v2121_v1 }
 0x401   : > { %v2267_v34 = vadd.f32 %v2266_v29, %v2247_v30 }
 0x405   : > { %v2286_v60 = vpop.f32.mrf.mxu2  ;;  %v2306_v35 = vpop.f32.mrf.mxu3 }
 0x406   : > { %v2287_v57 = vadd.f32 %v2286_v60, %v2267_v34  ;;  %v2326_v36 = vpop.f32.mrf.mxu0  ;;  %v2346_v7 = vpop.f32.mrf.mxu1 }
 0x408   : > { %v2307_v8 = vadd.f32 %v2306_v35, %v2287_v57 }
 0x40a   : > { %v2327_v47 = vadd.f32 %v2326_v36, %v2307_v8 }
 0x40c   : > { %v2347_v37 = vadd.f32 %v2346_v7, %v2327_v47 }
 0x40d   : > { %v2366_v10 = vpop.f32.mrf.mxu2  ;;  %v2386_v38 = vpop.f32.mrf.mxu3 }
 0x40e   : > { %v2367_v39 = vadd.f32 %v2366_v10, %v2347_v37  ;;  %v2406_v40 = vpop.f32.mrf.mxu0  ;;  %v2426_v41 = vpop.f32.mrf.mxu1 }
 0x410   : > { %v2387_v11 = vadd.f32 %v2386_v38, %v2367_v39 }
 0x412   : > { %v2407_v19 = vadd.f32 %v2406_v40, %v2387_v11 }
 0x414   : > { %v2427_v42 = vadd.f32 %v2426_v41, %v2407_v19 }
 0x415   : > { %v2446_v43 = vpop.f32.mrf.mxu2  ;;  %v2466_v44 = vpop.f32.mrf.mxu3 }
 0x416   : > { %v2447_v16 = vadd.f32 %v2446_v43, %v2427_v42  ;;  %v2486_v18 = vpop.f32.mrf.mxu0  ;;  %v2506_v46 = vpop.f32.mrf.mxu1 }
 0x418   : > { %v2467_v20 = vadd.f32 %v2466_v44, %v2447_v16 }
 0x41a   : > { %v2487_v31 = vadd.f32 %v2486_v18, %v2467_v20 }
 0x41c   : > { %v2507_v48 = vadd.f32 %v2506_v46, %v2487_v31 }
 0x41d   : > { %v2526_v50 = vpop.f32.mrf.mxu2  ;;  %v2546_v17 = vpop.f32.mrf.mxu3 }
 0x41e   : > { %v2527_v32 = vadd.f32 %v2526_v50, %v2507_v48  ;;  %v2566_v51 = vpop.f32.mrf.mxu0  ;;  %v2586_v52 = vpop.f32.mrf.mxu1 }
 0x420   : > { %v2547_v53 = vadd.f32 %v2546_v17, %v2527_v32 }
 0x422   : > { %v2567_v54 = vadd.f32 %v2566_v51, %v2547_v53 }
 0x424   : > { %v2587_v9 = vadd.f32 %v2586_v52, %v2567_v54 }
 0x425   : > { %v2606_v55 = vpop.f32.mrf.mxu2  ;;  %v2626_v58 = vpop.f32.mrf.mxu3 }
 0x426   : > { %v2607_v59 = vadd.f32 %v2606_v55, %v2587_v9  ;;  %v2646_v61 = vpop.f32.mrf.mxu0  ;;  %v2666_v62 = vpop.f32.mrf.mxu1 }
 0x428   : > { %v2627_v45 = vadd.f32 %v2626_v58, %v2607_v59 }
 0x42a   : > { %v2647_v2 = vadd.f32 %v2646_v61, %v2627_v45 }
 0x42c   : > { %v2667_v4 = vadd.f32 %v2666_v62, %v2647_v2 }
 0x42d   : > { %v2686_v6 = vpop.f32.mrf.mxu2  ;;  %v2706_v12 = vpop.f32.mrf.mxu3 }
 0x42e   : > { %v2687_v13 = vadd.f32 %v2686_v6, %v2667_v4  ;;  %v2726_v49 = vpop.f32.mrf.mxu0  ;;  %v2746_v63 = vpop.f32.mrf.mxu1 }
 0x430   : > { %v2707_v14 = vadd.f32 %v2706_v12, %v2687_v13 }
 0x432   : > { %v2727_v15 = vadd.f32 %v2726_v49, %v2707_v14 }
 0x434   : > { %v2747_v21 = vadd.f32 %v2746_v63, %v2727_v15 }
 0x435   : > { %v2766_v22 = vpop.f32.mrf.mxu2  ;;  %v2786_v23 = vpop.f32.mrf.mxu3 }
 0x436   : > { %v2767_v24 = vadd.f32 %v2766_v22, %v2747_v21  ;;  %v2806_v56 = vpop.f32.mrf.mxu0  ;;  %v2826_v33 = vpop.f32.mrf.mxu1 }
 0x438   : > { %v2787_v0 = vadd.f32 %v2786_v23, %v2767_v24 }
 0x43a   : > { %v2807_v25 = vadd.f32 %v2806_v56, %v2787_v0 }
 0x43c   : > { %v2827_v26 = vadd.f32 %v2826_v33, %v2807_v25 }
 0x43d   : > { %v2846_v27 = vpop.f32.mrf.mxu2  ;;  %v2866_v28 = vpop.f32.mrf.mxu3 }
 0x43e   : > { %v2847_v3 = vadd.f32 %v2846_v27, %v2827_v26  ;;  %v2886_v1 = vpop.f32.mrf.mxu0  ;;  %v2906_v5 = vpop.f32.mrf.mxu1 }
 0x440   : > { %v2867_v29 = vadd.f32 %v2866_v28, %v2847_v3 }
 0x442   : > { %v2887_v30 = vadd.f32 %v2886_v1, %v2867_v29 }
 0x444   : > { %v2907_v34 = vadd.f32 %v2906_v5, %v2887_v30 }
 0x445   : > { %v2926_v60 = vpop.f32.mrf.mxu2  ;;  %v2946_v35 = vpop.f32.mrf.mxu3 }
 0x446   : > { %v2927_v57 = vadd.f32 %v2926_v60, %v2907_v34  ;;  %v2966_v36 = vpop.f32.mrf.mxu0  ;;  %v2986_v7 = vpop.f32.mrf.mxu1 }
 0x448   : > { %v2947_v8 = vadd.f32 %v2946_v35, %v2927_v57 }
 0x44a   : > { %v2967_v47 = vadd.f32 %v2966_v36, %v2947_v8 }
 0x44c   : > { %v2987_v37 = vadd.f32 %v2986_v7, %v2967_v47 }
 0x44d   : > { %v3006_v10 = vpop.f32.mrf.mxu2  ;;  %v3026_v38 = vpop.f32.mrf.mxu3 }
 0x44e   : > { %v3007_v39 = vadd.f32 %v3006_v10, %v2987_v37  ;;  %v3046_v40 = vpop.f32.mrf.mxu0  ;;  %v3066_v41 = vpop.f32.mrf.mxu1 }
 0x450   : > { %v3027_v11 = vadd.f32 %v3026_v38, %v3007_v39 }
 0x452   : > { %v3047_v19 = vadd.f32 %v3046_v40, %v3027_v11 }
 0x454   : > { %v3067_v42 = vadd.f32 %v3066_v41, %v3047_v19 }
 0x455   : > { %v3086_v43 = vpop.f32.mrf.mxu2  ;;  %v3106_v44 = vpop.f32.mrf.mxu3 }
 0x456   : > { %v3087_v16 = vadd.f32 %v3086_v43, %v3067_v42  ;;  %v3126_v18 = vpop.f32.mrf.mxu0  ;;  %v3146_v20 = vpop.f32.mrf.mxu1 }
 0x458   : > { %v3107_v46 = vadd.f32 %v3106_v44, %v3087_v16 }
 0x45a   : > { %v3127_v31 = vadd.f32 %v3126_v18, %v3107_v46 }
 0x45c   : > { %v3147_v48 = vadd.f32 %v3146_v20, %v3127_v31 }
 0x45d   : > { %v3166_v50 = vpop.f32.mrf.mxu2  ;;  %v3186_v32 = vpop.f32.mrf.mxu3 }
 0x45e   : > { %v3167_v17 = vadd.f32 %v3166_v50, %v3147_v48  ;;  %v3206_v52 = vpop.f32.mrf.mxu0  ;;  %v3226_v54 = vpop.f32.mrf.mxu1 }
 0x460   : > { %v3187_v51 = vadd.f32 %v3186_v32, %v3167_v17 }
 0x462   : > { %v3207_v53 = vadd.f32 %v3206_v52, %v3187_v51 }
 0x464   : > { %v3227_v9 = vadd.f32 %v3226_v54, %v3207_v53 }
 0x466   : > { %3230 = vst.msk [vmem:[%s461_s23] sm:$0x1] %vm3229_vm3, %v3227_v9 }
 0x467   : > { %3643 = shalt.err (!%p3640_p8)
}
 0x468   : > { %3387 = dma.vmem_to_hbm [thread:$0]  (%p3800_p5), %s3243_s28, 16, %s3245_s29, %s3232_s22  }
 0x469 PF: > { %s4208_s15 = sld [smem:[#allocation18_spill]]  ;;  %p3419_p9 = scmp.ge.s32.totalorder %s3690_s20, 2 }
 0x46b   : > { %p3406_p10 = pnand %p3419_p9, %p3804_p6 }
 0x46d   : > { %p3407_p11 = pneg %p3406_p10 }
 0x46f   : > { %s3256_s19 = sand.u32 1, %s4208_s15  }
 0x470   : > { %s3257_s16 = scalar_lea.sflag [#allocation6], %s3256_s19 }
 0x471   : > { %3673 = dma.done.wait (%p3407_p11), %s3257_s16, 16  }
 0x472   : > { %3675 = vsyncadd (%p3407_p11), %s3257_s16, 4294967280  ;;  %s4210_s20 = sld [smem:[#allocation20_spill]]  ;;  %s4213_s17 = smov %s3682_s18 }
 0x473   : > { %s4211_s24 = sld [smem:[#allocation19_spill]] }
 0x474   : > { %s4212_s19 = sld [smem:[#allocation21_spill]] }
 0x478   : > { %p24_p12 = scmp.ge.s32.totalorder %s4210_s20, 4  }
 0x479   : > { %s4214_s18 = smov %s4211_s24 }
 0x47a   :  { %26 = sbr.rel (!%p24_p12) target bundleno = 9 (0x9), region = 136 }
 0x47f   :  { %3262 = vsyncpa [#allocation5], 1 }
 0x480   :  { %3264 = vsyncpa [#allocation5 + $0x1], 1 }
 0x481   :  { %3265 = vsyncpa [#allocation8], 1 }
 0x482   :  { %3266 = vsyncpa [#allocation11], 1 }
 0x483   :  { %3267 = vsyncpa [#allocation6], 1 }
 0x484   :  { %3269 = vsyncpa [#allocation6 + $0x1], 1 }

</bundles_post_ra>
